<compile_context>
chip_gen: v6e
topology: v6e:2x2x1
jax: 0.10.0
libtpu: 0.0.40
codegen_flags: <defaults>
</compile_context>

<pallas_src>
import jax
import jax.numpy as jnp
from jax.experimental import pallas as pl
from jax.experimental.pallas import tpu as pltpu


# ----------------------------------------------------------------------------
# Fused Inception forward: one Pallas kernel for the whole block.
# ----------------------------------------------------------------------------
@jax.jit
def inception_forward_pallas(x_nchw, params):
    N, Cin, H, W = x_nchw.shape
    P = H * W
    LPAD = 128  # lane zero-padding for shifted taps (>= max shift 2*W+2), 128-aligned

    # NCHW -> (N, C, H*W): pure reshape, no transpose needed in this layout.
    x = x_nchw.reshape(N, Cin, P).astype(jnp.float32)

    def flat_w(w):
        # PyTorch OIHW (Cout, Cin, K, K) -> (Cout, K*K*Cin), rows ordered (ky, kx, cin)
        cout, cin, k, _ = w.shape
        return jnp.transpose(w, (0, 2, 3, 1)).reshape(cout, k * k * cin)

    w311, b311 = params["b3_1"]
    w32, b32 = params["b3_2"]
    w33, b33 = params["b3_3"]
    w511, b511 = params["b5_1"]
    w52, b52 = params["b5_2"]
    w11, b11 = params["b1"]
    wbp, bbp = params["bp"]

    # Fuse the three 1x1 convs that read x directly into one weight matrix:
    # output rows [0:16] = branch3x3_1, [16:32] = branch5x5_1, [32:48] = branch1x1.
    w1cat = jnp.concatenate(
        [w311[:, :, 0, 0], w511[:, :, 0, 0], w11[:, :, 0, 0]], axis=0)   # (48, Cin)
    b1cat = jnp.concatenate([b311, b511, b11])[:, None]                  # (48, 1)

    args = (
        x,                                   # (N, Cin, P)
        w1cat, b1cat,                        # (48, Cin), (48, 1)
        flat_w(w32), b32[:, None],           # (24, 144), (24, 1)
        flat_w(w33), b33[:, None],           # (24, 216), (24, 1)
        flat_w(w52), b52[:, None],           # (24, 400), (24, 1)
        wbp[:, :, 0, 0], bbp[:, None],       # (24, Cin), (24, 1)
    )

    def kernel(x_ref, w1_ref, b1_ref, w32_ref, b32_ref, w33_ref, b33_ref,
               w52_ref, b52_ref, wbp_ref, bbp_ref, o_ref):
        xcp = x_ref[0]                                              # (Cin, P)

        # x-coordinate (position within an image row) of each flattened pixel.
        col = jax.lax.broadcasted_iota(jnp.int32, (1, P), 1)
        colx = col % W

        def shifted_taps(a, K):
            # a: (C, P).  Returns the K*K taps of the "same" KxK window:
            #   tap[(ky,kx)][c, i] = a[c, i + (ky-p)*W + (kx-p)]   (0 when OOB).
            # Vertical out-of-range lands in the 128-lane zero pad; horizontal
            # wrap-around across image rows is killed with a per-column mask.
            p = (K - 1) // 2
            C = a.shape[0]
            zpad = jnp.zeros((C, LPAD), jnp.float32)
            apad = jnp.concatenate([zpad, a, zpad], axis=1)         # (C, P+2*LPAD)
            taps = []
            for ky in range(K):
                for kx in range(K):
                    dy, dx = ky - p, kx - p
                    d = dy * W + dx
                    t = apad[:, LPAD + d:LPAD + d + P]              # static lane slice
                    if dx != 0:
                        ok = (colx + dx >= 0) & (colx + dx < W)
                        t = jnp.where(ok, t, jnp.zeros_like(t))
                    taps.append(t)
            return taps

        def conv_same(a, w_ref, b_ref, K):
            # Single MXU matmul with contraction K*K*C (im2col patch built in VMEM).
            patch = jnp.concatenate(shifted_taps(a, K), axis=0)     # (K*K*C, P)
            return jnp.dot(w_ref[...], patch,
                           preferred_element_type=jnp.float32) + b_ref[...]

        # Fused 1x1 convs on x (reads x once, one matmul for three branches).
        y1 = jnp.dot(w1_ref[...], xcp,
                     preferred_element_type=jnp.float32) + b1_ref[...]      # (48, P)

        # branch3x3: 1x1 -> 3x3 -> 3x3
        b3 = conv_same(y1[0:16, :], w32_ref, b32_ref, 3)            # (24, P)
        b3 = conv_same(b3, w33_ref, b33_ref, 3)                     # (24, P)

        # branch5x5: 1x1 -> 5x5
        b5 = conv_same(y1[16:32, :], w52_ref, b52_ref, 5)           # (24, P)

        # branch1x1
        b1o = y1[32:48, :]                                          # (16, P)

        # branch_pool: avg_pool2d(3, stride=1, pad=1, count_include_pad=True)
        # as 9 shifted VPU adds (no MXU / no conv), then a 1x1 conv.
        ptaps = shifted_taps(xcp, 3)
        pooled = ptaps[0]
        for t in ptaps[1:]:
            pooled = pooled + t
        pooled = pooled * (1.0 / 9.0)                               # (Cin, P)
        bp = jnp.dot(wbp_ref[...], pooled,
                     preferred_element_type=jnp.float32) + bbp_ref[...]     # (24, P)

        # Channel-concat [b3 | b5 | b1 | bp] -> (88, P).  P = 256 lanes => every
        # store is a full, unmasked vst (lane-dense output).
        o_ref[0] = jnp.concatenate([b3, b5, b1o, bp], axis=0).astype(o_ref.dtype)

    in_specs = [pl.BlockSpec((1, Cin, P), lambda n: (n, 0, 0))]
    # Weights/biases: whole (tiny) arrays, constant index_map -> fetched once.
    in_specs += [pl.BlockSpec(a.shape, lambda n: (0, 0)) for a in args[1:]]

    out = pl.pallas_call(
        kernel,
        out_shape=jax.ShapeDtypeStruct((N, 88, P), jnp.float32),
        grid=(N,),
        in_specs=in_specs,
        out_specs=pl.BlockSpec((1, 88, P), lambda n: (n, 0, 0)),
        compiler_params=pltpu.CompilerParams(
            # Batch axis is parallel -> both TensorCores get work on v7x.
            dimension_semantics=("parallel",),
        ),
    )(*args)

    # Already channel-major (NCHW ordered): just restore the spatial dims.
    return out.reshape(N, 88, H, W)


# ----------------------------------------------------------------------------
# Pure-JAX reference (correctness check only).
# ----------------------------------------------------------------------------
def inception_forward_ref(x, params):
    def conv(v, w, b):
        k = w.shape[-1]
        pad = (k - 1) // 2
        out = jax.lax.conv_general_dilated(
            v, w, (1, 1), [(pad, pad), (pad, pad)],
            dimension_numbers=("NCHW", "OIHW", "NCHW"),
            precision=jax.lax.Precision.HIGHEST)
        return out + b[None, :, None, None]

    b3 = conv(conv(conv(x, *params["b3_1"]), *params["b3_2"]), *params["b3_3"])
    b5 = conv(conv(x, *params["b5_1"]), *params["b5_2"])
    b1 = conv(x, *params["b1"])
    cin = x.shape[1]
    # avg_pool2d(3,1,1, count_include_pad=True) == conv with identity/9 weights.
    pw = jnp.tile((jnp.eye(cin, dtype=jnp.float32) / 9.0)[:, :, None, None],
                  (1, 1, 3, 3))
    bp = conv(conv(x, pw, jnp.zeros((cin,), jnp.float32)), *params["bp"])
    return jnp.concatenate([b3, b5, b1, bp], axis=1)  # 24+24+16+24 = 88 channels


# ----------------------------------------------------------------------------
# Deterministic parameter init (PyTorch Conv2d default: U(-1/sqrt(fan_in), ..)),
# weights in PyTorch OIHW layout.
# ----------------------------------------------------------------------------
def init_params(key, in_channels):
    def conv_init(k, ksize, cin, cout):
        kw, kb = jax.random.split(k)
        bound = 1.0 / float(cin * ksize * ksize) ** 0.5
        w = jax.random.uniform(kw, (cout, cin, ksize, ksize), jnp.float32,
                               -bound, bound)
        b = jax.random.uniform(kb, (cout,), jnp.float32, -bound, bound)
        return w, b

    ks = jax.random.split(key, 7)
    return {
        "b3_1": conv_init(ks[0], 1, in_channels, 16),
        "b3_2": conv_init(ks[1], 3, 16, 24),
        "b3_3": conv_init(ks[2], 3, 24, 24),
        "b5_1": conv_init(ks[3], 1, in_channels, 16),
        "b5_2": conv_init(ks[4], 5, 16, 24),
        "b1":   conv_init(ks[5], 1, in_channels, 16),
        "bp":   conv_init(ks[6], 1, in_channels, 24),
    }


if __name__ == "__main__":
    key = jax.random.PRNGKey(0)
    kx, kp = jax.random.split(key)

    N, C, H, W = 2, 4, 16, 16  # small NCHW input, as in the PyTorch module
    x = jax.random.normal(kx, (N, C, H, W), jnp.float32)
    params = init_params(kp, C)

    out = jax.block_until_ready(inception_forward_pallas(x, params))
    ref = jax.block_until_ready(inception_forward_ref(x, params))

    assert out.shape == (N, 88, H, W), out.shape
    max_err = float(jnp.max(jnp.abs(out - ref)))
    assert jnp.allclose(out, ref, atol=2e-4, rtol=2e-4), max_err
    print("KERNEL_OK")
</pallas_src>

<mosaic_0001>
module attributes {stable_mosaic.version = 11 : i64} {
  func.func @kernel(%arg0: i32, %arg1: memref<1x4x256xf32, #tpu.memory_space<vmem>>, %arg2: memref<48x4xf32, #tpu.memory_space<vmem>>, %arg3: memref<48x1xf32, #tpu.memory_space<vmem>>, %arg4: memref<24x144xf32, #tpu.memory_space<vmem>>, %arg5: memref<24x1xf32, #tpu.memory_space<vmem>>, %arg6: memref<24x216xf32, #tpu.memory_space<vmem>>, %arg7: memref<24x1xf32, #tpu.memory_space<vmem>>, %arg8: memref<24x400xf32, #tpu.memory_space<vmem>>, %arg9: memref<24x1xf32, #tpu.memory_space<vmem>>, %arg10: memref<24x4xf32, #tpu.memory_space<vmem>>, %arg11: memref<24x1xf32, #tpu.memory_space<vmem>>, %arg12: memref<1x88x256xf32, #tpu.memory_space<vmem>>) attributes {dimension_semantics = [#tpu.dimension_semantics<parallel>], iteration_bounds = array<i64: 2>, scalar_prefetch = 0 : i64, scratch_operands = 0 : i64, tpu.core_type = #tpu.core_type<tc>, window_params = [{transform_indices = @transform_0, window_bounds = array<i64: 1, 4, 256>}, {pipeline_mode = #tpu.pipeline_mode<synchronous>, transform_indices = @transform_1, window_bounds = array<i64: 48, 4>}, {pipeline_mode = #tpu.pipeline_mode<synchronous>, transform_indices = @transform_2, window_bounds = array<i64: 48, 1>}, {pipeline_mode = #tpu.pipeline_mode<synchronous>, transform_indices = @transform_3, window_bounds = array<i64: 24, 144>}, {pipeline_mode = #tpu.pipeline_mode<synchronous>, transform_indices = @transform_4, window_bounds = array<i64: 24, 1>}, {pipeline_mode = #tpu.pipeline_mode<synchronous>, transform_indices = @transform_5, window_bounds = array<i64: 24, 216>}, {pipeline_mode = #tpu.pipeline_mode<synchronous>, transform_indices = @transform_6, window_bounds = array<i64: 24, 1>}, {pipeline_mode = #tpu.pipeline_mode<synchronous>, transform_indices = @transform_7, window_bounds = array<i64: 24, 400>}, {pipeline_mode = #tpu.pipeline_mode<synchronous>, transform_indices = @transform_8, window_bounds = array<i64: 24, 1>}, {pipeline_mode = #tpu.pipeline_mode<synchronous>, transform_indices = @transform_9, window_bounds = array<i64: 24, 4>}, {pipeline_mode = #tpu.pipeline_mode<synchronous>, transform_indices = @transform_10, window_bounds = array<i64: 24, 1>}, {transform_indices = @transform_11, window_bounds = array<i64: 1, 88, 256>}]} {
    %c0 = arith.constant 0 : index
    %c0_0 = arith.constant 0 : index
    %c0_1 = arith.constant 0 : index
    %0 = vector.load %arg1[%c0, %c0_0, %c0_1] : memref<1x4x256xf32, #tpu.memory_space<vmem>>, vector<1x4x256xf32>
    %1 = vector.shape_cast %0 : vector<1x4x256xf32> to vector<4x256xf32>
    %2 = tpu.iota {dimensions = array<i32: 1>} : vector<1x256xi32>
    %c16_i32 = arith.constant 16 : i32
    %c0_i32 = arith.constant 0 : i32
    %3 = arith.cmpi eq, %c16_i32, %c0_i32 : i32
    %c1_i32 = arith.constant 1 : i32
    %4 = arith.select %3, %c1_i32, %c16_i32 : i32
    %5 = vector.broadcast %4 : i32 to vector<1x256xi32>
    %6 = arith.remsi %2, %5 : vector<1x256xi32>
    %c0_i32_2 = arith.constant 0 : i32
    %7 = vector.broadcast %c0_i32_2 : i32 to vector<1x256xi32>
    %8 = arith.cmpi ne, %6, %7 : vector<1x256xi32>
    %c0_i32_3 = arith.constant 0 : i32
    %9 = vector.broadcast %c0_i32_3 : i32 to vector<1x256xi32>
    %10 = arith.cmpi slt, %6, %9 : vector<1x256xi32>
    %c0_i32_4 = arith.constant 0 : i32
    %11 = arith.cmpi slt, %4, %c0_i32_4 : i32
    %12 = vector.broadcast %11 : i1 to vector<1x256xi1>
    %13 = vector.broadcast %12 : vector<1x256xi1> to vector<1x256xi1>
    %14 = arith.xori %10, %13 : vector<1x256xi1>
    %15 = arith.andi %14, %8 : vector<1x256xi1>
    %16 = vector.broadcast %4 : i32 to vector<1x256xi32>
    %17 = arith.addi %6, %16 : vector<1x256xi32>
    %18 = arith.select %15, %17, %6 : vector<1x256xi1>, vector<1x256xi32>
    %c0_5 = arith.constant 0 : index
    %c0_6 = arith.constant 0 : index
    %19 = vector.load %arg2[%c0_5, %c0_6] : memref<48x4xf32, #tpu.memory_space<vmem>>, vector<48x4xf32>
    %cst = arith.constant dense<0.000000e+00> : vector<48x256xf32>
    %20 = tpu.matmul %19, %1, %cst {dimension_numbers = #tpu.dot_dimension_numbers<[1], [0], [0], [1], [0, 0, 1, 1], [], []>} : vector<48x4xf32>, vector<4x256xf32>, vector<48x256xf32> -> vector<48x256xf32>
    %c0_7 = arith.constant 0 : index
    %c0_8 = arith.constant 0 : index
    %21 = vector.load %arg3[%c0_7, %c0_8] : memref<48x1xf32, #tpu.memory_space<vmem>>, vector<48x1xf32>
    %22 = vector.broadcast %21 : vector<48x1xf32> to vector<48x256xf32>
    %23 = arith.addf %20, %22 : vector<48x256xf32>
    %24 = vector.extract_strided_slice %23 {offsets = [0, 0], sizes = [16, 256], strides = [1, 1]} : vector<48x256xf32> to vector<16x256xf32>
    %cst_9 = arith.constant 0.000000e+00 : f32
    %25 = vector.broadcast %cst_9 : f32 to vector<16x128xf32>
    %26 = tpu.concatenate %25, %24, %25 in 1 : vector<16x128xf32>, vector<16x256xf32>, vector<16x128xf32> -> vector<16x512xf32>
    %27 = vector.extract_strided_slice %26 {offsets = [0, 111], sizes = [16, 256], strides = [1, 1]} : vector<16x512xf32> to vector<16x256xf32>
    %c-1_i32 = arith.constant -1 : i32
    %28 = vector.broadcast %c-1_i32 : i32 to vector<1x256xi32>
    %29 = arith.addi %18, %28 : vector<1x256xi32>
    %c0_i32_10 = arith.constant 0 : i32
    %30 = vector.broadcast %c0_i32_10 : i32 to vector<1x256xi32>
    %31 = arith.cmpi sge, %29, %30 : vector<1x256xi32>
    %c-1_i32_11 = arith.constant -1 : i32
    %32 = vector.broadcast %c-1_i32_11 : i32 to vector<1x256xi32>
    %33 = arith.addi %18, %32 : vector<1x256xi32>
    %c16_i32_12 = arith.constant 16 : i32
    %34 = vector.broadcast %c16_i32_12 : i32 to vector<1x256xi32>
    %35 = arith.cmpi slt, %33, %34 : vector<1x256xi32>
    %36 = arith.andi %31, %35 : vector<1x256xi1>
    %cst_13 = arith.constant 0.000000e+00 : f32
    %37 = vector.broadcast %cst_13 : f32 to vector<16x256xf32>
    %38 = vector.shape_cast %36 : vector<1x256xi1> to vector<1x256xi1>
    %39 = vector.broadcast %38 : vector<1x256xi1> to vector<16x256xi1>
    %40 = arith.select %39, %27, %37 : vector<16x256xi1>, vector<16x256xf32>
    %41 = vector.extract_strided_slice %26 {offsets = [0, 112], sizes = [16, 256], strides = [1, 1]} : vector<16x512xf32> to vector<16x256xf32>
    %42 = vector.extract_strided_slice %26 {offsets = [0, 113], sizes = [16, 256], strides = [1, 1]} : vector<16x512xf32> to vector<16x256xf32>
    %c1_i32_14 = arith.constant 1 : i32
    %43 = vector.broadcast %c1_i32_14 : i32 to vector<1x256xi32>
    %44 = arith.addi %18, %43 : vector<1x256xi32>
    %c0_i32_15 = arith.constant 0 : i32
    %45 = vector.broadcast %c0_i32_15 : i32 to vector<1x256xi32>
    %46 = arith.cmpi sge, %44, %45 : vector<1x256xi32>
    %c1_i32_16 = arith.constant 1 : i32
    %47 = vector.broadcast %c1_i32_16 : i32 to vector<1x256xi32>
    %48 = arith.addi %18, %47 : vector<1x256xi32>
    %c16_i32_17 = arith.constant 16 : i32
    %49 = vector.broadcast %c16_i32_17 : i32 to vector<1x256xi32>
    %50 = arith.cmpi slt, %48, %49 : vector<1x256xi32>
    %51 = arith.andi %46, %50 : vector<1x256xi1>
    %cst_18 = arith.constant 0.000000e+00 : f32
    %52 = vector.broadcast %cst_18 : f32 to vector<16x256xf32>
    %53 = vector.shape_cast %51 : vector<1x256xi1> to vector<1x256xi1>
    %54 = vector.broadcast %53 : vector<1x256xi1> to vector<16x256xi1>
    %55 = arith.select %54, %42, %52 : vector<16x256xi1>, vector<16x256xf32>
    %56 = vector.extract_strided_slice %26 {offsets = [0, 127], sizes = [16, 256], strides = [1, 1]} : vector<16x512xf32> to vector<16x256xf32>
    %c-1_i32_19 = arith.constant -1 : i32
    %57 = vector.broadcast %c-1_i32_19 : i32 to vector<1x256xi32>
    %58 = arith.addi %18, %57 : vector<1x256xi32>
    %c0_i32_20 = arith.constant 0 : i32
    %59 = vector.broadcast %c0_i32_20 : i32 to vector<1x256xi32>
    %60 = arith.cmpi sge, %58, %59 : vector<1x256xi32>
    %c-1_i32_21 = arith.constant -1 : i32
    %61 = vector.broadcast %c-1_i32_21 : i32 to vector<1x256xi32>
    %62 = arith.addi %18, %61 : vector<1x256xi32>
    %c16_i32_22 = arith.constant 16 : i32
    %63 = vector.broadcast %c16_i32_22 : i32 to vector<1x256xi32>
    %64 = arith.cmpi slt, %62, %63 : vector<1x256xi32>
    %65 = arith.andi %60, %64 : vector<1x256xi1>
    %cst_23 = arith.constant 0.000000e+00 : f32
    %66 = vector.broadcast %cst_23 : f32 to vector<16x256xf32>
    %67 = vector.shape_cast %65 : vector<1x256xi1> to vector<1x256xi1>
    %68 = vector.broadcast %67 : vector<1x256xi1> to vector<16x256xi1>
    %69 = arith.select %68, %56, %66 : vector<16x256xi1>, vector<16x256xf32>
    %70 = vector.extract_strided_slice %26 {offsets = [0, 128], sizes = [16, 256], strides = [1, 1]} : vector<16x512xf32> to vector<16x256xf32>
    %71 = vector.extract_strided_slice %26 {offsets = [0, 129], sizes = [16, 256], strides = [1, 1]} : vector<16x512xf32> to vector<16x256xf32>
    %c1_i32_24 = arith.constant 1 : i32
    %72 = vector.broadcast %c1_i32_24 : i32 to vector<1x256xi32>
    %73 = arith.addi %18, %72 : vector<1x256xi32>
    %c0_i32_25 = arith.constant 0 : i32
    %74 = vector.broadcast %c0_i32_25 : i32 to vector<1x256xi32>
    %75 = arith.cmpi sge, %73, %74 : vector<1x256xi32>
    %c1_i32_26 = arith.constant 1 : i32
    %76 = vector.broadcast %c1_i32_26 : i32 to vector<1x256xi32>
    %77 = arith.addi %18, %76 : vector<1x256xi32>
    %c16_i32_27 = arith.constant 16 : i32
    %78 = vector.broadcast %c16_i32_27 : i32 to vector<1x256xi32>
    %79 = arith.cmpi slt, %77, %78 : vector<1x256xi32>
    %80 = arith.andi %75, %79 : vector<1x256xi1>
    %cst_28 = arith.constant 0.000000e+00 : f32
    %81 = vector.broadcast %cst_28 : f32 to vector<16x256xf32>
    %82 = vector.shape_cast %80 : vector<1x256xi1> to vector<1x256xi1>
    %83 = vector.broadcast %82 : vector<1x256xi1> to vector<16x256xi1>
    %84 = arith.select %83, %71, %81 : vector<16x256xi1>, vector<16x256xf32>
    %85 = vector.extract_strided_slice %26 {offsets = [0, 143], sizes = [16, 256], strides = [1, 1]} : vector<16x512xf32> to vector<16x256xf32>
    %c-1_i32_29 = arith.constant -1 : i32
    %86 = vector.broadcast %c-1_i32_29 : i32 to vector<1x256xi32>
    %87 = arith.addi %18, %86 : vector<1x256xi32>
    %c0_i32_30 = arith.constant 0 : i32
    %88 = vector.broadcast %c0_i32_30 : i32 to vector<1x256xi32>
    %89 = arith.cmpi sge, %87, %88 : vector<1x256xi32>
    %c-1_i32_31 = arith.constant -1 : i32
    %90 = vector.broadcast %c-1_i32_31 : i32 to vector<1x256xi32>
    %91 = arith.addi %18, %90 : vector<1x256xi32>
    %c16_i32_32 = arith.constant 16 : i32
    %92 = vector.broadcast %c16_i32_32 : i32 to vector<1x256xi32>
    %93 = arith.cmpi slt, %91, %92 : vector<1x256xi32>
    %94 = arith.andi %89, %93 : vector<1x256xi1>
    %cst_33 = arith.constant 0.000000e+00 : f32
    %95 = vector.broadcast %cst_33 : f32 to vector<16x256xf32>
    %96 = vector.shape_cast %94 : vector<1x256xi1> to vector<1x256xi1>
    %97 = vector.broadcast %96 : vector<1x256xi1> to vector<16x256xi1>
    %98 = arith.select %97, %85, %95 : vector<16x256xi1>, vector<16x256xf32>
    %99 = vector.extract_strided_slice %26 {offsets = [0, 144], sizes = [16, 256], strides = [1, 1]} : vector<16x512xf32> to vector<16x256xf32>
    %100 = vector.extract_strided_slice %26 {offsets = [0, 145], sizes = [16, 256], strides = [1, 1]} : vector<16x512xf32> to vector<16x256xf32>
    %c1_i32_34 = arith.constant 1 : i32
    %101 = vector.broadcast %c1_i32_34 : i32 to vector<1x256xi32>
    %102 = arith.addi %18, %101 : vector<1x256xi32>
    %c0_i32_35 = arith.constant 0 : i32
    %103 = vector.broadcast %c0_i32_35 : i32 to vector<1x256xi32>
    %104 = arith.cmpi sge, %102, %103 : vector<1x256xi32>
    %c1_i32_36 = arith.constant 1 : i32
    %105 = vector.broadcast %c1_i32_36 : i32 to vector<1x256xi32>
    %106 = arith.addi %18, %105 : vector<1x256xi32>
    %c16_i32_37 = arith.constant 16 : i32
    %107 = vector.broadcast %c16_i32_37 : i32 to vector<1x256xi32>
    %108 = arith.cmpi slt, %106, %107 : vector<1x256xi32>
    %109 = arith.andi %104, %108 : vector<1x256xi1>
    %cst_38 = arith.constant 0.000000e+00 : f32
    %110 = vector.broadcast %cst_38 : f32 to vector<16x256xf32>
    %111 = vector.shape_cast %109 : vector<1x256xi1> to vector<1x256xi1>
    %112 = vector.broadcast %111 : vector<1x256xi1> to vector<16x256xi1>
    %113 = arith.select %112, %100, %110 : vector<16x256xi1>, vector<16x256xf32>
    %114 = tpu.concatenate %40, %41, %55, %69, %70, %84, %98, %99, %113 in 0 : vector<16x256xf32>, vector<16x256xf32>, vector<16x256xf32>, vector<16x256xf32>, vector<16x256xf32>, vector<16x256xf32>, vector<16x256xf32>, vector<16x256xf32>, vector<16x256xf32> -> vector<144x256xf32>
    %c0_39 = arith.constant 0 : index
    %c0_40 = arith.constant 0 : index
    %115 = vector.load %arg4[%c0_39, %c0_40] : memref<24x144xf32, #tpu.memory_space<vmem>>, vector<24x144xf32>
    %cst_41 = arith.constant dense<0.000000e+00> : vector<24x256xf32>
    %116 = tpu.matmul %115, %114, %cst_41 {dimension_numbers = #tpu.dot_dimension_numbers<[1], [0], [0], [1], [0, 0, 1, 1], [], []>} : vector<24x144xf32>, vector<144x256xf32>, vector<24x256xf32> -> vector<24x256xf32>
    %c0_42 = arith.constant 0 : index
    %c0_43 = arith.constant 0 : index
    %117 = vector.load %arg5[%c0_42, %c0_43] : memref<24x1xf32, #tpu.memory_space<vmem>>, vector<24x1xf32>
    %118 = vector.broadcast %117 : vector<24x1xf32> to vector<24x256xf32>
    %119 = arith.addf %116, %118 : vector<24x256xf32>
    %cst_44 = arith.constant 0.000000e+00 : f32
    %120 = vector.broadcast %cst_44 : f32 to vector<24x128xf32>
    %121 = tpu.concatenate %120, %119, %120 in 1 : vector<24x128xf32>, vector<24x256xf32>, vector<24x128xf32> -> vector<24x512xf32>
    %122 = vector.extract_strided_slice %121 {offsets = [0, 111], sizes = [24, 256], strides = [1, 1]} : vector<24x512xf32> to vector<24x256xf32>
    %c-1_i32_45 = arith.constant -1 : i32
    %123 = vector.broadcast %c-1_i32_45 : i32 to vector<1x256xi32>
    %124 = arith.addi %18, %123 : vector<1x256xi32>
    %c0_i32_46 = arith.constant 0 : i32
    %125 = vector.broadcast %c0_i32_46 : i32 to vector<1x256xi32>
    %126 = arith.cmpi sge, %124, %125 : vector<1x256xi32>
    %c-1_i32_47 = arith.constant -1 : i32
    %127 = vector.broadcast %c-1_i32_47 : i32 to vector<1x256xi32>
    %128 = arith.addi %18, %127 : vector<1x256xi32>
    %c16_i32_48 = arith.constant 16 : i32
    %129 = vector.broadcast %c16_i32_48 : i32 to vector<1x256xi32>
    %130 = arith.cmpi slt, %128, %129 : vector<1x256xi32>
    %131 = arith.andi %126, %130 : vector<1x256xi1>
    %cst_49 = arith.constant 0.000000e+00 : f32
    %132 = vector.broadcast %cst_49 : f32 to vector<24x256xf32>
    %133 = vector.shape_cast %131 : vector<1x256xi1> to vector<1x256xi1>
    %134 = vector.broadcast %133 : vector<1x256xi1> to vector<24x256xi1>
    %135 = arith.select %134, %122, %132 : vector<24x256xi1>, vector<24x256xf32>
    %136 = vector.extract_strided_slice %121 {offsets = [0, 112], sizes = [24, 256], strides = [1, 1]} : vector<24x512xf32> to vector<24x256xf32>
    %137 = vector.extract_strided_slice %121 {offsets = [0, 113], sizes = [24, 256], strides = [1, 1]} : vector<24x512xf32> to vector<24x256xf32>
    %c1_i32_50 = arith.constant 1 : i32
    %138 = vector.broadcast %c1_i32_50 : i32 to vector<1x256xi32>
    %139 = arith.addi %18, %138 : vector<1x256xi32>
    %c0_i32_51 = arith.constant 0 : i32
    %140 = vector.broadcast %c0_i32_51 : i32 to vector<1x256xi32>
    %141 = arith.cmpi sge, %139, %140 : vector<1x256xi32>
    %c1_i32_52 = arith.constant 1 : i32
    %142 = vector.broadcast %c1_i32_52 : i32 to vector<1x256xi32>
    %143 = arith.addi %18, %142 : vector<1x256xi32>
    %c16_i32_53 = arith.constant 16 : i32
    %144 = vector.broadcast %c16_i32_53 : i32 to vector<1x256xi32>
    %145 = arith.cmpi slt, %143, %144 : vector<1x256xi32>
    %146 = arith.andi %141, %145 : vector<1x256xi1>
    %cst_54 = arith.constant 0.000000e+00 : f32
    %147 = vector.broadcast %cst_54 : f32 to vector<24x256xf32>
    %148 = vector.shape_cast %146 : vector<1x256xi1> to vector<1x256xi1>
    %149 = vector.broadcast %148 : vector<1x256xi1> to vector<24x256xi1>
    %150 = arith.select %149, %137, %147 : vector<24x256xi1>, vector<24x256xf32>
    %151 = vector.extract_strided_slice %121 {offsets = [0, 127], sizes = [24, 256], strides = [1, 1]} : vector<24x512xf32> to vector<24x256xf32>
    %c-1_i32_55 = arith.constant -1 : i32
    %152 = vector.broadcast %c-1_i32_55 : i32 to vector<1x256xi32>
    %153 = arith.addi %18, %152 : vector<1x256xi32>
    %c0_i32_56 = arith.constant 0 : i32
    %154 = vector.broadcast %c0_i32_56 : i32 to vector<1x256xi32>
    %155 = arith.cmpi sge, %153, %154 : vector<1x256xi32>
    %c-1_i32_57 = arith.constant -1 : i32
    %156 = vector.broadcast %c-1_i32_57 : i32 to vector<1x256xi32>
    %157 = arith.addi %18, %156 : vector<1x256xi32>
    %c16_i32_58 = arith.constant 16 : i32
    %158 = vector.broadcast %c16_i32_58 : i32 to vector<1x256xi32>
    %159 = arith.cmpi slt, %157, %158 : vector<1x256xi32>
    %160 = arith.andi %155, %159 : vector<1x256xi1>
    %cst_59 = arith.constant 0.000000e+00 : f32
    %161 = vector.broadcast %cst_59 : f32 to vector<24x256xf32>
    %162 = vector.shape_cast %160 : vector<1x256xi1> to vector<1x256xi1>
    %163 = vector.broadcast %162 : vector<1x256xi1> to vector<24x256xi1>
    %164 = arith.select %163, %151, %161 : vector<24x256xi1>, vector<24x256xf32>
    %165 = vector.extract_strided_slice %121 {offsets = [0, 128], sizes = [24, 256], strides = [1, 1]} : vector<24x512xf32> to vector<24x256xf32>
    %166 = vector.extract_strided_slice %121 {offsets = [0, 129], sizes = [24, 256], strides = [1, 1]} : vector<24x512xf32> to vector<24x256xf32>
    %c1_i32_60 = arith.constant 1 : i32
    %167 = vector.broadcast %c1_i32_60 : i32 to vector<1x256xi32>
    %168 = arith.addi %18, %167 : vector<1x256xi32>
    %c0_i32_61 = arith.constant 0 : i32
    %169 = vector.broadcast %c0_i32_61 : i32 to vector<1x256xi32>
    %170 = arith.cmpi sge, %168, %169 : vector<1x256xi32>
    %c1_i32_62 = arith.constant 1 : i32
    %171 = vector.broadcast %c1_i32_62 : i32 to vector<1x256xi32>
    %172 = arith.addi %18, %171 : vector<1x256xi32>
    %c16_i32_63 = arith.constant 16 : i32
    %173 = vector.broadcast %c16_i32_63 : i32 to vector<1x256xi32>
    %174 = arith.cmpi slt, %172, %173 : vector<1x256xi32>
    %175 = arith.andi %170, %174 : vector<1x256xi1>
    %cst_64 = arith.constant 0.000000e+00 : f32
    %176 = vector.broadcast %cst_64 : f32 to vector<24x256xf32>
    %177 = vector.shape_cast %175 : vector<1x256xi1> to vector<1x256xi1>
    %178 = vector.broadcast %177 : vector<1x256xi1> to vector<24x256xi1>
    %179 = arith.select %178, %166, %176 : vector<24x256xi1>, vector<24x256xf32>
    %180 = vector.extract_strided_slice %121 {offsets = [0, 143], sizes = [24, 256], strides = [1, 1]} : vector<24x512xf32> to vector<24x256xf32>
    %c-1_i32_65 = arith.constant -1 : i32
    %181 = vector.broadcast %c-1_i32_65 : i32 to vector<1x256xi32>
    %182 = arith.addi %18, %181 : vector<1x256xi32>
    %c0_i32_66 = arith.constant 0 : i32
    %183 = vector.broadcast %c0_i32_66 : i32 to vector<1x256xi32>
    %184 = arith.cmpi sge, %182, %183 : vector<1x256xi32>
    %c-1_i32_67 = arith.constant -1 : i32
    %185 = vector.broadcast %c-1_i32_67 : i32 to vector<1x256xi32>
    %186 = arith.addi %18, %185 : vector<1x256xi32>
    %c16_i32_68 = arith.constant 16 : i32
    %187 = vector.broadcast %c16_i32_68 : i32 to vector<1x256xi32>
    %188 = arith.cmpi slt, %186, %187 : vector<1x256xi32>
    %189 = arith.andi %184, %188 : vector<1x256xi1>
    %cst_69 = arith.constant 0.000000e+00 : f32
    %190 = vector.broadcast %cst_69 : f32 to vector<24x256xf32>
    %191 = vector.shape_cast %189 : vector<1x256xi1> to vector<1x256xi1>
    %192 = vector.broadcast %191 : vector<1x256xi1> to vector<24x256xi1>
    %193 = arith.select %192, %180, %190 : vector<24x256xi1>, vector<24x256xf32>
    %194 = vector.extract_strided_slice %121 {offsets = [0, 144], sizes = [24, 256], strides = [1, 1]} : vector<24x512xf32> to vector<24x256xf32>
    %195 = vector.extract_strided_slice %121 {offsets = [0, 145], sizes = [24, 256], strides = [1, 1]} : vector<24x512xf32> to vector<24x256xf32>
    %c1_i32_70 = arith.constant 1 : i32
    %196 = vector.broadcast %c1_i32_70 : i32 to vector<1x256xi32>
    %197 = arith.addi %18, %196 : vector<1x256xi32>
    %c0_i32_71 = arith.constant 0 : i32
    %198 = vector.broadcast %c0_i32_71 : i32 to vector<1x256xi32>
    %199 = arith.cmpi sge, %197, %198 : vector<1x256xi32>
    %c1_i32_72 = arith.constant 1 : i32
    %200 = vector.broadcast %c1_i32_72 : i32 to vector<1x256xi32>
    %201 = arith.addi %18, %200 : vector<1x256xi32>
    %c16_i32_73 = arith.constant 16 : i32
    %202 = vector.broadcast %c16_i32_73 : i32 to vector<1x256xi32>
    %203 = arith.cmpi slt, %201, %202 : vector<1x256xi32>
    %204 = arith.andi %199, %203 : vector<1x256xi1>
    %cst_74 = arith.constant 0.000000e+00 : f32
    %205 = vector.broadcast %cst_74 : f32 to vector<24x256xf32>
    %206 = vector.shape_cast %204 : vector<1x256xi1> to vector<1x256xi1>
    %207 = vector.broadcast %206 : vector<1x256xi1> to vector<24x256xi1>
    %208 = arith.select %207, %195, %205 : vector<24x256xi1>, vector<24x256xf32>
    %209 = tpu.concatenate %135, %136, %150, %164, %165, %179, %193, %194, %208 in 0 : vector<24x256xf32>, vector<24x256xf32>, vector<24x256xf32>, vector<24x256xf32>, vector<24x256xf32>, vector<24x256xf32>, vector<24x256xf32>, vector<24x256xf32>, vector<24x256xf32> -> vector<216x256xf32>
    %c0_75 = arith.constant 0 : index
    %c0_76 = arith.constant 0 : index
    %210 = vector.load %arg6[%c0_75, %c0_76] : memref<24x216xf32, #tpu.memory_space<vmem>>, vector<24x216xf32>
    %cst_77 = arith.constant dense<0.000000e+00> : vector<24x256xf32>
    %211 = tpu.matmul %210, %209, %cst_77 {dimension_numbers = #tpu.dot_dimension_numbers<[1], [0], [0], [1], [0, 0, 1, 1], [], []>} : vector<24x216xf32>, vector<216x256xf32>, vector<24x256xf32> -> vector<24x256xf32>
    %c0_78 = arith.constant 0 : index
    %c0_79 = arith.constant 0 : index
    %212 = vector.load %arg7[%c0_78, %c0_79] : memref<24x1xf32, #tpu.memory_space<vmem>>, vector<24x1xf32>
    %213 = vector.broadcast %212 : vector<24x1xf32> to vector<24x256xf32>
    %214 = arith.addf %211, %213 : vector<24x256xf32>
    %215 = vector.extract_strided_slice %23 {offsets = [16, 0], sizes = [16, 256], strides = [1, 1]} : vector<48x256xf32> to vector<16x256xf32>
    %cst_80 = arith.constant 0.000000e+00 : f32
    %216 = vector.broadcast %cst_80 : f32 to vector<16x128xf32>
    %217 = tpu.concatenate %216, %215, %216 in 1 : vector<16x128xf32>, vector<16x256xf32>, vector<16x128xf32> -> vector<16x512xf32>
    %218 = vector.extract_strided_slice %217 {offsets = [0, 94], sizes = [16, 256], strides = [1, 1]} : vector<16x512xf32> to vector<16x256xf32>
    %c-2_i32 = arith.constant -2 : i32
    %219 = vector.broadcast %c-2_i32 : i32 to vector<1x256xi32>
    %220 = arith.addi %18, %219 : vector<1x256xi32>
    %c0_i32_81 = arith.constant 0 : i32
    %221 = vector.broadcast %c0_i32_81 : i32 to vector<1x256xi32>
    %222 = arith.cmpi sge, %220, %221 : vector<1x256xi32>
    %c-2_i32_82 = arith.constant -2 : i32
    %223 = vector.broadcast %c-2_i32_82 : i32 to vector<1x256xi32>
    %224 = arith.addi %18, %223 : vector<1x256xi32>
    %c16_i32_83 = arith.constant 16 : i32
    %225 = vector.broadcast %c16_i32_83 : i32 to vector<1x256xi32>
    %226 = arith.cmpi slt, %224, %225 : vector<1x256xi32>
    %227 = arith.andi %222, %226 : vector<1x256xi1>
    %cst_84 = arith.constant 0.000000e+00 : f32
    %228 = vector.broadcast %cst_84 : f32 to vector<16x256xf32>
    %229 = vector.shape_cast %227 : vector<1x256xi1> to vector<1x256xi1>
    %230 = vector.broadcast %229 : vector<1x256xi1> to vector<16x256xi1>
    %231 = arith.select %230, %218, %228 : vector<16x256xi1>, vector<16x256xf32>
    %232 = vector.extract_strided_slice %217 {offsets = [0, 95], sizes = [16, 256], strides = [1, 1]} : vector<16x512xf32> to vector<16x256xf32>
    %c-1_i32_85 = arith.constant -1 : i32
    %233 = vector.broadcast %c-1_i32_85 : i32 to vector<1x256xi32>
    %234 = arith.addi %18, %233 : vector<1x256xi32>
    %c0_i32_86 = arith.constant 0 : i32
    %235 = vector.broadcast %c0_i32_86 : i32 to vector<1x256xi32>
    %236 = arith.cmpi sge, %234, %235 : vector<1x256xi32>
    %c-1_i32_87 = arith.constant -1 : i32
    %237 = vector.broadcast %c-1_i32_87 : i32 to vector<1x256xi32>
    %238 = arith.addi %18, %237 : vector<1x256xi32>
    %c16_i32_88 = arith.constant 16 : i32
    %239 = vector.broadcast %c16_i32_88 : i32 to vector<1x256xi32>
    %240 = arith.cmpi slt, %238, %239 : vector<1x256xi32>
    %241 = arith.andi %236, %240 : vector<1x256xi1>
    %cst_89 = arith.constant 0.000000e+00 : f32
    %242 = vector.broadcast %cst_89 : f32 to vector<16x256xf32>
    %243 = vector.shape_cast %241 : vector<1x256xi1> to vector<1x256xi1>
    %244 = vector.broadcast %243 : vector<1x256xi1> to vector<16x256xi1>
    %245 = arith.select %244, %232, %242 : vector<16x256xi1>, vector<16x256xf32>
    %246 = vector.extract_strided_slice %217 {offsets = [0, 96], sizes = [16, 256], strides = [1, 1]} : vector<16x512xf32> to vector<16x256xf32>
    %247 = vector.extract_strided_slice %217 {offsets = [0, 97], sizes = [16, 256], strides = [1, 1]} : vector<16x512xf32> to vector<16x256xf32>
    %c1_i32_90 = arith.constant 1 : i32
    %248 = vector.broadcast %c1_i32_90 : i32 to vector<1x256xi32>
    %249 = arith.addi %18, %248 : vector<1x256xi32>
    %c0_i32_91 = arith.constant 0 : i32
    %250 = vector.broadcast %c0_i32_91 : i32 to vector<1x256xi32>
    %251 = arith.cmpi sge, %249, %250 : vector<1x256xi32>
    %c1_i32_92 = arith.constant 1 : i32
    %252 = vector.broadcast %c1_i32_92 : i32 to vector<1x256xi32>
    %253 = arith.addi %18, %252 : vector<1x256xi32>
    %c16_i32_93 = arith.constant 16 : i32
    %254 = vector.broadcast %c16_i32_93 : i32 to vector<1x256xi32>
    %255 = arith.cmpi slt, %253, %254 : vector<1x256xi32>
    %256 = arith.andi %251, %255 : vector<1x256xi1>
    %cst_94 = arith.constant 0.000000e+00 : f32
    %257 = vector.broadcast %cst_94 : f32 to vector<16x256xf32>
    %258 = vector.shape_cast %256 : vector<1x256xi1> to vector<1x256xi1>
    %259 = vector.broadcast %258 : vector<1x256xi1> to vector<16x256xi1>
    %260 = arith.select %259, %247, %257 : vector<16x256xi1>, vector<16x256xf32>
    %261 = vector.extract_strided_slice %217 {offsets = [0, 98], sizes = [16, 256], strides = [1, 1]} : vector<16x512xf32> to vector<16x256xf32>
    %c2_i32 = arith.constant 2 : i32
    %262 = vector.broadcast %c2_i32 : i32 to vector<1x256xi32>
    %263 = arith.addi %18, %262 : vector<1x256xi32>
    %c0_i32_95 = arith.constant 0 : i32
    %264 = vector.broadcast %c0_i32_95 : i32 to vector<1x256xi32>
    %265 = arith.cmpi sge, %263, %264 : vector<1x256xi32>
    %c2_i32_96 = arith.constant 2 : i32
    %266 = vector.broadcast %c2_i32_96 : i32 to vector<1x256xi32>
    %267 = arith.addi %18, %266 : vector<1x256xi32>
    %c16_i32_97 = arith.constant 16 : i32
    %268 = vector.broadcast %c16_i32_97 : i32 to vector<1x256xi32>
    %269 = arith.cmpi slt, %267, %268 : vector<1x256xi32>
    %270 = arith.andi %265, %269 : vector<1x256xi1>
    %cst_98 = arith.constant 0.000000e+00 : f32
    %271 = vector.broadcast %cst_98 : f32 to vector<16x256xf32>
    %272 = vector.shape_cast %270 : vector<1x256xi1> to vector<1x256xi1>
    %273 = vector.broadcast %272 : vector<1x256xi1> to vector<16x256xi1>
    %274 = arith.select %273, %261, %271 : vector<16x256xi1>, vector<16x256xf32>
    %275 = vector.extract_strided_slice %217 {offsets = [0, 110], sizes = [16, 256], strides = [1, 1]} : vector<16x512xf32> to vector<16x256xf32>
    %c-2_i32_99 = arith.constant -2 : i32
    %276 = vector.broadcast %c-2_i32_99 : i32 to vector<1x256xi32>
    %277 = arith.addi %18, %276 : vector<1x256xi32>
    %c0_i32_100 = arith.constant 0 : i32
    %278 = vector.broadcast %c0_i32_100 : i32 to vector<1x256xi32>
    %279 = arith.cmpi sge, %277, %278 : vector<1x256xi32>
    %c-2_i32_101 = arith.constant -2 : i32
    %280 = vector.broadcast %c-2_i32_101 : i32 to vector<1x256xi32>
    %281 = arith.addi %18, %280 : vector<1x256xi32>
    %c16_i32_102 = arith.constant 16 : i32
    %282 = vector.broadcast %c16_i32_102 : i32 to vector<1x256xi32>
    %283 = arith.cmpi slt, %281, %282 : vector<1x256xi32>
    %284 = arith.andi %279, %283 : vector<1x256xi1>
    %cst_103 = arith.constant 0.000000e+00 : f32
    %285 = vector.broadcast %cst_103 : f32 to vector<16x256xf32>
    %286 = vector.shape_cast %284 : vector<1x256xi1> to vector<1x256xi1>
    %287 = vector.broadcast %286 : vector<1x256xi1> to vector<16x256xi1>
    %288 = arith.select %287, %275, %285 : vector<16x256xi1>, vector<16x256xf32>
    %289 = vector.extract_strided_slice %217 {offsets = [0, 111], sizes = [16, 256], strides = [1, 1]} : vector<16x512xf32> to vector<16x256xf32>
    %c-1_i32_104 = arith.constant -1 : i32
    %290 = vector.broadcast %c-1_i32_104 : i32 to vector<1x256xi32>
    %291 = arith.addi %18, %290 : vector<1x256xi32>
    %c0_i32_105 = arith.constant 0 : i32
    %292 = vector.broadcast %c0_i32_105 : i32 to vector<1x256xi32>
    %293 = arith.cmpi sge, %291, %292 : vector<1x256xi32>
    %c-1_i32_106 = arith.constant -1 : i32
    %294 = vector.broadcast %c-1_i32_106 : i32 to vector<1x256xi32>
    %295 = arith.addi %18, %294 : vector<1x256xi32>
    %c16_i32_107 = arith.constant 16 : i32
    %296 = vector.broadcast %c16_i32_107 : i32 to vector<1x256xi32>
    %297 = arith.cmpi slt, %295, %296 : vector<1x256xi32>
    %298 = arith.andi %293, %297 : vector<1x256xi1>
    %cst_108 = arith.constant 0.000000e+00 : f32
    %299 = vector.broadcast %cst_108 : f32 to vector<16x256xf32>
    %300 = vector.shape_cast %298 : vector<1x256xi1> to vector<1x256xi1>
    %301 = vector.broadcast %300 : vector<1x256xi1> to vector<16x256xi1>
    %302 = arith.select %301, %289, %299 : vector<16x256xi1>, vector<16x256xf32>
    %303 = vector.extract_strided_slice %217 {offsets = [0, 112], sizes = [16, 256], strides = [1, 1]} : vector<16x512xf32> to vector<16x256xf32>
    %304 = vector.extract_strided_slice %217 {offsets = [0, 113], sizes = [16, 256], strides = [1, 1]} : vector<16x512xf32> to vector<16x256xf32>
    %c1_i32_109 = arith.constant 1 : i32
    %305 = vector.broadcast %c1_i32_109 : i32 to vector<1x256xi32>
    %306 = arith.addi %18, %305 : vector<1x256xi32>
    %c0_i32_110 = arith.constant 0 : i32
    %307 = vector.broadcast %c0_i32_110 : i32 to vector<1x256xi32>
    %308 = arith.cmpi sge, %306, %307 : vector<1x256xi32>
    %c1_i32_111 = arith.constant 1 : i32
    %309 = vector.broadcast %c1_i32_111 : i32 to vector<1x256xi32>
    %310 = arith.addi %18, %309 : vector<1x256xi32>
    %c16_i32_112 = arith.constant 16 : i32
    %311 = vector.broadcast %c16_i32_112 : i32 to vector<1x256xi32>
    %312 = arith.cmpi slt, %310, %311 : vector<1x256xi32>
    %313 = arith.andi %308, %312 : vector<1x256xi1>
    %cst_113 = arith.constant 0.000000e+00 : f32
    %314 = vector.broadcast %cst_113 : f32 to vector<16x256xf32>
    %315 = vector.shape_cast %313 : vector<1x256xi1> to vector<1x256xi1>
    %316 = vector.broadcast %315 : vector<1x256xi1> to vector<16x256xi1>
    %317 = arith.select %316, %304, %314 : vector<16x256xi1>, vector<16x256xf32>
    %318 = vector.extract_strided_slice %217 {offsets = [0, 114], sizes = [16, 256], strides = [1, 1]} : vector<16x512xf32> to vector<16x256xf32>
    %c2_i32_114 = arith.constant 2 : i32
    %319 = vector.broadcast %c2_i32_114 : i32 to vector<1x256xi32>
    %320 = arith.addi %18, %319 : vector<1x256xi32>
    %c0_i32_115 = arith.constant 0 : i32
    %321 = vector.broadcast %c0_i32_115 : i32 to vector<1x256xi32>
    %322 = arith.cmpi sge, %320, %321 : vector<1x256xi32>
    %c2_i32_116 = arith.constant 2 : i32
    %323 = vector.broadcast %c2_i32_116 : i32 to vector<1x256xi32>
    %324 = arith.addi %18, %323 : vector<1x256xi32>
    %c16_i32_117 = arith.constant 16 : i32
    %325 = vector.broadcast %c16_i32_117 : i32 to vector<1x256xi32>
    %326 = arith.cmpi slt, %324, %325 : vector<1x256xi32>
    %327 = arith.andi %322, %326 : vector<1x256xi1>
    %cst_118 = arith.constant 0.000000e+00 : f32
    %328 = vector.broadcast %cst_118 : f32 to vector<16x256xf32>
    %329 = vector.shape_cast %327 : vector<1x256xi1> to vector<1x256xi1>
    %330 = vector.broadcast %329 : vector<1x256xi1> to vector<16x256xi1>
    %331 = arith.select %330, %318, %328 : vector<16x256xi1>, vector<16x256xf32>
    %332 = vector.extract_strided_slice %217 {offsets = [0, 126], sizes = [16, 256], strides = [1, 1]} : vector<16x512xf32> to vector<16x256xf32>
    %c-2_i32_119 = arith.constant -2 : i32
    %333 = vector.broadcast %c-2_i32_119 : i32 to vector<1x256xi32>
    %334 = arith.addi %18, %333 : vector<1x256xi32>
    %c0_i32_120 = arith.constant 0 : i32
    %335 = vector.broadcast %c0_i32_120 : i32 to vector<1x256xi32>
    %336 = arith.cmpi sge, %334, %335 : vector<1x256xi32>
    %c-2_i32_121 = arith.constant -2 : i32
    %337 = vector.broadcast %c-2_i32_121 : i32 to vector<1x256xi32>
    %338 = arith.addi %18, %337 : vector<1x256xi32>
    %c16_i32_122 = arith.constant 16 : i32
    %339 = vector.broadcast %c16_i32_122 : i32 to vector<1x256xi32>
    %340 = arith.cmpi slt, %338, %339 : vector<1x256xi32>
    %341 = arith.andi %336, %340 : vector<1x256xi1>
    %cst_123 = arith.constant 0.000000e+00 : f32
    %342 = vector.broadcast %cst_123 : f32 to vector<16x256xf32>
    %343 = vector.shape_cast %341 : vector<1x256xi1> to vector<1x256xi1>
    %344 = vector.broadcast %343 : vector<1x256xi1> to vector<16x256xi1>
    %345 = arith.select %344, %332, %342 : vector<16x256xi1>, vector<16x256xf32>
    %346 = vector.extract_strided_slice %217 {offsets = [0, 127], sizes = [16, 256], strides = [1, 1]} : vector<16x512xf32> to vector<16x256xf32>
    %c-1_i32_124 = arith.constant -1 : i32
    %347 = vector.broadcast %c-1_i32_124 : i32 to vector<1x256xi32>
    %348 = arith.addi %18, %347 : vector<1x256xi32>
    %c0_i32_125 = arith.constant 0 : i32
    %349 = vector.broadcast %c0_i32_125 : i32 to vector<1x256xi32>
    %350 = arith.cmpi sge, %348, %349 : vector<1x256xi32>
    %c-1_i32_126 = arith.constant -1 : i32
    %351 = vector.broadcast %c-1_i32_126 : i32 to vector<1x256xi32>
    %352 = arith.addi %18, %351 : vector<1x256xi32>
    %c16_i32_127 = arith.constant 16 : i32
    %353 = vector.broadcast %c16_i32_127 : i32 to vector<1x256xi32>
    %354 = arith.cmpi slt, %352, %353 : vector<1x256xi32>
    %355 = arith.andi %350, %354 : vector<1x256xi1>
    %cst_128 = arith.constant 0.000000e+00 : f32
    %356 = vector.broadcast %cst_128 : f32 to vector<16x256xf32>
    %357 = vector.shape_cast %355 : vector<1x256xi1> to vector<1x256xi1>
    %358 = vector.broadcast %357 : vector<1x256xi1> to vector<16x256xi1>
    %359 = arith.select %358, %346, %356 : vector<16x256xi1>, vector<16x256xf32>
    %360 = vector.extract_strided_slice %217 {offsets = [0, 128], sizes = [16, 256], strides = [1, 1]} : vector<16x512xf32> to vector<16x256xf32>
    %361 = vector.extract_strided_slice %217 {offsets = [0, 129], sizes = [16, 256], strides = [1, 1]} : vector<16x512xf32> to vector<16x256xf32>
    %c1_i32_129 = arith.constant 1 : i32
    %362 = vector.broadcast %c1_i32_129 : i32 to vector<1x256xi32>
    %363 = arith.addi %18, %362 : vector<1x256xi32>
    %c0_i32_130 = arith.constant 0 : i32
    %364 = vector.broadcast %c0_i32_130 : i32 to vector<1x256xi32>
    %365 = arith.cmpi sge, %363, %364 : vector<1x256xi32>
    %c1_i32_131 = arith.constant 1 : i32
    %366 = vector.broadcast %c1_i32_131 : i32 to vector<1x256xi32>
    %367 = arith.addi %18, %366 : vector<1x256xi32>
    %c16_i32_132 = arith.constant 16 : i32
    %368 = vector.broadcast %c16_i32_132 : i32 to vector<1x256xi32>
    %369 = arith.cmpi slt, %367, %368 : vector<1x256xi32>
    %370 = arith.andi %365, %369 : vector<1x256xi1>
    %cst_133 = arith.constant 0.000000e+00 : f32
    %371 = vector.broadcast %cst_133 : f32 to vector<16x256xf32>
    %372 = vector.shape_cast %370 : vector<1x256xi1> to vector<1x256xi1>
    %373 = vector.broadcast %372 : vector<1x256xi1> to vector<16x256xi1>
    %374 = arith.select %373, %361, %371 : vector<16x256xi1>, vector<16x256xf32>
    %375 = vector.extract_strided_slice %217 {offsets = [0, 130], sizes = [16, 256], strides = [1, 1]} : vector<16x512xf32> to vector<16x256xf32>
    %c2_i32_134 = arith.constant 2 : i32
    %376 = vector.broadcast %c2_i32_134 : i32 to vector<1x256xi32>
    %377 = arith.addi %18, %376 : vector<1x256xi32>
    %c0_i32_135 = arith.constant 0 : i32
    %378 = vector.broadcast %c0_i32_135 : i32 to vector<1x256xi32>
    %379 = arith.cmpi sge, %377, %378 : vector<1x256xi32>
    %c2_i32_136 = arith.constant 2 : i32
    %380 = vector.broadcast %c2_i32_136 : i32 to vector<1x256xi32>
    %381 = arith.addi %18, %380 : vector<1x256xi32>
    %c16_i32_137 = arith.constant 16 : i32
    %382 = vector.broadcast %c16_i32_137 : i32 to vector<1x256xi32>
    %383 = arith.cmpi slt, %381, %382 : vector<1x256xi32>
    %384 = arith.andi %379, %383 : vector<1x256xi1>
    %cst_138 = arith.constant 0.000000e+00 : f32
    %385 = vector.broadcast %cst_138 : f32 to vector<16x256xf32>
    %386 = vector.shape_cast %384 : vector<1x256xi1> to vector<1x256xi1>
    %387 = vector.broadcast %386 : vector<1x256xi1> to vector<16x256xi1>
    %388 = arith.select %387, %375, %385 : vector<16x256xi1>, vector<16x256xf32>
    %389 = vector.extract_strided_slice %217 {offsets = [0, 142], sizes = [16, 256], strides = [1, 1]} : vector<16x512xf32> to vector<16x256xf32>
    %c-2_i32_139 = arith.constant -2 : i32
    %390 = vector.broadcast %c-2_i32_139 : i32 to vector<1x256xi32>
    %391 = arith.addi %18, %390 : vector<1x256xi32>
    %c0_i32_140 = arith.constant 0 : i32
    %392 = vector.broadcast %c0_i32_140 : i32 to vector<1x256xi32>
    %393 = arith.cmpi sge, %391, %392 : vector<1x256xi32>
    %c-2_i32_141 = arith.constant -2 : i32
    %394 = vector.broadcast %c-2_i32_141 : i32 to vector<1x256xi32>
    %395 = arith.addi %18, %394 : vector<1x256xi32>
    %c16_i32_142 = arith.constant 16 : i32
    %396 = vector.broadcast %c16_i32_142 : i32 to vector<1x256xi32>
    %397 = arith.cmpi slt, %395, %396 : vector<1x256xi32>
    %398 = arith.andi %393, %397 : vector<1x256xi1>
    %cst_143 = arith.constant 0.000000e+00 : f32
    %399 = vector.broadcast %cst_143 : f32 to vector<16x256xf32>
    %400 = vector.shape_cast %398 : vector<1x256xi1> to vector<1x256xi1>
    %401 = vector.broadcast %400 : vector<1x256xi1> to vector<16x256xi1>
    %402 = arith.select %401, %389, %399 : vector<16x256xi1>, vector<16x256xf32>
    %403 = vector.extract_strided_slice %217 {offsets = [0, 143], sizes = [16, 256], strides = [1, 1]} : vector<16x512xf32> to vector<16x256xf32>
    %c-1_i32_144 = arith.constant -1 : i32
    %404 = vector.broadcast %c-1_i32_144 : i32 to vector<1x256xi32>
    %405 = arith.addi %18, %404 : vector<1x256xi32>
    %c0_i32_145 = arith.constant 0 : i32
    %406 = vector.broadcast %c0_i32_145 : i32 to vector<1x256xi32>
    %407 = arith.cmpi sge, %405, %406 : vector<1x256xi32>
    %c-1_i32_146 = arith.constant -1 : i32
    %408 = vector.broadcast %c-1_i32_146 : i32 to vector<1x256xi32>
    %409 = arith.addi %18, %408 : vector<1x256xi32>
    %c16_i32_147 = arith.constant 16 : i32
    %410 = vector.broadcast %c16_i32_147 : i32 to vector<1x256xi32>
    %411 = arith.cmpi slt, %409, %410 : vector<1x256xi32>
    %412 = arith.andi %407, %411 : vector<1x256xi1>
    %cst_148 = arith.constant 0.000000e+00 : f32
    %413 = vector.broadcast %cst_148 : f32 to vector<16x256xf32>
    %414 = vector.shape_cast %412 : vector<1x256xi1> to vector<1x256xi1>
    %415 = vector.broadcast %414 : vector<1x256xi1> to vector<16x256xi1>
    %416 = arith.select %415, %403, %413 : vector<16x256xi1>, vector<16x256xf32>
    %417 = vector.extract_strided_slice %217 {offsets = [0, 144], sizes = [16, 256], strides = [1, 1]} : vector<16x512xf32> to vector<16x256xf32>
    %418 = vector.extract_strided_slice %217 {offsets = [0, 145], sizes = [16, 256], strides = [1, 1]} : vector<16x512xf32> to vector<16x256xf32>
    %c1_i32_149 = arith.constant 1 : i32
    %419 = vector.broadcast %c1_i32_149 : i32 to vector<1x256xi32>
    %420 = arith.addi %18, %419 : vector<1x256xi32>
    %c0_i32_150 = arith.constant 0 : i32
    %421 = vector.broadcast %c0_i32_150 : i32 to vector<1x256xi32>
    %422 = arith.cmpi sge, %420, %421 : vector<1x256xi32>
    %c1_i32_151 = arith.constant 1 : i32
    %423 = vector.broadcast %c1_i32_151 : i32 to vector<1x256xi32>
    %424 = arith.addi %18, %423 : vector<1x256xi32>
    %c16_i32_152 = arith.constant 16 : i32
    %425 = vector.broadcast %c16_i32_152 : i32 to vector<1x256xi32>
    %426 = arith.cmpi slt, %424, %425 : vector<1x256xi32>
    %427 = arith.andi %422, %426 : vector<1x256xi1>
    %cst_153 = arith.constant 0.000000e+00 : f32
    %428 = vector.broadcast %cst_153 : f32 to vector<16x256xf32>
    %429 = vector.shape_cast %427 : vector<1x256xi1> to vector<1x256xi1>
    %430 = vector.broadcast %429 : vector<1x256xi1> to vector<16x256xi1>
    %431 = arith.select %430, %418, %428 : vector<16x256xi1>, vector<16x256xf32>
    %432 = vector.extract_strided_slice %217 {offsets = [0, 146], sizes = [16, 256], strides = [1, 1]} : vector<16x512xf32> to vector<16x256xf32>
    %c2_i32_154 = arith.constant 2 : i32
    %433 = vector.broadcast %c2_i32_154 : i32 to vector<1x256xi32>
    %434 = arith.addi %18, %433 : vector<1x256xi32>
    %c0_i32_155 = arith.constant 0 : i32
    %435 = vector.broadcast %c0_i32_155 : i32 to vector<1x256xi32>
    %436 = arith.cmpi sge, %434, %435 : vector<1x256xi32>
    %c2_i32_156 = arith.constant 2 : i32
    %437 = vector.broadcast %c2_i32_156 : i32 to vector<1x256xi32>
    %438 = arith.addi %18, %437 : vector<1x256xi32>
    %c16_i32_157 = arith.constant 16 : i32
    %439 = vector.broadcast %c16_i32_157 : i32 to vector<1x256xi32>
    %440 = arith.cmpi slt, %438, %439 : vector<1x256xi32>
    %441 = arith.andi %436, %440 : vector<1x256xi1>
    %cst_158 = arith.constant 0.000000e+00 : f32
    %442 = vector.broadcast %cst_158 : f32 to vector<16x256xf32>
    %443 = vector.shape_cast %441 : vector<1x256xi1> to vector<1x256xi1>
    %444 = vector.broadcast %443 : vector<1x256xi1> to vector<16x256xi1>
    %445 = arith.select %444, %432, %442 : vector<16x256xi1>, vector<16x256xf32>
    %446 = vector.extract_strided_slice %217 {offsets = [0, 158], sizes = [16, 256], strides = [1, 1]} : vector<16x512xf32> to vector<16x256xf32>
    %c-2_i32_159 = arith.constant -2 : i32
    %447 = vector.broadcast %c-2_i32_159 : i32 to vector<1x256xi32>
    %448 = arith.addi %18, %447 : vector<1x256xi32>
    %c0_i32_160 = arith.constant 0 : i32
    %449 = vector.broadcast %c0_i32_160 : i32 to vector<1x256xi32>
    %450 = arith.cmpi sge, %448, %449 : vector<1x256xi32>
    %c-2_i32_161 = arith.constant -2 : i32
    %451 = vector.broadcast %c-2_i32_161 : i32 to vector<1x256xi32>
    %452 = arith.addi %18, %451 : vector<1x256xi32>
    %c16_i32_162 = arith.constant 16 : i32
    %453 = vector.broadcast %c16_i32_162 : i32 to vector<1x256xi32>
    %454 = arith.cmpi slt, %452, %453 : vector<1x256xi32>
    %455 = arith.andi %450, %454 : vector<1x256xi1>
    %cst_163 = arith.constant 0.000000e+00 : f32
    %456 = vector.broadcast %cst_163 : f32 to vector<16x256xf32>
    %457 = vector.shape_cast %455 : vector<1x256xi1> to vector<1x256xi1>
    %458 = vector.broadcast %457 : vector<1x256xi1> to vector<16x256xi1>
    %459 = arith.select %458, %446, %456 : vector<16x256xi1>, vector<16x256xf32>
    %460 = vector.extract_strided_slice %217 {offsets = [0, 159], sizes = [16, 256], strides = [1, 1]} : vector<16x512xf32> to vector<16x256xf32>
    %c-1_i32_164 = arith.constant -1 : i32
    %461 = vector.broadcast %c-1_i32_164 : i32 to vector<1x256xi32>
    %462 = arith.addi %18, %461 : vector<1x256xi32>
    %c0_i32_165 = arith.constant 0 : i32
    %463 = vector.broadcast %c0_i32_165 : i32 to vector<1x256xi32>
    %464 = arith.cmpi sge, %462, %463 : vector<1x256xi32>
    %c-1_i32_166 = arith.constant -1 : i32
    %465 = vector.broadcast %c-1_i32_166 : i32 to vector<1x256xi32>
    %466 = arith.addi %18, %465 : vector<1x256xi32>
    %c16_i32_167 = arith.constant 16 : i32
    %467 = vector.broadcast %c16_i32_167 : i32 to vector<1x256xi32>
    %468 = arith.cmpi slt, %466, %467 : vector<1x256xi32>
    %469 = arith.andi %464, %468 : vector<1x256xi1>
    %cst_168 = arith.constant 0.000000e+00 : f32
    %470 = vector.broadcast %cst_168 : f32 to vector<16x256xf32>
    %471 = vector.shape_cast %469 : vector<1x256xi1> to vector<1x256xi1>
    %472 = vector.broadcast %471 : vector<1x256xi1> to vector<16x256xi1>
    %473 = arith.select %472, %460, %470 : vector<16x256xi1>, vector<16x256xf32>
    %474 = vector.extract_strided_slice %217 {offsets = [0, 160], sizes = [16, 256], strides = [1, 1]} : vector<16x512xf32> to vector<16x256xf32>
    %475 = vector.extract_strided_slice %217 {offsets = [0, 161], sizes = [16, 256], strides = [1, 1]} : vector<16x512xf32> to vector<16x256xf32>
    %c1_i32_169 = arith.constant 1 : i32
    %476 = vector.broadcast %c1_i32_169 : i32 to vector<1x256xi32>
    %477 = arith.addi %18, %476 : vector<1x256xi32>
    %c0_i32_170 = arith.constant 0 : i32
    %478 = vector.broadcast %c0_i32_170 : i32 to vector<1x256xi32>
    %479 = arith.cmpi sge, %477, %478 : vector<1x256xi32>
    %c1_i32_171 = arith.constant 1 : i32
    %480 = vector.broadcast %c1_i32_171 : i32 to vector<1x256xi32>
    %481 = arith.addi %18, %480 : vector<1x256xi32>
    %c16_i32_172 = arith.constant 16 : i32
    %482 = vector.broadcast %c16_i32_172 : i32 to vector<1x256xi32>
    %483 = arith.cmpi slt, %481, %482 : vector<1x256xi32>
    %484 = arith.andi %479, %483 : vector<1x256xi1>
    %cst_173 = arith.constant 0.000000e+00 : f32
    %485 = vector.broadcast %cst_173 : f32 to vector<16x256xf32>
    %486 = vector.shape_cast %484 : vector<1x256xi1> to vector<1x256xi1>
    %487 = vector.broadcast %486 : vector<1x256xi1> to vector<16x256xi1>
    %488 = arith.select %487, %475, %485 : vector<16x256xi1>, vector<16x256xf32>
    %489 = vector.extract_strided_slice %217 {offsets = [0, 162], sizes = [16, 256], strides = [1, 1]} : vector<16x512xf32> to vector<16x256xf32>
    %c2_i32_174 = arith.constant 2 : i32
    %490 = vector.broadcast %c2_i32_174 : i32 to vector<1x256xi32>
    %491 = arith.addi %18, %490 : vector<1x256xi32>
    %c0_i32_175 = arith.constant 0 : i32
    %492 = vector.broadcast %c0_i32_175 : i32 to vector<1x256xi32>
    %493 = arith.cmpi sge, %491, %492 : vector<1x256xi32>
    %c2_i32_176 = arith.constant 2 : i32
    %494 = vector.broadcast %c2_i32_176 : i32 to vector<1x256xi32>
    %495 = arith.addi %18, %494 : vector<1x256xi32>
    %c16_i32_177 = arith.constant 16 : i32
    %496 = vector.broadcast %c16_i32_177 : i32 to vector<1x256xi32>
    %497 = arith.cmpi slt, %495, %496 : vector<1x256xi32>
    %498 = arith.andi %493, %497 : vector<1x256xi1>
    %cst_178 = arith.constant 0.000000e+00 : f32
    %499 = vector.broadcast %cst_178 : f32 to vector<16x256xf32>
    %500 = vector.shape_cast %498 : vector<1x256xi1> to vector<1x256xi1>
    %501 = vector.broadcast %500 : vector<1x256xi1> to vector<16x256xi1>
    %502 = arith.select %501, %489, %499 : vector<16x256xi1>, vector<16x256xf32>
    %503 = tpu.concatenate %231, %245, %246, %260, %274, %288, %302, %303, %317, %331, %345, %359, %360, %374, %388, %402 in 0 : vector<16x256xf32>, vector<16x256xf32>, vector<16x256xf32>, vector<16x256xf32>, vector<16x256xf32>, vector<16x256xf32>, vector<16x256xf32>, vector<16x256xf32>, vector<16x256xf32>, vector<16x256xf32>, vector<16x256xf32>, vector<16x256xf32>, vector<16x256xf32>, vector<16x256xf32>, vector<16x256xf32>, vector<16x256xf32> -> vector<256x256xf32>
    %504 = tpu.concatenate %416, %417, %431, %445, %459, %473, %474, %488, %502 in 0 : vector<16x256xf32>, vector<16x256xf32>, vector<16x256xf32>, vector<16x256xf32>, vector<16x256xf32>, vector<16x256xf32>, vector<16x256xf32>, vector<16x256xf32>, vector<16x256xf32> -> vector<144x256xf32>
    %505 = tpu.concatenate %503, %504 in 0 : vector<256x256xf32>, vector<144x256xf32> -> vector<400x256xf32>
    %c0_179 = arith.constant 0 : index
    %c0_180 = arith.constant 0 : index
    %506 = vector.load %arg8[%c0_179, %c0_180] : memref<24x400xf32, #tpu.memory_space<vmem>>, vector<24x400xf32>
    %cst_181 = arith.constant dense<0.000000e+00> : vector<24x256xf32>
    %507 = tpu.matmul %506, %505, %cst_181 {dimension_numbers = #tpu.dot_dimension_numbers<[1], [0], [0], [1], [0, 0, 1, 1], [], []>} : vector<24x400xf32>, vector<400x256xf32>, vector<24x256xf32> -> vector<24x256xf32>
    %c0_182 = arith.constant 0 : index
    %c0_183 = arith.constant 0 : index
    %508 = vector.load %arg9[%c0_182, %c0_183] : memref<24x1xf32, #tpu.memory_space<vmem>>, vector<24x1xf32>
    %509 = vector.broadcast %508 : vector<24x1xf32> to vector<24x256xf32>
    %510 = arith.addf %507, %509 : vector<24x256xf32>
    %511 = vector.extract_strided_slice %23 {offsets = [32, 0], sizes = [16, 256], strides = [1, 1]} : vector<48x256xf32> to vector<16x256xf32>
    %cst_184 = arith.constant 0.000000e+00 : f32
    %512 = vector.broadcast %cst_184 : f32 to vector<4x128xf32>
    %513 = tpu.concatenate %512, %1, %512 in 1 : vector<4x128xf32>, vector<4x256xf32>, vector<4x128xf32> -> vector<4x512xf32>
    %514 = vector.extract_strided_slice %513 {offsets = [0, 111], sizes = [4, 256], strides = [1, 1]} : vector<4x512xf32> to vector<4x256xf32>
    %c-1_i32_185 = arith.constant -1 : i32
    %515 = vector.broadcast %c-1_i32_185 : i32 to vector<1x256xi32>
    %516 = arith.addi %18, %515 : vector<1x256xi32>
    %c0_i32_186 = arith.constant 0 : i32
    %517 = vector.broadcast %c0_i32_186 : i32 to vector<1x256xi32>
    %518 = arith.cmpi sge, %516, %517 : vector<1x256xi32>
    %c-1_i32_187 = arith.constant -1 : i32
    %519 = vector.broadcast %c-1_i32_187 : i32 to vector<1x256xi32>
    %520 = arith.addi %18, %519 : vector<1x256xi32>
    %c16_i32_188 = arith.constant 16 : i32
    %521 = vector.broadcast %c16_i32_188 : i32 to vector<1x256xi32>
    %522 = arith.cmpi slt, %520, %521 : vector<1x256xi32>
    %523 = arith.andi %518, %522 : vector<1x256xi1>
    %cst_189 = arith.constant 0.000000e+00 : f32
    %524 = vector.broadcast %cst_189 : f32 to vector<4x256xf32>
    %525 = vector.shape_cast %523 : vector<1x256xi1> to vector<1x256xi1>
    %526 = vector.broadcast %525 : vector<1x256xi1> to vector<4x256xi1>
    %527 = arith.select %526, %514, %524 : vector<4x256xi1>, vector<4x256xf32>
    %528 = vector.extract_strided_slice %513 {offsets = [0, 112], sizes = [4, 256], strides = [1, 1]} : vector<4x512xf32> to vector<4x256xf32>
    %529 = vector.extract_strided_slice %513 {offsets = [0, 113], sizes = [4, 256], strides = [1, 1]} : vector<4x512xf32> to vector<4x256xf32>
    %c1_i32_190 = arith.constant 1 : i32
    %530 = vector.broadcast %c1_i32_190 : i32 to vector<1x256xi32>
    %531 = arith.addi %18, %530 : vector<1x256xi32>
    %c0_i32_191 = arith.constant 0 : i32
    %532 = vector.broadcast %c0_i32_191 : i32 to vector<1x256xi32>
    %533 = arith.cmpi sge, %531, %532 : vector<1x256xi32>
    %c1_i32_192 = arith.constant 1 : i32
    %534 = vector.broadcast %c1_i32_192 : i32 to vector<1x256xi32>
    %535 = arith.addi %18, %534 : vector<1x256xi32>
    %c16_i32_193 = arith.constant 16 : i32
    %536 = vector.broadcast %c16_i32_193 : i32 to vector<1x256xi32>
    %537 = arith.cmpi slt, %535, %536 : vector<1x256xi32>
    %538 = arith.andi %533, %537 : vector<1x256xi1>
    %cst_194 = arith.constant 0.000000e+00 : f32
    %539 = vector.broadcast %cst_194 : f32 to vector<4x256xf32>
    %540 = vector.shape_cast %538 : vector<1x256xi1> to vector<1x256xi1>
    %541 = vector.broadcast %540 : vector<1x256xi1> to vector<4x256xi1>
    %542 = arith.select %541, %529, %539 : vector<4x256xi1>, vector<4x256xf32>
    %543 = vector.extract_strided_slice %513 {offsets = [0, 127], sizes = [4, 256], strides = [1, 1]} : vector<4x512xf32> to vector<4x256xf32>
    %c-1_i32_195 = arith.constant -1 : i32
    %544 = vector.broadcast %c-1_i32_195 : i32 to vector<1x256xi32>
    %545 = arith.addi %18, %544 : vector<1x256xi32>
    %c0_i32_196 = arith.constant 0 : i32
    %546 = vector.broadcast %c0_i32_196 : i32 to vector<1x256xi32>
    %547 = arith.cmpi sge, %545, %546 : vector<1x256xi32>
    %c-1_i32_197 = arith.constant -1 : i32
    %548 = vector.broadcast %c-1_i32_197 : i32 to vector<1x256xi32>
    %549 = arith.addi %18, %548 : vector<1x256xi32>
    %c16_i32_198 = arith.constant 16 : i32
    %550 = vector.broadcast %c16_i32_198 : i32 to vector<1x256xi32>
    %551 = arith.cmpi slt, %549, %550 : vector<1x256xi32>
    %552 = arith.andi %547, %551 : vector<1x256xi1>
    %cst_199 = arith.constant 0.000000e+00 : f32
    %553 = vector.broadcast %cst_199 : f32 to vector<4x256xf32>
    %554 = vector.shape_cast %552 : vector<1x256xi1> to vector<1x256xi1>
    %555 = vector.broadcast %554 : vector<1x256xi1> to vector<4x256xi1>
    %556 = arith.select %555, %543, %553 : vector<4x256xi1>, vector<4x256xf32>
    %557 = vector.extract_strided_slice %513 {offsets = [0, 128], sizes = [4, 256], strides = [1, 1]} : vector<4x512xf32> to vector<4x256xf32>
    %558 = vector.extract_strided_slice %513 {offsets = [0, 129], sizes = [4, 256], strides = [1, 1]} : vector<4x512xf32> to vector<4x256xf32>
    %c1_i32_200 = arith.constant 1 : i32
    %559 = vector.broadcast %c1_i32_200 : i32 to vector<1x256xi32>
    %560 = arith.addi %18, %559 : vector<1x256xi32>
    %c0_i32_201 = arith.constant 0 : i32
    %561 = vector.broadcast %c0_i32_201 : i32 to vector<1x256xi32>
    %562 = arith.cmpi sge, %560, %561 : vector<1x256xi32>
    %c1_i32_202 = arith.constant 1 : i32
    %563 = vector.broadcast %c1_i32_202 : i32 to vector<1x256xi32>
    %564 = arith.addi %18, %563 : vector<1x256xi32>
    %c16_i32_203 = arith.constant 16 : i32
    %565 = vector.broadcast %c16_i32_203 : i32 to vector<1x256xi32>
    %566 = arith.cmpi slt, %564, %565 : vector<1x256xi32>
    %567 = arith.andi %562, %566 : vector<1x256xi1>
    %cst_204 = arith.constant 0.000000e+00 : f32
    %568 = vector.broadcast %cst_204 : f32 to vector<4x256xf32>
    %569 = vector.shape_cast %567 : vector<1x256xi1> to vector<1x256xi1>
    %570 = vector.broadcast %569 : vector<1x256xi1> to vector<4x256xi1>
    %571 = arith.select %570, %558, %568 : vector<4x256xi1>, vector<4x256xf32>
    %572 = vector.extract_strided_slice %513 {offsets = [0, 143], sizes = [4, 256], strides = [1, 1]} : vector<4x512xf32> to vector<4x256xf32>
    %c-1_i32_205 = arith.constant -1 : i32
    %573 = vector.broadcast %c-1_i32_205 : i32 to vector<1x256xi32>
    %574 = arith.addi %18, %573 : vector<1x256xi32>
    %c0_i32_206 = arith.constant 0 : i32
    %575 = vector.broadcast %c0_i32_206 : i32 to vector<1x256xi32>
    %576 = arith.cmpi sge, %574, %575 : vector<1x256xi32>
    %c-1_i32_207 = arith.constant -1 : i32
    %577 = vector.broadcast %c-1_i32_207 : i32 to vector<1x256xi32>
    %578 = arith.addi %18, %577 : vector<1x256xi32>
    %c16_i32_208 = arith.constant 16 : i32
    %579 = vector.broadcast %c16_i32_208 : i32 to vector<1x256xi32>
    %580 = arith.cmpi slt, %578, %579 : vector<1x256xi32>
    %581 = arith.andi %576, %580 : vector<1x256xi1>
    %cst_209 = arith.constant 0.000000e+00 : f32
    %582 = vector.broadcast %cst_209 : f32 to vector<4x256xf32>
    %583 = vector.shape_cast %581 : vector<1x256xi1> to vector<1x256xi1>
    %584 = vector.broadcast %583 : vector<1x256xi1> to vector<4x256xi1>
    %585 = arith.select %584, %572, %582 : vector<4x256xi1>, vector<4x256xf32>
    %586 = vector.extract_strided_slice %513 {offsets = [0, 144], sizes = [4, 256], strides = [1, 1]} : vector<4x512xf32> to vector<4x256xf32>
    %587 = vector.extract_strided_slice %513 {offsets = [0, 145], sizes = [4, 256], strides = [1, 1]} : vector<4x512xf32> to vector<4x256xf32>
    %c1_i32_210 = arith.constant 1 : i32
    %588 = vector.broadcast %c1_i32_210 : i32 to vector<1x256xi32>
    %589 = arith.addi %18, %588 : vector<1x256xi32>
    %c0_i32_211 = arith.constant 0 : i32
    %590 = vector.broadcast %c0_i32_211 : i32 to vector<1x256xi32>
    %591 = arith.cmpi sge, %589, %590 : vector<1x256xi32>
    %c1_i32_212 = arith.constant 1 : i32
    %592 = vector.broadcast %c1_i32_212 : i32 to vector<1x256xi32>
    %593 = arith.addi %18, %592 : vector<1x256xi32>
    %c16_i32_213 = arith.constant 16 : i32
    %594 = vector.broadcast %c16_i32_213 : i32 to vector<1x256xi32>
    %595 = arith.cmpi slt, %593, %594 : vector<1x256xi32>
    %596 = arith.andi %591, %595 : vector<1x256xi1>
    %cst_214 = arith.constant 0.000000e+00 : f32
    %597 = vector.broadcast %cst_214 : f32 to vector<4x256xf32>
    %598 = vector.shape_cast %596 : vector<1x256xi1> to vector<1x256xi1>
    %599 = vector.broadcast %598 : vector<1x256xi1> to vector<4x256xi1>
    %600 = arith.select %599, %587, %597 : vector<4x256xi1>, vector<4x256xf32>
    %601 = arith.addf %527, %528 : vector<4x256xf32>
    %602 = arith.addf %601, %542 : vector<4x256xf32>
    %603 = arith.addf %602, %556 : vector<4x256xf32>
    %604 = arith.addf %603, %557 : vector<4x256xf32>
    %605 = arith.addf %604, %571 : vector<4x256xf32>
    %606 = arith.addf %605, %585 : vector<4x256xf32>
    %607 = arith.addf %606, %586 : vector<4x256xf32>
    %608 = arith.addf %607, %600 : vector<4x256xf32>
    %cst_215 = arith.constant 0.111111112 : f32
    %609 = vector.broadcast %cst_215 : f32 to vector<4x256xf32>
    %610 = arith.mulf %608, %609 : vector<4x256xf32>
    %c0_216 = arith.constant 0 : index
    %c0_217 = arith.constant 0 : index
    %611 = vector.load %arg10[%c0_216, %c0_217] : memref<24x4xf32, #tpu.memory_space<vmem>>, vector<24x4xf32>
    %cst_218 = arith.constant dense<0.000000e+00> : vector<24x256xf32>
    %612 = tpu.matmul %611, %610, %cst_218 {dimension_numbers = #tpu.dot_dimension_numbers<[1], [0], [0], [1], [0, 0, 1, 1], [], []>} : vector<24x4xf32>, vector<4x256xf32>, vector<24x256xf32> -> vector<24x256xf32>
    %c0_219 = arith.constant 0 : index
    %c0_220 = arith.constant 0 : index
    %613 = vector.load %arg11[%c0_219, %c0_220] : memref<24x1xf32, #tpu.memory_space<vmem>>, vector<24x1xf32>
    %614 = vector.broadcast %613 : vector<24x1xf32> to vector<24x256xf32>
    %615 = arith.addf %612, %614 : vector<24x256xf32>
    %616 = tpu.concatenate %214, %510, %511, %615 in 0 : vector<24x256xf32>, vector<24x256xf32>, vector<16x256xf32>, vector<24x256xf32> -> vector<88x256xf32>
    %c0_221 = arith.constant 0 : index
    %c0_222 = arith.constant 0 : index
    %c0_223 = arith.constant 0 : index
    %617 = vector.load %arg12[%c0_221, %c0_222, %c0_223] : memref<1x88x256xf32, #tpu.memory_space<vmem>>, vector<1x88x256xf32>
    %618 = vector.shape_cast %617 : vector<1x88x256xf32> to vector<88x256xf32>
    %619 = vector.shape_cast %616 : vector<88x256xf32> to vector<1x88x256xf32>
    tpu.vector_store %arg12[%c0_221, %c0_222, %c0_223], %619 {strides = array<i32>} : memref<1x88x256xf32, #tpu.memory_space<vmem>>, vector<1x88x256xf32>,
    return
  }
  func.func @transform_0(%arg0: i32) -> (i32, i32, i32) {
    %c0_i32 = arith.constant 0 : i32
    %c0_i32_0 = arith.constant 0 : i32
    %c0_i32_1 = arith.constant 0 : i32
    return %arg0, %c0_i32, %c0_i32_0 : i32, i32, i32
  }
  func.func @transform_1(%arg0: i32) -> (i32, i32) {
    %c0_i32 = arith.constant 0 : i32
    %c0_i32_0 = arith.constant 0 : i32
    %c0_i32_1 = arith.constant 0 : i32
    return %c0_i32, %c0_i32_0 : i32, i32
  }
  func.func @transform_2(%arg0: i32) -> (i32, i32) {
    %c0_i32 = arith.constant 0 : i32
    %c0_i32_0 = arith.constant 0 : i32
    %c0_i32_1 = arith.constant 0 : i32
    return %c0_i32, %c0_i32_0 : i32, i32
  }
  func.func @transform_3(%arg0: i32) -> (i32, i32) {
    %c0_i32 = arith.constant 0 : i32
    %c0_i32_0 = arith.constant 0 : i32
    %c0_i32_1 = arith.constant 0 : i32
    return %c0_i32, %c0_i32_0 : i32, i32
  }
  func.func @transform_4(%arg0: i32) -> (i32, i32) {
    %c0_i32 = arith.constant 0 : i32
    %c0_i32_0 = arith.constant 0 : i32
    %c0_i32_1 = arith.constant 0 : i32
    return %c0_i32, %c0_i32_0 : i32, i32
  }
  func.func @transform_5(%arg0: i32) -> (i32, i32) {
    %c0_i32 = arith.constant 0 : i32
    %c0_i32_0 = arith.constant 0 : i32
    %c0_i32_1 = arith.constant 0 : i32
    return %c0_i32, %c0_i32_0 : i32, i32
  }
  func.func @transform_6(%arg0: i32) -> (i32, i32) {
    %c0_i32 = arith.constant 0 : i32
    %c0_i32_0 = arith.constant 0 : i32
    %c0_i32_1 = arith.constant 0 : i32
    return %c0_i32, %c0_i32_0 : i32, i32
  }
  func.func @transform_7(%arg0: i32) -> (i32, i32) {
    %c0_i32 = arith.constant 0 : i32
    %c0_i32_0 = arith.constant 0 : i32
    %c0_i32_1 = arith.constant 0 : i32
    return %c0_i32, %c0_i32_0 : i32, i32
  }
  func.func @transform_8(%arg0: i32) -> (i32, i32) {
    %c0_i32 = arith.constant 0 : i32
    %c0_i32_0 = arith.constant 0 : i32
    %c0_i32_1 = arith.constant 0 : i32
    return %c0_i32, %c0_i32_0 : i32, i32
  }
  func.func @transform_9(%arg0: i32) -> (i32, i32) {
    %c0_i32 = arith.constant 0 : i32
    %c0_i32_0 = arith.constant 0 : i32
    %c0_i32_1 = arith.constant 0 : i32
    return %c0_i32, %c0_i32_0 : i32, i32
  }
  func.func @transform_10(%arg0: i32) -> (i32, i32) {
    %c0_i32 = arith.constant 0 : i32
    %c0_i32_0 = arith.constant 0 : i32
    %c0_i32_1 = arith.constant 0 : i32
    return %c0_i32, %c0_i32_0 : i32, i32
  }
  func.func @transform_11(%arg0: i32) -> (i32, i32, i32) {
    %c0_i32 = arith.constant 0 : i32
    %c0_i32_0 = arith.constant 0 : i32
    %c0_i32_1 = arith.constant 0 : i32
    return %arg0, %c0_i32, %c0_i32_0 : i32, i32, i32
  }
}

</mosaic_0001>

<bundles_post_ra>
// kernel: inception_forward_pallas.1
= control target key start
LH: loop header
LB: loop body
LE: loop exit
PB: predicated region body
PF: predicated region fallthrough
CT: control target
= control target key end

     0   :  { %s2598_s17 = smov 0   ;;  %s4326_s0 = inlined_call_operand.vmem [shape: f32[2,4,256], index: 0, kind: input, shape index: {}]   ;;  %s4327_s1 = inlined_call_operand.vmem [shape: f32[48,4], index: 1, kind: input, shape index: {}]   ;;  %s4328_s2 = inlined_call_operand.vmem [shape: f32[48,1], index: 2, kind: input, shape index: {}]   ;;  %s4329_s3 = inlined_call_operand.vmem [shape: f32[24,144], index: 3, kind: input, shape index: {}]   ;;  %s4330_s4 = inlined_call_operand.vmem [shape: f32[24,1], index: 4, kind: input, shape index: {}]   ;;  %s4331_s5 = inlined_call_operand.vmem [shape: f32[24,216], index: 5, kind: input, shape index: {}]   ;;  %s4332_s6 = inlined_call_operand.vmem [shape: f32[24,1], index: 6, kind: input, shape index: {}]   ;;  %s4333_s7 = inlined_call_operand.vmem [shape: f32[24,400], index: 7, kind: input, shape index: {}]   ;;  %s4334_s8 = inlined_call_operand.vmem [shape: f32[24,1], index: 8, kind: input, shape index: {}]   ;;  %s4335_s9 = inlined_call_operand.vmem [shape: f32[24,4], index: 9, kind: input, shape index: {}]   ;;  %s4336_s10 = inlined_call_operand.vmem [shape: f32[24,1], index: 10, kind: input, shape index: {}]   ;;  %s4337_s11 = inlined_call_operand.vmem [shape: f32[2,88,256], index: 11, kind: output, shape index: {}]  }
   0x1 LB: > { %s2292_s18 = sadd.s32 4294967295, %s2510_s17   ;;  %p2296_p0 = scmp.ge.s32.totalorder %s2510_s17, 1  ;;  %s2510_s17 = sphi %s2598_s17, %s21_s17  }
   0x2   : > { %p337_p1 = scmp.lt.s32.totalorder %s2510_s17, 3 }
   0x4   : > { %p338_p2 = pnand %p2296_p0, %p337_p1 }
   0x6   : > { %341 = sbr.rel (%p338_p2) target bundleno = 1115 (0x45b), region = 64 }
   0xb   : > { %p377_p3 = scmp.lt.s32.totalorder %s2292_s18, 1  ;;  %v4360_v0 = vmov 0.0   ;;  %v422_v1 = vld [vmem:[%s4328_s2 + $0x8] sm:$0xff]  ;;  %v2513_v2 = vmov 0   ;;  %s4344_s21 = smov 112   ;;  %v421_v3 = vld [vmem:[%s4328_s2] sm:$0xff]  ;;  %v388_v47 = vlaneseq }
   0xc   : > { %547 = vmatprep.mubr.f32.mxu1 %v4360_v0  ;;  %2500 = vset.pattern.permute.xlu0 %v2513_v2  ;;  %vm4370_vm0 = vcmask 1043456   ;;  %s4342_s28 = smov 113   ;;  %v415_v6 = vld [vmem:[%s4327_s1] sm:$0xff]  ;;  %vm4369_vm1 = vcmask 31744   ;;  %s4338_s12 = smov 1   ;;  %v416_v7 = vld [vmem:[%s4327_s1 + $0x8] sm:$0xff] }
   0xd   : > { %s4525_s18 = smov (!%p377_p3, %s2292_s18), 1  ;;  %774 = vrot.lane.b32.xlu1 %v4360_v0, %s4344_s21  ;;  %434 = vperm.xlu0 %2500, %v422_v1   ;;  %s4348_s13 = smov 127   ;;  %v417_v8 = vld [vmem:[%s4327_s1 + $0x10] sm:$0xff]  ;;  %v418_v9 = vld [vmem:[%s4327_s1 + $0x18] sm:$0xff]  ;;  %v419_v10 = vld [vmem:[%s4327_s1 + $0x20] sm:$0xff]  ;;  %vm4371_vm2 = vcmask 130048  }
   0xe   : > { %2501 = vset.pattern.permute.xlu1 %v2513_v2  ;;  %s2464_s22 = sshll.u32 %s4525_s18, 3  ;;  %s2518_s16 = smov 16   ;;  %v420_v11 = vld [vmem:[%s4327_s1 + $0x28] sm:$0xff]  ;;  %v795_v22 = vld [vmem:[%s4330_s4] sm:$0xff]  ;;  %v797_v24 = vld [vmem:[%s4330_s4 + $0x10] sm:$0xff]  ;;  %v389_v50 = vand.u32 127, %v388_v47 }
   0xf   : > { %s2621_s27 = scalar_lea.vmem %s4326_s0, %s2464_s22  ;;  %s4340_s19 = smov 15   ;;  %v796_v23 = vld [vmem:[%s4330_s4 + $0x8] sm:$0xff]  ;;  %v423_v26 = vld [vmem:[%s4328_s2 + $0x10] sm:$0xff]  ;;  %v424_v27 = vld [vmem:[%s4328_s2 + $0x18] sm:$0xff]  ;;  %vm780_vm3 = vcmask 916480   ;;  %vm715_vm5 = vcmask 924672  }
  0x10   : > { %v387_v4 = vld [vmem:[%s2621_s27] sm:$0xff]  ;;  %s2520_s23 = smov 17   ;;  %s4346_s15 = smov 111   ;;  %v790_v25 = vld [vmem:[%s4329_s3 + $0x8] sm:$0xff]  ;;  %v390_v53 = vadd.s32 128, %v389_v50  ;;  %v2825_v59 = vand.u32 15, %v389_v50 }
  0x11   : > { %709 = vrot.lane.b32.xlu1 %v4360_v0, %s4342_s28  ;;  %v2626_v5 = vcombine.high %v387_v4, %v387_v4  ;;  %429 = vperm.xlu0 %2500, %v421_v3   ;;  %v426_v28 = vld [vmem:[%s4328_s2 + $0x28] sm:$0xff]  ;;  %v425_v29 = vld [vmem:[%s4328_s2 + $0x20] sm:$0xff]  ;;  %s2522_s20 = smov 18   ;;  %s2523_s22 = smov 30   ;;  %vm692_vm8 = vcmask 1039360   ;;  %vm669_vm10 = vcmask 7168  }
  0x12   : > { %s2524_s24 = smov 95   ;;  %s2525_s25 = smov 31   ;;  %v2819_v56 = vand.u32 15, %v390_v53  ;;  %v2833_v63 = vadd.s32 4294967295, %v2825_v59  ;;  %vm4372_vm11 = vcmask 121856   ;;  %vm611_vm12 = vcmask 138240  }
  0x13   : > { %4398 = vst [vmem:[#allocation2_spill] sm:$0xff] %v2626_v5  ;;  %2300 = vmatprep.subr.msk.mxu1 %vm4370_vm0, %v2626_v5  ;;  %s2526_s26 = smov 96   ;;  %s2527_s29 = smov 32   ;;  %vm738_vm13 = vcmask 908288   ;;  %vm1386_vm15 = vcmask 146432  }
  0x14   : > { %2301 = vmatpush1.msk.msra.mxu1 %vm4370_vm0, %v387_v4  ;;  %s4358_s30 = smov 33   ;;  %s4352_s14 = smov 114   ;;  %v2828_v60 = vadd.s32 4294967295, %v2819_v56  ;;  %v2842_v4 = vadd.s32 1, %v2819_v56  ;;  %vm586_vm6 = vcmp.ge.s32.totalorder %v2833_v63, 0  ;;  %v1803_v63 = vld [vmem:[%s4333_s7 + $0x38] sm:$0xff] }
  0x15   : > { %659 = vrot.lane.b32.xlu1 %v4360_v0, %s4338_s12  ;;  %2302 = vmatmul.mubr.msk.f32.vlgmr.msra.gmra.mxu1 %vm4369_vm1, %v415_v6 }
  0x16   : > { %686 = vrot.lane.b32.xlu0 %v4360_v0, %s4348_s13  ;;  %553 = vmatprep.mubr.f32.mxu1 %v4360_v0  ;;  %vm587_vm4 = vcmp.ge.s32.totalorder %v2828_v60, 0  ;;  %vm629_vm7 = vcmp.lt.s32.totalorder %v2842_v4, 16  ;;  %v1800_v4 = vld [vmem:[%s4333_s7 + $0x20] sm:$0xff] }
  0x19   : > { %751 = vrot.lane.b32.xlu1 %v4360_v0, %s2518_s16  ;;  %2303 = vmatmul.mubr.msk.f32.gmra.mxu1 %vm4369_vm1, %v416_v7 }
  0x1a   : > { %636 = vrot.lane.b32.xlu0 %v4360_v0, %s4340_s19  ;;  %559 = vmatprep.mubr.f32.mxu1 %v4360_v0 }
  0x1d   : > { %2304 = vmatmul.mubr.msk.f32.gmra.mxu1 %vm4369_vm1, %v417_v8 }
  0x1e   : > { %601 = vrot.lane.b32.xlu0 %v4360_v0, %s2520_s23  ;;  %565 = vmatprep.mubr.f32.mxu1 %v4360_v0 }
  0x21   : > { %2305 = vmatmul.mubr.msk.f32.gmra.mxu1 %vm4369_vm1, %v418_v9  ;;  %v2849_v9 = vadd.s32 1, %v2825_v59 }
  0x22   : > { %571 = vmatprep.mubr.f32.mxu1 %v4360_v0 }
  0x23   : > { %vm628_vm9 = vcmp.lt.s32.totalorder %v2849_v9, 16  ;;  %v1805_v9 = vld [vmem:[%s4333_s7 + $0x48] sm:$0xff] }
  0x25   : > { %2306 = vmatmul.mubr.msk.f32.gmra.mxu1 %vm4369_vm1, %v419_v10 }
  0x26   : > { %577 = vmatprep.mubr.f32.mxu1 %v4360_v0 }
  0x29   : > { %2307 = vmatmul.mubr.msk.f32.gmra.mxu1 %vm4369_vm1, %v420_v11 }
  0x2a   : > { %2332 = vmatprep.mubr.msk.f32.mxu1 %vm4371_vm2, %v790_v25 }
  0x7f   : > { %v2781_v30 = vpop.permute.xlu1 %774 }
  0x83   : > { %v2787_v31 = vpop.permute.xlu1 %709 }
  0x87   : > { %v2797_v33 = vpop.permute.xlu1 %659 }
  0x88   : > { %v435_v12 = vpop.permute.xlu0 %434 }
  0x8b   : > { %v2803_v35 = vpop.permute.xlu1 %751 }
  0x8c   : > { %v430_v13 = vpop.permute.xlu0 %429 }
  0x90   : > { %v2789_v32 = vpop.permute.xlu0 %686 }
  0x94   : > { %v2799_v34 = vpop.permute.xlu0 %636 }
  0x98   : > { %v2805_v36 = vpop.permute.xlu0 %601 }
  0xd5   : > { %v549_v14 = vpop.f32.mrf.mxu1 }
  0xd6   : > { %v2670_v15 = vadd.f32 %v549_v14, %v430_v13 }
  0xd7   : > { %v551_v16 = vpop.f32.mrf.mxu1 }
  0xd8   : > { %705 = vrot.lane.b32.xlu1 %v2670_v15, %s4342_s28  ;;  %770 = vrot.lane.b32.xlu0 %v2670_v15, %s4344_s21  ;;  %v2680_v17 = vadd.f32 %v551_v16, %v430_v13 }
  0xd9   : > { %v555_v18 = vpop.f32.mrf.mxu1 }
  0xda   : > { %v2698_v19 = vadd.f32 %v555_v18, %v435_v12 }
  0xdb   : > { %v557_v20 = vpop.f32.mrf.mxu1 }
  0xdc   : > { %638 = vrot.lane.b32.xlu1 %v2670_v15, %s4340_s19  ;;  %682 = vrot.lane.b32.xlu0 %v2670_v15, %s4348_s13  ;;  %v2712_v21 = vadd.f32 %v557_v20, %v435_v12 }
  0xe0   : > { %772 = vrot.lane.b32.xlu1 %v2680_v17, %s4344_s21  ;;  %661 = vrot.lane.b32.xlu0 %v2670_v15, %s4338_s12 }
  0xe4   : > { %684 = vrot.lane.b32.xlu1 %v2680_v17, %s4348_s13  ;;  %753 = vrot.lane.b32.xlu0 %v2670_v15, %s2518_s16 }
  0xe8   : > { %663 = vrot.lane.b32.xlu1 %v2680_v17, %s4338_s12  ;;  %707 = vrot.lane.b32.xlu0 %v2680_v17, %s4342_s28 }
  0xec   : > { %755 = vrot.lane.b32.xlu1 %v2680_v17, %s2518_s16  ;;  %640 = vrot.lane.b32.xlu0 %v2680_v17, %s4340_s19 }
  0xf0   : > { %711 = vrot.lane.b32.xlu1 %v2698_v19, %s4342_s28  ;;  %776 = vrot.lane.b32.xlu0 %v2698_v19, %s4344_s21 }
  0xf4   : > { %665 = vrot.lane.b32.xlu1 %v2698_v19, %s4338_s12  ;;  %688 = vrot.lane.b32.xlu0 %v2698_v19, %s4348_s13 }
  0xf8   : > { %757 = vrot.lane.b32.xlu1 %v2698_v19, %s2518_s16  ;;  %642 = vrot.lane.b32.xlu0 %v2698_v19, %s4340_s19 }
  0xfc   : > { %778 = vrot.lane.b32.xlu1 %v2712_v21, %s4344_s21  ;;  %607 = vrot.lane.b32.xlu0 %v2698_v19, %s2520_s23  ;;  %s4356_s21 = smov 98  }
 0x100   : > { %603 = vrot.lane.b32.xlu1 %v2670_v15, %s2520_s23  ;;  %713 = vrot.lane.b32.xlu0 %v2712_v21, %s4342_s28  ;;  %s4354_s28 = smov 34  }
 0x104   : > { %690 = vrot.lane.b32.xlu1 %v2712_v21, %s4348_s13  ;;  %605 = vrot.lane.b32.xlu0 %v2680_v17, %s2520_s23  ;;  %s4400_s13 = smov 98  }
 0x108   : > { %732 = vrot.lane.b32.xlu1 %v4360_v0, %s4346_s15  ;;  %730 = vrot.lane.b32.xlu0 %v2680_v17, %s4346_s15 }
 0x10c   : > { %734 = vrot.lane.b32.xlu1 %v2698_v19, %s4346_s15  ;;  %667 = vrot.lane.b32.xlu0 %v2712_v21, %s4338_s12  ;;  %s2530_s12 = smov 97  }
 0x110   : > { %644 = vrot.lane.b32.xlu1 %v2712_v21, %s4340_s19  ;;  %800 = vperm.xlu0 %2500, %v795_v22   ;;  %s4350_s19 = smov 110  }
 0x114   : > { %728 = vrot.lane.b32.xlu1 %v2670_v15, %s4346_s15  ;;  %759 = vrot.lane.b32.xlu0 %v2712_v21, %s2518_s16 }
 0x118   : > { %609 = vrot.lane.b32.xlu1 %v2712_v21, %s2520_s23  ;;  %805 = vperm.xlu0 %2500, %v796_v23  }
 0x11c   : > { %810 = vperm.xlu1 %2501, %v797_v24   ;;  %736 = vrot.lane.b32.xlu0 %v2712_v21, %s4346_s15  ;;  %s4401_s15 = smov 34  }
 0x120   : > { %439 = vperm.xlu1 %2501, %v423_v26   ;;  %444 = vperm.xlu0 %2500, %v424_v27  }
 0x124   : > { %454 = vperm.xlu0 %2500, %v426_v28   ;;  %449 = vperm.xlu1 %2501, %v425_v29  }
 0x128   : > { %1376 = vrot.lane.b32.xlu0 %v4360_v0, %s2522_s20  ;;  %1353 = vrot.lane.b32.xlu1 %v4360_v0, %s2523_s22 }
 0x12c   : > { %1684 = vrot.lane.b32.xlu0 %v4360_v0, %s2524_s24  ;;  %1318 = vrot.lane.b32.xlu1 %v4360_v0, %s2525_s25 }
 0x130   : > { %1781 = vrot.lane.b32.xlu0 %v4360_v0, %s2526_s26  ;;  %1726 = vrot.lane.b32.xlu1 %v4360_v0, %s2527_s29 }
 0x134   : > { %1295 = vrot.lane.b32.xlu0 %v4360_v0, %s4358_s30  ;;  %1552 = vrot.lane.b32.xlu1 %v4360_v0, %s4352_s14  ;;  %s4428_s14 = smov 1  }
 0x138   : > { %1661 = vrot.lane.b32.xlu0 %v4360_v0, %s2530_s12  ;;  %1615 = vrot.lane.b32.xlu1 %v4360_v0, %s4350_s19  ;;  %s2465_s19 = smul.u32 176, %s4525_s18  ;;  %s4399_s18 = smov 33  }
 0x13a   : > { %s3001_s30 = scalar_lea.vmem %s4337_s11, %s2465_s19  ;;  %s2537_s19 = smov 14  }
 0x13c   : > { %1272 = vrot.lane.b32.xlu0 %v4360_v0, %s4354_s28  ;;  %s4402_s28 = smov 114  }
 0x140   : > { %1638 = vrot.lane.b32.xlu0 %v4360_v0, %s4356_s21  ;;  %s2536_s21 = smov 2  }
 0x14a   : > { %v706_v37 = vpop.permute.xlu1 %705  ;;  %v771_v38 = vpop.permute.xlu0 %770 }
 0x14e   : > { %v2807_v39 = vpop.permute.xlu1 %638  ;;  %v683_v40 = vpop.permute.xlu0 %682 }
 0x152   : > { %v773_v41 = vpop.permute.xlu1 %772  ;;  %v2809_v42 = vpop.permute.xlu0 %661 }
 0x153   : > { %v782_v3 = vsel %vm780_vm3, %v773_v41, %v2781_v30  ;;  %v781_v8 = vsel %vm780_vm3, %v771_v38, %v773_v41 }
 0x156   : > { %v685_v43 = vpop.permute.xlu1 %684  ;;  %v2811_v44 = vpop.permute.xlu0 %753 }
 0x157   : > { %v694_v22 = vsel %vm692_vm8, %v685_v43, %v2789_v32  ;;  %v693_v23 = vsel %vm692_vm8, %v683_v40, %v685_v43 }
 0x15a   : > { %v2813_v45 = vpop.permute.xlu1 %663  ;;  %v708_v46 = vpop.permute.xlu0 %707 }
 0x15b   : > { %v717_v12 = vsel %vm715_vm5, %v708_v46, %v2787_v31  ;;  %v716_v13 = vsel %vm715_vm5, %v706_v37, %v708_v46 }
 0x15e   : > { %v2815_v48 = vpop.permute.xlu1 %755  ;;  %v2817_v49 = vpop.permute.xlu0 %640 }
 0x15f   : > { %v648_v40 = vsel %vm4372_vm11, %v2807_v39, %v2817_v49  ;;  %v763_v53 = vsel %vm4371_vm2, %v2811_v44, %v2815_v48 }
 0x162   : > { %v712_v51 = vpop.permute.xlu1 %711  ;;  %v777_v52 = vpop.permute.xlu0 %776 }
 0x166   : > { %v666_v54 = vpop.permute.xlu1 %665  ;;  %v689_v55 = vpop.permute.xlu0 %688 }
 0x167   : > { %v672_v29 = vsel %vm669_vm10, %v2797_v33, %v666_v54 }
 0x16a   : > { %v2821_v57 = vpop.permute.xlu1 %757  ;;  %v2823_v58 = vpop.permute.xlu0 %642 }
 0x16b   : > { %v649_v38 = vsel %vm4372_vm11, %v2799_v34, %v2823_v58 }
 0x16e   : > { %v779_v61 = vpop.permute.xlu1 %778  ;;  %v2830_v62 = vpop.permute.xlu0 %607 }
 0x16f   : > { %v784_v1 = vsel %vm780_vm3, %v779_v61, %v2781_v30  ;;  %v783_v2 = vsel %vm780_vm3, %v777_v52, %v779_v61 }
 0x170   : > { %822 = vmatprep.subr.mxu1 %v784_v1 }
 0x171   : > { %823 = vmatpush1.msra.mxu1 %v783_v2 }
 0x172   : > { %v2844_v6 = vpop.permute.xlu1 %603  ;;  %824 = vmatprep.subr.mxu1 %v782_v3  ;;  %v714_v7 = vpop.permute.xlu0 %713 }
 0x173   : > { %v718_v10 = vsel %vm715_vm5, %v712_v51, %v714_v7  ;;  %825 = vmatpush1.msra.mxu1 %v781_v8  ;;  %v719_v11 = vsel %vm715_vm5, %v714_v7, %v2787_v31  ;;  %v789_v8 = vld [vmem:[%s4329_s3] sm:$0xff] }
 0x174   : > { %2308 = vmatprep.subr.msk.mxu1 %vm587_vm4, %v719_v11 }
 0x175   : > { %2309 = vmatpush1.msk.msra.mxu1 %vm586_vm6, %v718_v10 }
 0x176   : > { %v691_v14 = vpop.permute.xlu1 %690  ;;  %2310 = vmatprep.subr.msk.mxu1 %vm587_vm4, %v717_v12  ;;  %v606_v16 = vpop.permute.xlu0 %605 }
 0x177   : > { %v695_v18 = vsel %vm692_vm8, %v689_v55, %v691_v14  ;;  %2311 = vmatpush1.msk.msra.mxu1 %vm586_vm6, %v716_v13  ;;  %v696_v20 = vsel %vm692_vm8, %v691_v14, %v2789_v32  ;;  %v762_v55 = vsel %vm4371_vm2, %v2803_v35, %v2811_v44  ;;  %v613_v48 = vsel %vm611_vm12, %v2844_v6, %v606_v16  ;;  %v792_v14 = vld [vmem:[%s4329_s3 + $0x18] sm:$0xff] }
 0x178   : > { %2312 = vmatprep.subr.msk.mxu1 %vm629_vm7, %v696_v20  ;;  %v612_v44 = vsel %vm611_vm12, %v2805_v36, %v2844_v6 }
 0x179   : > { %2313 = vmatpush1.msk.msra.mxu1 %vm628_vm9, %v695_v18  ;;  %v791_v18 = vld [vmem:[%s4329_s3 + $0x10] sm:$0xff] }
 0x17a   : > { %v2877_v24 = vpop.permute.xlu1 %732  ;;  %2314 = vmatprep.subr.msk.mxu1 %vm629_vm7, %v694_v22  ;;  %v2881_v25 = vpop.permute.xlu0 %730 }
 0x17b   : > { %2315 = vmatpush1.msk.msra.mxu1 %vm628_vm9, %v693_v23  ;;  %v740_v6 = vsel %vm738_vm13, %v2881_v25, %v2877_v24 }
 0x17c   : > { %834 = vmatprep.subr.mxu1 %v2712_v21  ;;  %v671_v21 = vsel %vm669_vm10, %v2809_v42, %v2813_v45 }
 0x17d   : > { %835 = vmatpush1.msra.mxu1 %v2698_v19  ;;  %v561_v19 = vpop.f32.mrf.mxu1 }
 0x17e   : > { %v735_v26 = vpop.permute.xlu1 %734  ;;  %836 = vmatprep.subr.mxu1 %v2680_v17  ;;  %v668_v27 = vpop.permute.xlu0 %667  ;;  %v670_v17 = vsel %vm669_vm10, %v2797_v33, %v2809_v42  ;;  %v647_v42 = vsel %vm4372_vm11, %v2799_v34, %v2807_v39  ;;  %v764_v39 = vsel %vm4371_vm2, %v2803_v35, %v2821_v57 }
 0x17f   : > { %v673_v28 = vsel %vm669_vm10, %v666_v54, %v668_v27  ;;  %837 = vmatpush1.msra.mxu1 %v2670_v15  ;;  %v2918_v41 = vpop.f32.mrf.mxu1 }
 0x180   : > { %2316 = vmatprep.subr.msk.mxu1 %vm587_vm4, %v673_v28 }
 0x181   : > { %2317 = vmatpush1.msk.msra.mxu1 %vm586_vm6, %v672_v29  ;;  %v2927_v43 = vpop.f32.mrf.mxu1  ;;  %v793_v29 = vld [vmem:[%s4329_s3 + $0x20] sm:$0xff] }
 0x182   : > { %v645_v15 = vpop.permute.xlu1 %644  ;;  %2318 = vmatprep.subr.msk.mxu1 %vm587_vm4, %v671_v21 }
 0x183   : > { %v650_v37 = vsel %vm4372_vm11, %v2823_v58, %v645_v15  ;;  %2319 = vmatpush1.msk.msra.mxu1 %vm586_vm6, %v670_v17  ;;  %v2931_v47 = vpop.f32.mrf.mxu1  ;;  %vm1328_vm11 = vcmask 252928  }
 0x184   : > { %2320 = vmatprep.subr.msk.mxu1 %vm629_vm7, %v650_v37 }
 0x185   : > { %2321 = vmatpush1.msk.msra.mxu1 %vm628_vm9, %v649_v38  ;;  %v573_v52 = vpop.f32.mrf.mxu1 }
 0x186   : > { %2322 = vmatprep.subr.msk.mxu1 %vm629_vm7, %v648_v40  ;;  %v729_v45 = vpop.permute.xlu1 %728 }
 0x187   : > { %2323 = vmatpush1.msk.msra.mxu1 %vm628_vm9, %v647_v42  ;;  %v575_v61 = vpop.f32.mrf.mxu1  ;;  %v739_v10 = vsel %vm738_vm13, %v729_v45, %v2881_v25 }
 0x189   : > { %v579_v7 = vpop.f32.mrf.mxu1 }
 0x18a   : > { %v610_v51 = vpop.permute.xlu1 %609 }
 0x18b   : > { %v2929_v46 = vpop.permute.xlu0 %800  ;;  %v615_v58 = vsel %vm611_vm12, %v2830_v62, %v610_v51  ;;  %v581_v16 = vpop.f32.mrf.mxu1 }
 0x18f   : > { %v760_v49 = vpop.permute.xlu0 %759 }
 0x190   : > { %v765_v50 = vsel %vm4371_vm2, %v2821_v57, %v760_v49  ;;  %v614_v57 = vsel %vm611_vm12, %v2805_v36, %v2830_v62 }
 0x191   : > { %846 = vmatprep.subr.mxu1 %v765_v50 }
 0x192   : > { %847 = vmatpush1.msra.mxu1 %v764_v39 }
 0x193   : > { %848 = vmatprep.subr.mxu1 %v763_v53  ;;  %v2941_v54 = vpop.permute.xlu0 %805 }
 0x194   : > { %849 = vmatpush1.msra.mxu1 %v762_v55 }
 0x195   : > { %2324 = vmatprep.subr.msk.mxu1 %vm587_vm4, %v615_v58 }
 0x196   : > { %2325 = vmatpush1.msk.msra.mxu1 %vm586_vm6, %v614_v57 }
 0x197   : > { %v2960_v1 = vpop.permute.xlu1 %810  ;;  %2326 = vmatprep.subr.msk.mxu1 %vm587_vm4, %v613_v48  ;;  %v737_v62 = vpop.permute.xlu0 %736 }
 0x198   : > { %v741_v2 = vsel %vm738_vm13, %v735_v26, %v737_v62  ;;  %2327 = vmatpush1.msk.msra.mxu1 %vm586_vm6, %v612_v44  ;;  %v742_v3 = vsel %vm738_vm13, %v737_v62, %v2877_v24  ;;  %v794_v26 = vld [vmem:[%s4329_s3 + $0x28] sm:$0xff] }
 0x199   : > { %2328 = vmatprep.subr.msk.mxu1 %vm629_vm7, %v742_v3 }
 0x19a   : > { %2329 = vmatpush2.msk.msra.mxu1 %vm628_vm9, %v741_v2 }
 0x19b   : > { %v440_v11 = vpop.permute.xlu1 %439  ;;  %2330 = vmatprep.subr.msk.mxu1 %vm629_vm7, %v740_v6  ;;  %v445_v12 = vpop.permute.xlu0 %444 }
 0x19c   : > { %v2984_v13 = vadd.f32 %v561_v19, %v440_v11  ;;  %2331 = vmatpush2.msk.msra.mxu1 %vm628_vm9, %v739_v10  ;;  %v3032_v21 = vadd.f32 %v2918_v41, %v440_v11  ;;  %v3055_v19 = vadd.f32 %v2927_v43, %v445_v12  ;;  %v3086_v17 = vadd.f32 %v2931_v47, %v445_v12 }
 0x19d   : > { %887 = vmatmul.mubr.f32.vlgmr.msra.gmra.mxu1 %v789_v8 }
 0x19e   : > { %1745 = vrot.lane.b32.xlu1 %v2984_v13, %s2518_s16  ;;  %1378 = vrot.lane.b32.xlu0 %v2984_v13, %s2522_s20 }
 0x19f   : > { %v455_v20 = vpop.permute.xlu0 %454  ;;  %2333 = vmatprep.mubr.msk.f32.mxu1 %vm4371_vm2, %v792_v14  ;;  %v450_v22 = vpop.permute.xlu1 %449 }
 0x1a0   : > { %v580_v23 = vadd.f32 %v579_v7, %v455_v20  ;;  %v582_v25 = vadd.f32 %v581_v16, %v455_v20  ;;  %v574_v27 = vadd.f32 %v573_v52, %v450_v22  ;;  %v576_v28 = vadd.f32 %v575_v61, %v450_v22 }
 0x1a1   : > { %893 = vmatmul.mubr.f32.gmra.mxu1 %v791_v18 }
 0x1a2   : > { %2229 = vst [vmem:[%s3001_s30 + $0x70] sm:$0xff] %v580_v23  ;;  %2230 = vst [vmem:[%s3001_s30 + $0x78] sm:$0xff] %v582_v25  ;;  %1399 = vrot.lane.b32.xlu1 %v2984_v13, %s2520_s23  ;;  %1320 = vrot.lane.b32.xlu0 %v2984_v13, %s2525_s25 }
 0x1a3   : > { %2227 = vst [vmem:[%s3001_s30 + $0x60] sm:$0xff] %v574_v27  ;;  %2228 = vst [vmem:[%s3001_s30 + $0x68] sm:$0xff] %v576_v28  ;;  %2334 = vmatprep.mubr.msk.f32.mxu1 %vm4371_vm2, %v794_v26  ;;  %v3096_v15 = vpop.permute.xlu0 %1376  ;;  %v3112_v38 = vpop.permute.xlu1 %1353 }
 0x1a5   : > { %899 = vmatmul.mubr.f32.gmra.mxu1 %v793_v29 }
 0x1a6   : > { %1355 = vrot.lane.b32.xlu1 %v2984_v13, %s2523_s22  ;;  %1680 = vrot.lane.b32.xlu0 %v2984_v13, %s2524_s24 }
 0x1a7   : > { %v3102_v37 = vpop.permute.xlu0 %1684  ;;  %v3120_v41 = vpop.permute.xlu1 %1318 }
 0x1aa   : > { %1777 = vrot.lane.b32.xlu1 %v2984_v13, %s2526_s26  ;;  %1728 = vrot.lane.b32.xlu0 %v2984_v13, %s2527_s29 }
 0x1ab   : > { %v3114_v40 = vpop.permute.xlu0 %1781  ;;  %v3132_v43 = vpop.permute.xlu1 %1726 }
 0x1ac   : > { %4403 = vst [vmem:[#allocation3_spill] sm:$0xff] %v3114_v40 }
 0x1ae   : > { %1657 = vrot.lane.b32.xlu1 %v2984_v13, %s2530_s12  ;;  %1297 = vrot.lane.b32.xlu0 %v2984_v13, %s4399_s18 }
 0x1af   : > { %v3122_v42 = vpop.permute.xlu0 %1295  ;;  %v3140_v47 = vpop.permute.xlu1 %1552 }
 0x1b2   : > { %1634 = vrot.lane.b32.xlu1 %v2984_v13, %s4400_s13  ;;  %1274 = vrot.lane.b32.xlu0 %v2984_v13, %s4401_s15 }
 0x1b3   : > { %v3134_v45 = vpop.permute.xlu0 %1661  ;;  %v3150_v50 = vpop.permute.xlu1 %1615 }
 0x1b4   : > { %4405 = vst [vmem:[#allocation4_spill] sm:$0xff] %v3134_v45  ;;  %4406 = vst [vmem:[#allocation5_spill] sm:$0xff] %v3150_v50 }
 0x1b6   : > { %1380 = vrot.lane.b32.xlu1 %v3032_v21, %s2522_s20  ;;  %1747 = vrot.lane.b32.xlu0 %v3032_v21, %s2518_s16 }
 0x1b7   : > { %v3142_v49 = vpop.permute.xlu0 %1272 }
 0x1ba   : > { %1322 = vrot.lane.b32.xlu1 %v3032_v21, %s2525_s25  ;;  %1401 = vrot.lane.b32.xlu0 %v3032_v21, %s2520_s23 }
 0x1bb   : > { %v3152_v51 = vpop.permute.xlu0 %1638 }
 0x1bc   : > { %4407 = vst [vmem:[#allocation6_spill] sm:$0xff] %v3152_v51 }
 0x1be   : > { %1682 = vrot.lane.b32.xlu1 %v3032_v21, %s2524_s24  ;;  %1357 = vrot.lane.b32.xlu0 %v3032_v21, %s2523_s22 }
 0x1c2   : > { %1730 = vrot.lane.b32.xlu1 %v3032_v21, %s2527_s29  ;;  %1550 = vrot.lane.b32.xlu0 %v3032_v21, %s4402_s28 }
 0x1c6   : > { %1779 = vrot.lane.b32.xlu1 %v3032_v21, %s2526_s26  ;;  %1359 = vrot.lane.b32.xlu0 %v3055_v19, %s2523_s22 }
 0x1ca   : > { %1299 = vrot.lane.b32.xlu1 %v3032_v21, %s4399_s18  ;;  %1686 = vrot.lane.b32.xlu0 %v3055_v19, %s2524_s24 }
 0x1ce   : > { %1659 = vrot.lane.b32.xlu1 %v3032_v21, %s2530_s12  ;;  %1732 = vrot.lane.b32.xlu0 %v3055_v19, %s2527_s29 }
 0x1d2   : > { %1276 = vrot.lane.b32.xlu1 %v3032_v21, %s4401_s15  ;;  %1783 = vrot.lane.b32.xlu0 %v3055_v19, %s2526_s26 }
 0x1d6   : > { %1636 = vrot.lane.b32.xlu1 %v3032_v21, %s4400_s13  ;;  %1663 = vrot.lane.b32.xlu0 %v3055_v19, %s2530_s12 }
 0x1da   : > { %1640 = vrot.lane.b32.xlu0 %v3055_v19, %s4400_s13  ;;  %1749 = vrot.lane.b32.xlu1 %v3055_v19, %s2518_s16 }
 0x1de   : > { %1554 = vrot.lane.b32.xlu0 %v3055_v19, %s4402_s28  ;;  %1403 = vrot.lane.b32.xlu1 %v3055_v19, %s2520_s23 }
 0x1e2   : > { %1751 = vrot.lane.b32.xlu0 %v3086_v17, %s2518_s16  ;;  %1382 = vrot.lane.b32.xlu1 %v3055_v19, %s2522_s20 }
 0x1e6   : > { %1405 = vrot.lane.b32.xlu0 %v3086_v17, %s2520_s23  ;;  %1324 = vrot.lane.b32.xlu1 %v3055_v19, %s2525_s25 }
 0x1ea   : > { %1384 = vrot.lane.b32.xlu0 %v3086_v17, %s2522_s20  ;;  %1301 = vrot.lane.b32.xlu1 %v3055_v19, %s4399_s18  ;;  %s4404_s20 = smov 110  }
 0x1ee   : > { %1326 = vrot.lane.b32.xlu0 %v3086_v17, %s2525_s25  ;;  %1278 = vrot.lane.b32.xlu1 %v3055_v19, %s4401_s15  ;;  %s4414_s25 = smov 112  }
 0x1f2   : > { %1303 = vrot.lane.b32.xlu0 %v3086_v17, %s4399_s18  ;;  %1361 = vrot.lane.b32.xlu1 %v3086_v17, %s2523_s22  ;;  %s2534_s22 = smov 126  }
 0x1f6   : > { %1280 = vrot.lane.b32.xlu0 %v3086_v17, %s4401_s15  ;;  %1688 = vrot.lane.b32.xlu1 %v3086_v17, %s2524_s24  ;;  %s4410_s24 = smov 111  }
 0x1fa   : > { %1556 = vrot.lane.b32.xlu0 %v3086_v17, %s4402_s28  ;;  %1734 = vrot.lane.b32.xlu1 %v3086_v17, %s2527_s29  ;;  %s4427_s29 = smov 15  }
 0x1fe   : > { %1619 = vrot.lane.b32.xlu0 %v3086_v17, %s4404_s20  ;;  %1785 = vrot.lane.b32.xlu1 %v3086_v17, %s2526_s26  ;;  %s4426_s26 = smov 113  }
 0x202   : > { %1617 = vrot.lane.b32.xlu0 %v3055_v19, %s4404_s20  ;;  %1665 = vrot.lane.b32.xlu1 %v3086_v17, %s2530_s12  ;;  %s4408_s12 = smov 127  }
 0x206   : > { %1533 = vrot.lane.b32.xlu0 %v3086_v17, %s2534_s22  ;;  %1642 = vrot.lane.b32.xlu1 %v3086_v17, %s4400_s13 }
 0x20a   : > { %1531 = vrot.lane.b32.xlu0 %v3055_v19, %s2534_s22  ;;  %1548 = vrot.lane.b32.xlu1 %v2984_v13, %s4402_s28 }
 0x20e   : > { %1527 = vrot.lane.b32.xlu0 %v3032_v21, %s2534_s22  ;;  %1529 = vrot.lane.b32.xlu1 %v4360_v0, %s2534_s22 }
 0x210   : > { %v1746_v39 = vpop.permute.xlu1 %1745  ;;  %v3156_v52 = vpop.permute.xlu0 %1378 }
 0x211   : > { %v1753_v40 = vsel %vm4371_vm2, %v2803_v35, %v1746_v39 }
 0x212   : > { %1525 = vrot.lane.b32.xlu0 %v2984_v13, %s2534_s22  ;;  %1613 = vrot.lane.b32.xlu1 %v3032_v21, %s4404_s20 }
 0x214   : > { %v3161_v53 = vpop.permute.xlu1 %1399  ;;  %v3163_v55 = vpop.permute.xlu0 %1320 }
 0x216   : > { %1511 = vrot.lane.b32.xlu0 %v3086_v17, %s4408_s12  ;;  %1611 = vrot.lane.b32.xlu1 %v2984_v13, %s4404_s20 }
 0x218   : > { %v3169_v58 = vpop.permute.xlu1 %1355  ;;  %v3171_v57 = vpop.permute.xlu0 %1680 }
 0x219   : > { %4409 = vst [vmem:[#allocation7_spill] sm:$0xff] %v3171_v57  ;;  %v3249_v57 = vadd.s32 4294967294, %v2825_v59 }
 0x21a   : > { %1509 = vrot.lane.b32.xlu0 %v3055_v19, %s4408_s12  ;;  %1597 = vrot.lane.b32.xlu1 %v3086_v17, %s4410_s24 }
 0x21b   : > { %4423 = vst [vmem:[#allocation19_spill] sm:$0xff] %v3249_v57  ;;  %vm4397_vm1 = vcmp.ge.s32.totalorder %v3249_v57, 0 }
 0x21c   : > { %v3177_v61 = vpop.permute.xlu1 %1777  ;;  %v3179_v48 = vpop.permute.xlu0 %1728 }
 0x21d   : > { %4411 = vst [vmem:[#allocation8_spill] sm:$0xff] %v3177_v61 }
 0x21e   : > { %1507 = vrot.lane.b32.xlu0 %v3032_v21, %s4408_s12  ;;  %1595 = vrot.lane.b32.xlu1 %v3055_v19, %s4410_s24 }
 0x220   : > { %v3185_v44 = vpop.permute.xlu1 %1657  ;;  %v3187_v62 = vpop.permute.xlu0 %1297 }
 0x221   : > { %4412 = vst [vmem:[#allocation9_spill] sm:$0xff] %v3185_v44 }
 0x222   : > { %1505 = vrot.lane.b32.xlu0 %v2984_v13, %s4408_s12  ;;  %1593 = vrot.lane.b32.xlu1 %v3032_v21, %s4410_s24 }
 0x224   : > { %v3193_v2 = vpop.permute.xlu1 %1634  ;;  %v3195_v3 = vpop.permute.xlu0 %1274 }
 0x225   : > { %4413 = vst [vmem:[#allocation10_spill] sm:$0xff] %v3193_v2 }
 0x226   : > { %1763 = vrot.lane.b32.xlu0 %v3032_v21, %s4414_s25  ;;  %1591 = vrot.lane.b32.xlu1 %v2984_v13, %s4410_s24 }
 0x228   : > { %v1381_v7 = vpop.permute.xlu1 %1380  ;;  %v1748_v6 = vpop.permute.xlu0 %1747 }
 0x22a   : > { %1767 = vrot.lane.b32.xlu1 %v3086_v17, %s4414_s25 }
 0x22c   : > { %v3203_v8 = vpop.permute.xlu1 %1322  ;;  %v1402_v10 = vpop.permute.xlu0 %1401 }
 0x22e   : > { %1765 = vrot.lane.b32.xlu1 %v3055_v19, %s4414_s25 }
 0x230   : > { %v3207_v11 = vpop.permute.xlu1 %1682  ;;  %v3209_v12 = vpop.permute.xlu0 %1357 }
 0x231   : > { %4415 = vst [vmem:[#allocation11_spill] sm:$0xff] %v3207_v11 }
 0x234   : > { %v3211_v14 = vpop.permute.xlu1 %1730  ;;  %v3213_v16 = vpop.permute.xlu0 %1550 }
 0x238   : > { %v3215_v18 = vpop.permute.xlu1 %1779  ;;  %v3217_v20 = vpop.permute.xlu0 %1359 }
 0x239   : > { %4416 = vst [vmem:[#allocation12_spill] sm:$0xff] %v3215_v18 }
 0x23c   : > { %v3219_v22 = vpop.permute.xlu1 %1299  ;;  %v3221_v23 = vpop.permute.xlu0 %1686 }
 0x240   : > { %v3223_v25 = vpop.permute.xlu1 %1659  ;;  %v3225_v26 = vpop.permute.xlu0 %1732 }
 0x241   : > { %4417 = vst [vmem:[#allocation13_spill] sm:$0xff] %v3223_v25 }
 0x244   : > { %v3227_v27 = vpop.permute.xlu1 %1276  ;;  %v3229_v28 = vpop.permute.xlu0 %1783 }
 0x245   : > { %4418 = vst [vmem:[#allocation14_spill] sm:$0xff] %v3229_v28  ;;  %v1754_v28 = vsel %vm4371_vm2, %v1746_v39, %v1748_v6  ;;  %v1408_v6 = vsel %vm611_vm12, %v3161_v53, %v1402_v10  ;;  %v1407_v39 = vsel %vm611_vm12, %v2805_v36, %v3161_v53  ;;  %v3282_v53 = vadd.s32 2, %v2819_v56 }
 0x247   : > { %4424 = vst [vmem:[#allocation20_spill] sm:$0xff] %v3282_v53  ;;  %vm4396_vm0 = vcmp.lt.s32.totalorder %v3282_v53, 16  ;;  %v1147_v53 = vld [vmem:[%s4332_s6 + $0x10] sm:$0xff] }
 0x248   : > { %v3231_v29 = vpop.permute.xlu1 %1636  ;;  %v3233_v0 = vpop.permute.xlu0 %1663 }
 0x249   : > { %4419 = vst [vmem:[#allocation15_spill] sm:$0xff] %v3231_v29  ;;  %4420 = vst [vmem:[#allocation16_spill] sm:$0xff] %v3233_v0  ;;  %v3244_v29 = vadd.s32 4294967294, %v2819_v56  ;;  %v1387_v56 = vsel %vm1386_vm15, %v3096_v15, %v3156_v52 }
 0x24b   : > { %4422 = vst [vmem:[#allocation18_spill] sm:$0xff] %v3244_v29  ;;  %vm1259_vm14 = vcmp.ge.s32.totalorder %v3244_v29, 0 }
 0x24c   : > { %v1750_v50 = vpop.permute.xlu1 %1749  ;;  %v3235_v2 = vpop.permute.xlu0 %1640 }
 0x24d   : > { %4421 = vst [vmem:[#allocation17_spill] sm:$0xff] %v3235_v2  ;;  %v1755_v18 = vsel %vm4371_vm2, %v2803_v35, %v1750_v50 }
 0x250   : > { %v1404_v51 = vpop.permute.xlu1 %1403  ;;  %v3237_v44 = vpop.permute.xlu0 %1554 }
 0x254   : > { %v1383_v45 = vpop.permute.xlu1 %1382  ;;  %v1752_v61 = vpop.permute.xlu0 %1751 }
 0x255   : > { %v1756_v25 = vsel %vm4371_vm2, %v1750_v50, %v1752_v61  ;;  %v1409_v50 = vsel %vm611_vm12, %v2805_v36, %v1404_v51  ;;  %vm1363_vm2 = vcmask 244736  }
 0x256   : > { %1835 = vmatprep.subr.mxu1 %v1756_v25 }
 0x257   : > { %1836 = vmatpush1.msra.mxu1 %v1755_v18  ;;  %v1389_v18 = vsel %vm1386_vm15, %v3096_v15, %v1383_v45 }
 0x258   : > { %v1325_v0 = vpop.permute.xlu1 %1324  ;;  %1837 = vmatprep.subr.mxu1 %v1754_v28  ;;  %v1406_v2 = vpop.permute.xlu0 %1405  ;;  %v1388_v28 = vsel %vm1386_vm15, %v3156_v52, %v1381_v7  ;;  %v1366_v52 = vsel %vm1363_vm2, %v3112_v38, %v3217_v20 }
 0x259   : > { %v1410_v61 = vsel %vm611_vm12, %v1404_v51, %v1406_v2  ;;  %1838 = vmatpush1.msra.mxu1 %v1753_v40 }
 0x25a   : > { %2374 = vmatprep.subr.msk.mxu1 %vm587_vm4, %v1410_v61 }
 0x25b   : > { %2375 = vmatpush1.msk.msra.mxu1 %vm586_vm6, %v1409_v50  ;;  %v3293_v50 = vadd.s32 2, %v2825_v59 }
 0x25c   : > { %v3264_v40 = vpop.permute.xlu1 %1301  ;;  %2376 = vmatprep.subr.msk.mxu1 %vm587_vm4, %v1408_v6  ;;  %v1385_v51 = vpop.permute.xlu0 %1384 }
 0x25d   : > { %v1390_v2 = vsel %vm1386_vm15, %v1383_v45, %v1385_v51  ;;  %v888_v10 = vpop.f32.mrf.mxu1  ;;  %2377 = vmatpush1.msk.msra.mxu1 %vm586_vm6, %v1407_v39  ;;  %4425 = vst [vmem:[#allocation21_spill] sm:$0xff] %v3293_v50  ;;  %vm4395_vm15 = vcmp.lt.s32.totalorder %v3293_v50, 16  ;;  %v1365_v51 = vsel %vm1363_vm2, %v3169_v58, %v3209_v12  ;;  %v1331_v12 = vsel %vm1328_vm11, %v3120_v41, %v1325_v0 }
 0x25e   : > { %v3275_v25 = vadd.f32 %v888_v10, %v2929_v46  ;;  %2378 = vmatprep.subr.msk.mxu1 %vm1259_vm14, %v1390_v2  ;;  %v1364_v2 = vsel %vm1363_vm2, %v3112_v38, %v3169_v58 }
 0x25f   : > { %2379 = vmatpush1.msk.msra.mxu1 %vm4397_vm1, %v1389_v18  ;;  %v890_v7 = vpop.f32.mrf.mxu1  ;;  %v1330_v18 = vsel %vm1328_vm11, %v3163_v55, %v3203_v8 }
 0x260   : > { %1091 = vrot.lane.b32.xlu0 %v3275_v25, %s2518_s16  ;;  %911 = vrot.lane.b32.xlu1 %v3275_v25, %s2520_s23  ;;  %v3290_v45 = vpop.permute.xlu1 %1278  ;;  %v1327_v61 = vpop.permute.xlu0 %1326  ;;  %v3314_v39 = vadd.f32 %v890_v7, %v2929_v46 }
 0x261   : > { %2380 = vmatprep.subr.msk.mxu1 %vm1259_vm14, %v1388_v28  ;;  %v1332_v10 = vsel %vm1328_vm11, %v1325_v0, %v1327_v61  ;;  %v1329_v28 = vsel %vm1328_vm11, %v3120_v41, %v3163_v55  ;;  %vm1305_vm11 = vcmask 269312  }
 0x262   : > { %2381 = vmatpush1.msk.msra.mxu1 %vm4397_vm1, %v1387_v56  ;;  %v1308_v7 = vsel %vm1305_vm11, %v3122_v42, %v3264_v40 }
 0x264   : > { %1031 = vrot.lane.b32.xlu0 %v3275_v25, %s4426_s26  ;;  %941 = vrot.lane.b32.xlu1 %v3275_v25, %s4427_s29  ;;  %v1362_v59 = vpop.permute.xlu1 %1361  ;;  %v1304_v6 = vpop.permute.xlu0 %1303 }
 0x265   : > { %v1367_v15 = vsel %vm1363_vm2, %v3217_v20, %v1362_v59  ;;  %vm1736_vm2 = vcmask 261120   ;;  %v1309_v56 = vsel %vm1305_vm11, %v3264_v40, %v1304_v6 }
 0x266   : > { %2382 = vmatprep.subr.msk.mxu1 %vm4396_vm0, %v1367_v15  ;;  %v1739_v8 = vsel %vm1736_vm2, %v3132_v43, %v3225_v26  ;;  %v1738_v55 = vsel %vm1736_vm2, %v3179_v48, %v3211_v14  ;;  %v1307_v14 = vsel %vm1305_vm11, %v3187_v62, %v3219_v22 }
 0x267   : > { %2383 = vmatpush1.msk.msra.mxu1 %vm4395_vm15, %v1366_v52 }
 0x268   : > { %913 = vrot.lane.b32.xlu0 %v3314_v39, %s2520_s23  ;;  %1001 = vrot.lane.b32.xlu1 %v3275_v25, %s4408_s12  ;;  %v3327_v20 = vpop.permute.xlu1 %1688  ;;  %v1281_v46 = vpop.permute.xlu0 %1280 }
 0x269   : > { %2384 = vmatprep.subr.msk.mxu1 %vm4396_vm0, %v1365_v51 }
 0x26a   : > { %2385 = vmatpush1.msk.msra.mxu1 %vm4395_vm15, %v1364_v2 }
 0x26b   : > { %2386 = vmatprep.subr.msk.mxu1 %vm629_vm7, %v1332_v10 }
 0x26c   : > { %2387 = vmatpush1.msk.msra.mxu1 %vm628_vm9, %v1331_v12  ;;  %943 = vrot.lane.b32.xlu0 %v3314_v39, %s4427_s29  ;;  %v1735_v38 = vpop.permute.xlu1 %1734  ;;  %v1557_v58 = vpop.permute.xlu0 %1556 }
 0x26d   : > { %971 = vrot.lane.b32.xlu1 %v3275_v25, %s4428_s14  ;;  %2388 = vmatprep.subr.msk.mxu1 %vm629_vm7, %v1330_v18  ;;  %v1740_v0 = vsel %vm1736_vm2, %v3225_v26, %v1735_v38  ;;  %v1737_v26 = vsel %vm1736_vm2, %v3132_v43, %v3179_v48  ;;  %v1306_v48 = vsel %vm1305_vm11, %v3122_v42, %v3187_v62  ;;  %vm1282_vm2 = vcmask 277504  }
 0x26e   : > { %2389 = vmatpush1.msk.msra.mxu1 %vm628_vm9, %v1329_v28  ;;  %v1286_v22 = vsel %vm1282_vm2, %v3290_v45, %v1281_v46  ;;  %v1285_v40 = vsel %vm1282_vm2, %v3142_v49, %v3290_v45  ;;  %v1284_v42 = vsel %vm1282_vm2, %v3195_v3, %v3227_v27  ;;  %v1283_v15 = vsel %vm1282_vm2, %v3142_v49, %v3195_v3  ;;  %v894_v45 = vpop.f32.mrf.mxu1 }
 0x26f   : > { %1855 = vmatprep.subr.mxu1 %v1740_v0  ;;  %vm1558_vm11 = vcmask 932864   ;;  %vm1535_vm2 = vcmask 1031168  }
 0x270   : > { %1856 = vmatpush1.msra.mxu1 %v1739_v8  ;;  %1003 = vrot.lane.b32.xlu0 %v3314_v39, %s4408_s12  ;;  %v3360_v41 = vpop.permute.xlu1 %1785  ;;  %v3365_v61 = vpop.permute.xlu0 %1619  ;;  %v1562_v27 = vsel %vm1558_vm11, %v1557_v58, %v3140_v47  ;;  %v1561_v52 = vsel %vm1558_vm11, %v3237_v44, %v1557_v58  ;;  %v1560_v3 = vsel %vm1558_vm11, %v3213_v16, %v3140_v47 }
 0x271   : > { %4429 = vst [vmem:[#allocation22_spill] sm:$0xff] %v3360_v41  ;;  %4430 = vst [vmem:[#allocation23_spill] sm:$0xff] %v3365_v61  ;;  %1061 = vrot.lane.b32.xlu1 %v3275_v25, %s4410_s24  ;;  %1857 = vmatprep.subr.mxu1 %v1738_v55  ;;  %v3432_v44 = vadd.f32 %v894_v45, %v2941_v54  ;;  %v896_v58 = vpop.f32.mrf.mxu1  ;;  %v3522_v45 = vld [vmem:[%s2621_s27] sm:$0xff]  ;;  %s2535_s27 = smov 94   ;;  %v2100_v61 = vld [vmem:[%s4336_s10 + $0x8] sm:$0xff] }
 0x272   : > { %1858 = vmatpush1.msra.mxu1 %v1737_v26  ;;  %v3459_v8 = vadd.f32 %v896_v58, %v2941_v54  ;;  %4437 = vst [vmem:[#allocation30_spill] sm:$0xff] %v3522_v45  ;;  %v1140_v58 = vld [vmem:[%s4331_s5 + $0x8] sm:$0xff] }
 0x273   : > { %2390 = vmatprep.subr.msk.mxu1 %vm587_vm4, %v1309_v56 }
 0x274   : > { %2391 = vmatpush1.msk.msra.mxu1 %vm586_vm6, %v1308_v7  ;;  %973 = vrot.lane.b32.xlu0 %v3314_v39, %s4428_s14  ;;  %v3383_v59 = vpop.permute.xlu1 %1665  ;;  %v3385_v43 = vpop.permute.xlu0 %1617 }
 0x275   : > { %4431 = vst [vmem:[#allocation24_spill] sm:$0xff] %v3383_v59  ;;  %4432 = vst [vmem:[#allocation25_spill] sm:$0xff] %v3385_v43  ;;  %1115 = vrot.lane.b32.xlu1 %v3275_v25, %s4414_s25  ;;  %2392 = vmatprep.subr.msk.mxu1 %vm587_vm4, %v1307_v14 }
 0x276   : > { %2393 = vmatpush1.msk.msra.mxu1 %vm586_vm6, %v1306_v48  ;;  %v900_v48 = vpop.f32.mrf.mxu1 }
 0x277   : > { %2394 = vmatprep.subr.msk.mxu1 %vm1259_vm14, %v1286_v22  ;;  %v3498_v22 = vadd.f32 %v900_v48, %v2960_v1 }
 0x278   : > { %2395 = vmatpush1.msk.msra.mxu1 %vm4397_vm1, %v1285_v40  ;;  %v3404_v62 = vpop.permute.xlu1 %1642  ;;  %1063 = vrot.lane.b32.xlu0 %v3314_v39, %s4410_s24  ;;  %v1534_v6 = vpop.permute.xlu0 %1533 }
 0x279   : > { %4433 = vst [vmem:[#allocation26_spill] sm:$0xff] %v3404_v62  ;;  %1093 = vrot.lane.b32.xlu1 %v3314_v39, %s2518_s16  ;;  %2396 = vmatprep.subr.msk.mxu1 %vm1259_vm14, %v1284_v42  ;;  %v902_v40 = vpop.f32.mrf.mxu1 }
 0x27a   : > { %2397 = vmatpush1.msk.msra.mxu1 %vm4397_vm1, %v1283_v15 }
 0x27b   : > { %2398 = vmatprep.subr.msk.mxu1 %vm1259_vm14, %v1562_v27 }
 0x27c   : > { %2399 = vmatpush2.msk.msra.mxu1 %vm4397_vm1, %v1561_v52  ;;  %v1549_v49 = vpop.permute.xlu1 %1548  ;;  %1117 = vrot.lane.b32.xlu0 %v3314_v39, %s4414_s25  ;;  %v1532_v51 = vpop.permute.xlu0 %1531 }
 0x27d   : > { %1033 = vrot.lane.b32.xlu1 %v3314_v39, %s4426_s26  ;;  %v1559_v46 = vsel %vm1558_vm11, %v1549_v49, %v3213_v16  ;;  %2400 = vmatprep.subr.msk.mxu1 %vm1259_vm14, %v1560_v3  ;;  %v1538_v16 = vsel %vm1535_vm2, %v1532_v51, %v1534_v6  ;;  %vm1163_vm11 = vcmask 719872  }
 0x27e   : > { %2401 = vmatpush2.msk.msra.mxu1 %vm4397_vm1, %v1559_v46  ;;  %2371 = vmatprep.mubr.msk.f32.mxu0 %vm1163_vm11, %v1140_v58 }
 0x280   : > { %v1530_v2 = vpop.permute.xlu1 %1529  ;;  %975 = vrot.lane.b32.xlu0 %v3432_v44, %s4428_s14  ;;  %v1528_v47 = vpop.permute.xlu0 %1527 }
 0x281   : > { %915 = vrot.lane.b32.xlu1 %v3432_v44, %s2520_s23  ;;  %v1539_v10 = vsel %vm1535_vm2, %v1534_v6, %v1530_v2  ;;  %v1537_v12 = vsel %vm1535_vm2, %v1528_v47, %v1530_v2  ;;  %v903_v6 = vadd.f32 %v902_v40, %v2960_v1 }
 0x282   : > { %2402 = vmatprep.subr.msk.mxu1 %vm4396_vm0, %v1539_v10  ;;  %v4444_v10 = vmov 0.0  }
 0x283   : > { %2403 = vmatpush2.msk.msra.mxu1 %vm4395_vm15, %v1538_v16 }
 0x284   : > { %1095 = vrot.lane.b32.xlu0 %v3432_v44, %s2518_s16  ;;  %2404 = vmatprep.subr.msk.mxu1 %vm4396_vm0, %v1537_v12  ;;  %v1526_v18 = vpop.permute.xlu0 %1525  ;;  %v3504_v42 = vpop.permute.xlu1 %1613 }
 0x285   : > { %945 = vrot.lane.b32.xlu1 %v3432_v44, %s4427_s29  ;;  %v1536_v38 = vsel %vm1535_vm2, %v1526_v18, %v1528_v47  ;;  %4434 = vst [vmem:[#allocation27_spill] sm:$0xff] %v3504_v42  ;;  %vm4446_vm2 = vcmask 121856  }
 0x286   : > { %2405 = vmatpush2.msk.msra.mxu1 %vm4395_vm15, %v1536_v38  ;;  %vm4447_vm15 = vmmov %vm4446_vm2 }
 0x287   : > { %vm4448_vm0 = vmmov %vm4446_vm2 }
 0x288   : > { %1035 = vrot.lane.b32.xlu0 %v3432_v44, %s4426_s26  ;;  %v1512_v28 = vpop.permute.xlu0 %1511  ;;  %v3514_v15 = vpop.permute.xlu1 %1611 }
 0x289   : > { %1005 = vrot.lane.b32.xlu1 %v3432_v44, %s4408_s12  ;;  %v1516_v0 = vsel %vm692_vm8, %v1512_v28, %v2789_v32  ;;  %4435 = vst [vmem:[#allocation28_spill] sm:$0xff] %v3514_v15 }
 0x28a   : > { %2406 = vmatprep.subr.msk.mxu1 %vm629_vm7, %v1516_v0 }
 0x28c   : > { %917 = vrot.lane.b32.xlu0 %v3459_v8, %s2520_s23  ;;  %v1510_v55 = vpop.permute.xlu0 %1509  ;;  %v3519_v27 = vpop.permute.xlu1 %1597 }
 0x28d   : > { %1065 = vrot.lane.b32.xlu1 %v3432_v44, %s4410_s24  ;;  %v1515_v26 = vsel %vm692_vm8, %v1510_v55, %v1512_v28  ;;  %4436 = vst [vmem:[#allocation29_spill] sm:$0xff] %v3519_v27 }
 0x28e   : > { %2407 = vmatpush2.msk.msra.mxu1 %vm628_vm9, %v1515_v26 }
 0x290   : > { %947 = vrot.lane.b32.xlu0 %v3459_v8, %s4427_s29  ;;  %v1508_v54 = vpop.permute.xlu0 %1507  ;;  %v3532_v1 = vpop.permute.xlu1 %1595 }
 0x291   : > { %1119 = vrot.lane.b32.xlu1 %v3432_v44, %s4414_s25  ;;  %v1514_v56 = vsel %vm692_vm8, %v1508_v54, %v2789_v32  ;;  %4438 = vst [vmem:[#allocation31_spill] sm:$0xff] %v3532_v1 }
 0x292   : > { %2408 = vmatprep.subr.msk.mxu1 %vm629_vm7, %v1514_v56 }
 0x294   : > { %1067 = vrot.lane.b32.xlu0 %v3459_v8, %s4410_s24  ;;  %v1506_v7 = vpop.permute.xlu0 %1505  ;;  %v3537_v52 = vpop.permute.xlu1 %1593 }
 0x295   : > { %977 = vrot.lane.b32.xlu1 %v3459_v8, %s4428_s14  ;;  %v1513_v14 = vsel %vm692_vm8, %v1506_v7, %v1508_v54  ;;  %4439 = vst [vmem:[#allocation32_spill] sm:$0xff] %v3537_v52 }
 0x296   : > { %2409 = vmatpush2.msk.msra.mxu1 %vm628_vm9, %v1513_v14 }
 0x297   : > { %1879 = vmatprep.subr.mxu1 %v3086_v17 }
 0x298   : > { %1121 = vrot.lane.b32.xlu0 %v3459_v8, %s4414_s25  ;;  %1880 = vmatpush2.msra.mxu1 %v3055_v19  ;;  %v3547_v49 = vpop.permute.xlu1 %1591  ;;  %v3562_v51 = vpop.permute.xlu0 %1763 }
 0x299   : > { %1097 = vrot.lane.b32.xlu1 %v3459_v8, %s2518_s16  ;;  %1881 = vmatprep.subr.mxu1 %v3032_v21  ;;  %4440 = vst [vmem:[#allocation33_spill] sm:$0xff] %v3547_v49  ;;  %4442 = vst [vmem:[#allocation35_spill] sm:$0xff] %v3562_v51 }
 0x29a   : > { %1882 = vmatpush2.msra.mxu1 %v2984_v13 }
 0x29c   : > { %1007 = vrot.lane.b32.xlu0 %v3459_v8, %s4408_s12  ;;  %v3552_v3 = vpop.permute.xlu1 %1767 }
 0x29d   : > { %1037 = vrot.lane.b32.xlu1 %v3459_v8, %s4426_s26  ;;  %4441 = vst [vmem:[#allocation34_spill] sm:$0xff] %v3552_v3 }
 0x2a0   : > { %979 = vrot.lane.b32.xlu0 %v3498_v22, %s4428_s14  ;;  %v3564_v46 = vpop.permute.xlu1 %1765 }
 0x2a1   : > { %919 = vrot.lane.b32.xlu1 %v3498_v22, %s2520_s23  ;;  %4443 = vst [vmem:[#allocation36_spill] sm:$0xff] %v3564_v46 }
 0x2a4   : > { %1099 = vrot.lane.b32.xlu0 %v3498_v22, %s2518_s16 }
 0x2a5   : > { %949 = vrot.lane.b32.xlu1 %v3498_v22, %s4427_s29 }
 0x2a8   : > { %921 = vrot.lane.b32.xlu0 %v903_v6, %s2520_s23 }
 0x2a9   : > { %1069 = vrot.lane.b32.xlu1 %v3498_v22, %s4410_s24 }
 0x2ac   : > { %951 = vrot.lane.b32.xlu0 %v903_v6, %s4427_s29 }
 0x2ad   : > { %1123 = vrot.lane.b32.xlu1 %v3498_v22, %s4414_s25 }
 0x2b0   : > { %2002 = vrot.lane.b32.xlu0 %v3522_v45, %s2520_s23 }
 0x2b1   : > { %1039 = vrot.lane.b32.xlu1 %v3498_v22, %s4426_s26 }
 0x2b4   : > { %1577 = vrot.lane.b32.xlu0 %v3086_v17, %s4426_s26 }
 0x2b5   : > { %1009 = vrot.lane.b32.xlu1 %v3498_v22, %s4408_s12 }
 0x2b8   : > { %2064 = vrot.lane.b32.xlu0 %v2626_v5, %s2518_s16 }
 0x2b9   : > { %981 = vrot.lane.b32.xlu1 %v903_v6, %s4428_s14 }
 0x2bc   : > { %2012 = vrot.lane.b32.xlu0 %v3522_v45, %s4427_s29 }
 0x2bd   : > { %1761 = vrot.lane.b32.xlu1 %v2984_v13, %s4414_s25 }
 0x2c0   : > { %1489 = vrot.lane.b32.xlu0 %v3055_v19, %s4428_s14 }
 0x2c1   : > { %2004 = vrot.lane.b32.xlu1 %v2626_v5, %s2520_s23 }
 0x2c4   : > { %1573 = vrot.lane.b32.xlu0 %v3032_v21, %s4426_s26 }
 0x2c5   : > { %1101 = vrot.lane.b32.xlu1 %v903_v6, %s2518_s16 }
 0x2c8   : > { %2022 = vrot.lane.b32.xlu0 %v3522_v45, %s4428_s14 }
 0x2c9   : > { %2062 = vrot.lane.b32.xlu1 %v3522_v45, %s2518_s16 }
 0x2cc   : > { %1485 = vrot.lane.b32.xlu0 %v2984_v13, %s4428_s14 }
 0x2cd   : > { %1575 = vrot.lane.b32.xlu1 %v3055_v19, %s4426_s26 }
 0x2d0   : > { %1071 = vrot.lane.b32.xlu0 %v903_v6, %s4410_s24 }
 0x2d1   : > { %2014 = vrot.lane.b32.xlu1 %v2626_v5, %s4427_s29 }
 0x2d2   : > { %v3569_v2 = vpop.permute.xlu1 %911  ;;  %v3571_v47 = vpop.permute.xlu0 %1091 }
 0x2d4   : > { %1707 = vrot.lane.b32.xlu0 %v4444_v10, %s2535_s27 }
 0x2d5   : > { %1491 = vrot.lane.b32.xlu1 %v3086_v17, %s4428_s14 }
 0x2d6   : > { %v3577_v16 = vpop.permute.xlu1 %941  ;;  %v1032_v12 = vpop.permute.xlu0 %1031 }
 0x2d8   : > { %1125 = vrot.lane.b32.xlu0 %v903_v6, %s4414_s25 }
 0x2d9   : > { %1571 = vrot.lane.b32.xlu1 %v2984_v13, %s4426_s26 }
 0x2da   : > { %v1002_v18 = vpop.permute.xlu1 %1001  ;;  %v3582_v38 = vpop.permute.xlu0 %913 }
 0x2dc   : > { %1041 = vrot.lane.b32.xlu0 %v903_v6, %s4426_s26 }
 0x2dd   : > { %2024 = vrot.lane.b32.xlu1 %v2626_v5, %s4428_s14 }
 0x2de   : > { %v3591_v28 = vpop.permute.xlu0 %943 }
 0x2df   : > { %v3593_v0 = vpop.permute.xlu1 %971 }
 0x2e0   : > { %1709 = vrot.lane.b32.xlu0 %v3055_v19, %s2535_s27 }
 0x2e1   : > { %1487 = vrot.lane.b32.xlu1 %v3032_v21, %s4428_s14 }
 0x2e2   : > { %v1004_v55 = vpop.permute.xlu0 %1003 }
 0x2e3   : > { %v1062_v26 = vpop.permute.xlu1 %1061  ;;  %v1014_v54 = vsel %vm692_vm8, %v1004_v55, %v2789_v32  ;;  %v1013_v56 = vsel %vm692_vm8, %v1002_v18, %v1004_v55 }
 0x2e4   : > { %1011 = vrot.lane.b32.xlu0 %v903_v6, %s4408_s12  ;;  %2335 = vmatprep.subr.msk.mxu0 %vm629_vm7, %v1014_v54 }
 0x2e5   : > { %1711 = vrot.lane.b32.xlu1 %v3086_v17, %s2535_s27  ;;  %2336 = vmatpush1.msk.msra.mxu0 %vm628_vm9, %v1013_v56 }
 0x2e6   : > { %1175 = vmatprep.subr.mxu0 %v903_v6  ;;  %v974_v7 = vpop.permute.xlu0 %973 }
 0x2e7   : > { %v1116_v14 = vpop.permute.xlu1 %1115  ;;  %v3611_v48 = vsel %vm669_vm10, %v3593_v0, %v974_v7  ;;  %1176 = vmatpush1.msra.mxu0 %v3498_v22 }
 0x2e8   : > { %1470 = vrot.lane.b32.xlu0 %v3086_v17, %s2536_s21  ;;  %1177 = vmatprep.subr.mxu0 %v3459_v8 }
 0x2e9   : > { %1468 = vrot.lane.b32.xlu1 %v3055_v19, %s2536_s21  ;;  %1178 = vmatpush1.msra.mxu0 %v3432_v44 }
 0x2ea   : > { %1179 = vmatprep.subr.mxu0 %v3314_v39  ;;  %v3619_v40 = vpop.permute.xlu0 %1063 }
 0x2eb   : > { %v3621_v6 = vpop.permute.xlu1 %1093  ;;  %v3625_v18 = vsel %vm738_vm13, %v1062_v26, %v3619_v40  ;;  %1180 = vmatpush1.msra.mxu0 %v3275_v25 }
 0x2ec   : > { %1462 = vrot.lane.b32.xlu0 %v4444_v10, %s2536_s21 }
 0x2ed   : > { %1705 = vrot.lane.b32.xlu1 %v3032_v21, %s2535_s27 }
 0x2ee   : > { %v3631_v8 = vpop.permute.xlu0 %1117 }
 0x2ef   : > { %v3633_v44 = vpop.permute.xlu1 %1033  ;;  %v3637_v39 = vsel %vm780_vm3, %v1116_v14, %v3631_v8 }
 0x2f0   : > { %v3641_v22 = vsel %vm715_vm5, %v1032_v12, %v3633_v44  ;;  %2034 = vrot.lane.b32.xlu0 %v2626_v5, %s4408_s12 }
 0x2f1   : > { %1703 = vrot.lane.b32.xlu1 %v2984_v13, %s2535_s27 }
 0x2f2   : > { %v3647_v25 = vpop.permute.xlu0 %975 }
 0x2f3   : > { %v3649_v58 = vpop.permute.xlu1 %915 }
 0x2f4   : > { %1466 = vrot.lane.b32.xlu0 %v3032_v21, %s2536_s21 }
 0x2f5   : > { %1464 = vrot.lane.b32.xlu1 %v2984_v13, %s2536_s21 }
 0x2f6   : > { %v3653_v55 = vpop.permute.xlu0 %1095 }
 0x2f7   : > { %v3655_v26 = vpop.permute.xlu1 %945 }
 0x2f8   : > { %2044 = vrot.lane.b32.xlu0 %v2626_v5, %s4426_s26 }
 0x2f9   : > { %2032 = vrot.lane.b32.xlu1 %v3522_v45, %s4408_s12 }
 0x2fa   : > { %v1036_v12 = vpop.permute.xlu0 %1035 }
 0x2fb   : > { %v1006_v54 = vpop.permute.xlu1 %1005 }
 0x2fc   : > { %1447 = vrot.lane.b32.xlu0 %v3086_v17, %s2537_s19 }
 0x2fd   : > { %1445 = vrot.lane.b32.xlu1 %v3055_v19, %s2537_s19 }
 0x2fe   : > { %v918_v56 = vpop.permute.xlu0 %917 }
 0x2ff   : > { %v1066_v7 = vpop.permute.xlu1 %1065  ;;  %v3665_v14 = vsel %vm611_vm12, %v3649_v58, %v918_v56  ;;  %v1797_v56 = vld [vmem:[%s4333_s7 + $0x8] sm:$0xff] }
 0x300   : > { %1439 = vrot.lane.b32.xlu0 %v4444_v10, %s2537_s19  ;;  %1899 = vmatprep.mubr.f32.mxu1 %v1797_v56 }
 0x301   : > { %2042 = vrot.lane.b32.xlu1 %v3522_v45, %s4426_s26 }
 0x302   : > { %v3670_v51 = vpop.permute.xlu0 %947 }
 0x303   : > { %v1120_v46 = vpop.permute.xlu1 %1119 }
 0x304   : > { %1443 = vrot.lane.b32.xlu0 %v3032_v21, %s2537_s19 }
 0x305   : > { %1441 = vrot.lane.b32.xlu1 %v2984_v13, %s2537_s19 }
 0x306   : > { %v3674_v3 = vpop.permute.xlu0 %1067 }
 0x307   : > { %v978_v49 = vpop.permute.xlu1 %977  ;;  %v3678_v52 = vsel %vm738_vm13, %v1066_v7, %v3674_v3 }
 0x308   : > { %2054 = vrot.lane.b32.xlu0 %v2626_v5, %s4410_s24 }
 0x309   : > { %2084 = vrot.lane.b32.xlu1 %v2626_v5, %s4414_s25 }
 0x30a   : > { %v3687_v10 = vpop.permute.xlu0 %1121 }
 0x30b   : > { %v3689_v1 = vpop.permute.xlu1 %1097  ;;  %v3693_v27 = vsel %vm780_vm3, %v1120_v46, %v3687_v10 }
 0x30c   : > { %1423 = vrot.lane.b32.xlu0 %v3055_v19, %s4427_s29 }
 0x30d   : > { %2082 = vrot.lane.b32.xlu1 %v3522_v45, %s4414_s25 }
 0x30e   : > { %v3699_v7 = vpop.permute.xlu0 %1007 }
 0x30f   : > { %v3701_v5 = vpop.permute.xlu1 %1037  ;;  %v3705_v15 = vsel %vm692_vm8, %v1006_v54, %v3699_v7 }
 0x310   : > { %v3709_v56 = vsel %vm715_vm5, %v1036_v12, %v3701_v5  ;;  %2052 = vrot.lane.b32.xlu0 %v3522_v45, %s4410_s24  ;;  %v1809_v12 = vld [vmem:[%s4334_s8 + $0x8] sm:$0xff]  ;;  %v1808_v45 = vld [vmem:[%s4334_s8] sm:$0xff] }
 0x311   : > { %1425 = vrot.lane.b32.xlu1 %v3086_v17, %s4427_s29 }
 0x312   : > { %v980_v19 = vpop.permute.xlu0 %979 }
 0x313   : > { %v3715_v46 = vpop.permute.xlu1 %919  ;;  %v987_v29 = vsel %vm669_vm10, %v2797_v33, %v980_v19 }
 0x314   : > { %1421 = vrot.lane.b32.xlu0 %v3032_v21, %s4427_s29  ;;  %v1145_v21 = vld [vmem:[%s4332_s6] sm:$0xff] }
 0x315   : > { %1419 = vrot.lane.b32.xlu1 %v2984_v13, %s4427_s29  ;;  %v1810_v13 = vld [vmem:[%s4334_s8 + $0x10] sm:$0xff] }
 0x316   : > { %v3724_v54 = vpop.permute.xlu0 %1099 }
 0x317   : > { %v950_v17 = vpop.permute.xlu1 %949 }
 0x318   : > { %1818 = vperm.xlu0 %2500, %v1809_v12  }
 0x319   : > { %1813 = vperm.xlu1 %2501, %v1808_v45   ;;  %v1146_v45 = vld [vmem:[%s4332_s6 + $0x8] sm:$0xff] }
 0x31a   : > { %v3732_v42 = vpop.permute.xlu0 %921 }
 0x31b   : > { %v3737_v50 = vpop.permute.xlu1 %1069 }
 0x31c   : > { %1150 = vperm.xlu0 %2500, %v1145_v21   ;;  %v2099_v21 = vld [vmem:[%s4336_s10] sm:$0xff] }
 0x31d   : > { %1823 = vperm.xlu1 %2501, %v1810_v13  }
 0x31e   : > { %v952_v12 = vpop.permute.xlu0 %951 }
 0x31f   : > { %v3745_v43 = vpop.permute.xlu1 %1123 }
 0x320   : > { %1160 = vperm.xlu0 %2500, %v1147_v53   ;;  %v2101_v53 = vld [vmem:[%s4336_s10 + $0x10] sm:$0xff] }
 0x321   : > { %1155 = vperm.xlu1 %2501, %v1146_v45  }
 0x322   : > { %v2003_v62 = vpop.permute.xlu0 %2002 }
 0x323   : > { %v3753_v13 = vpop.permute.xlu1 %1039 }
 0x324   : > { %2109 = vperm.xlu0 %2500, %v2100_v61   ;;  %v986_v61 = vsel %vm669_vm10, %v3647_v25, %v978_v49  ;;  %v957_v49 = vsel %vm4447_vm15, %v2799_v34, %v950_v17  ;;  %vm4450_vm15 = vmmov %vm4448_vm0 }
 0x325   : > { %2104 = vperm.xlu1 %2501, %v2099_v21  }
 0x326   : > { %v3755_v59 = vpop.permute.xlu0 %1577 }
 0x327   : > { %4445 = vst [vmem:[#allocation37_spill] sm:$0xff] %v3755_v59  ;;  %v3760_v45 = vpop.permute.xlu1 %1009 }
 0x329   : > { %2114 = vperm.xlu1 %2501, %v2101_v53   ;;  %v985_v53 = vsel %vm669_vm10, %v2797_v33, %v3647_v25 }
 0x32a   : > { %v2065_v41 = vpop.permute.xlu0 %2064 }
 0x32b   : > { %v982_v57 = vpop.permute.xlu1 %981 }
 0x32c   : > { %v988_v11 = vsel %vm669_vm10, %v980_v19, %v982_v57  ;;  %v983_v57 = vsel %vm669_vm10, %v2797_v33, %v3593_v0  ;;  %v956_v0 = vsel %vm4448_vm0, %v3655_v26, %v3670_v51  ;;  %v954_v19 = vsel %vm4450_vm15, %v3577_v16, %v3591_v28 }
 0x32d   : > { %2337 = vmatprep.subr.msk.mxu0 %vm587_vm4, %v988_v11  ;;  %v958_v11 = vsel %vm4446_vm2, %v950_v17, %v952_v12  ;;  %vm4449_vm2 = vmmov %vm4448_vm0  ;;  %v2006_v28 = vsel %vm611_vm12, %v2805_v36, %v2003_v62 }
 0x32e   : > { %2338 = vmatpush1.msk.msra.mxu0 %vm586_vm6, %v987_v29  ;;  %v3771_v21 = vpop.permute.xlu0 %2012 }
 0x32f   : > { %v3776_v59 = vpop.permute.xlu1 %1761  ;;  %2339 = vmatprep.subr.msk.mxu0 %vm587_vm4, %v986_v61 }
 0x330   : > { %2340 = vmatpush1.msk.msra.mxu0 %vm586_vm6, %v985_v53 }
 0x331   : > { %2341 = vmatprep.subr.msk.mxu0 %vm587_vm4, %v3611_v48  ;;  %v955_v48 = vsel %vm4449_vm2, %v2799_v34, %v3655_v26  ;;  %v953_v26 = vsel %vm4448_vm0, %v2799_v34, %v3577_v16  ;;  %vm4451_vm2 = vcmask 130048  }
 0x332   : > { %2342 = vmatpush1.msk.msra.mxu0 %vm586_vm6, %v983_v57  ;;  %v3791_v29 = vpop.permute.xlu0 %1489  ;;  %vm4452_vm15 = vmmov %vm4451_vm2 }
 0x333   : > { %v2005_v25 = vpop.permute.xlu1 %2004  ;;  %2343 = vmatprep.subr.msk.mxu0 %vm629_vm7, %v958_v11  ;;  %v1107_v53 = vsel %vm4452_vm15, %v2803_v35, %v3724_v54  ;;  %vm4453_vm0 = vmmov %vm4451_vm2 }
 0x334   : > { %2344 = vmatpush1.msk.msra.mxu0 %vm628_vm9, %v957_v49  ;;  %v2007_v61 = vsel %vm611_vm12, %v2003_v62, %v2005_v25  ;;  %v1106_v16 = vsel %vm4453_vm0, %v3653_v55, %v3689_v1  ;;  %vm4455_vm1 = vmmov %vm4453_vm0  ;;  %v2010_v25 = vsel %vm586_vm6, %v2006_v28, 0.0 }
 0x335   : > { %2345 = vmatprep.subr.msk.mxu0 %vm629_vm7, %v956_v0  ;;  %v1105_v62 = vsel %vm4455_vm1, %v2803_v35, %v3653_v55  ;;  %vm4456_vm15 = vmmov %vm4453_vm0  ;;  %v2011_v1 = vsel %vm587_vm4, %v2007_v61, 0.0 }
 0x336   : > { %2346 = vmatpush1.msk.msra.mxu0 %vm628_vm9, %v955_v48  ;;  %v3812_v17 = vpop.permute.xlu0 %1573  ;;  %vm4458_vm1 = vmmov %vm4453_vm0 }
 0x337   : > { %v1102_v51 = vpop.permute.xlu1 %1101  ;;  %2347 = vmatprep.subr.msk.mxu0 %vm629_vm7, %v954_v19  ;;  %v1103_v55 = vsel %vm4458_vm1, %v2803_v35, %v3571_v47 }
 0x338   : > { %2348 = vmatpush1.msk.msra.mxu0 %vm628_vm9, %v953_v26  ;;  %v1108_v12 = vsel %vm4451_vm2, %v3724_v54, %v1102_v51  ;;  %vm4454_vm2 = vcmask 121856   ;;  %v1104_v54 = vsel %vm4456_vm15, %v3571_v47, %v3621_v6  ;;  %v928_v6 = vsel %vm611_vm12, %v3715_v46, %v3732_v42 }
 0x339   : > { %1193 = vmatprep.subr.mxu0 %v1108_v12  ;;  %v2016_v11 = vsel %vm4454_vm2, %v2799_v34, %v3771_v21  ;;  %vm4457_vm2 = vmmov %vm4453_vm0  ;;  %v924_v42 = vsel %vm611_vm12, %v3569_v2, %v3582_v38  ;;  %vm4459_vm15 = vcmask 121856  }
 0x33a   : > { %1194 = vmatpush1.msra.mxu0 %v1107_v53  ;;  %v3832_v57 = vpop.permute.xlu0 %2022  ;;  %v2020_v26 = vsel %vm628_vm9, %v2016_v11, 0.0 }
 0x33b   : > { %v2063_v49 = vpop.permute.xlu1 %2062  ;;  %1195 = vmatprep.subr.mxu0 %v1106_v16 }
 0x33c   : > { %v2066_v0 = vsel %vm4453_vm0, %v2803_v35, %v2063_v49  ;;  %v2067_v48 = vsel %vm4457_vm2, %v2063_v49, %v2065_v41  ;;  %1196 = vmatpush1.msra.mxu0 %v1105_v62  ;;  %v927_v41 = vsel %vm611_vm12, %v2805_v36, %v3715_v46  ;;  %v925_v35 = vsel %vm611_vm12, %v2805_v36, %v3649_v58 }
 0x33d   : > { %v2070_v19 = vadd.f32 %v2066_v0, %v2010_v25  ;;  %v2071_v51 = vadd.f32 %v2067_v48, %v2011_v1  ;;  %1197 = vmatprep.subr.mxu0 %v1104_v54  ;;  %v1130_v54 = vsel %vm780_vm3, %v3687_v10, %v2781_v30  ;;  %v1128_v1 = vsel %vm780_vm3, %v3631_v8, %v2781_v30 }
 0x33e   : > { %1198 = vmatpush1.msra.mxu0 %v1103_v55  ;;  %v1486_v12 = vpop.permute.xlu0 %1485  ;;  %vm1690_vm0 = vcmask 777216   ;;  %vm1787_vm2 = vcmask 785408  }
 0x33f   : > { %v3861_v28 = vadd.f32 %v2070_v19, %v2020_v26  ;;  %v3863_v61 = vpop.permute.xlu1 %1575  ;;  %2349 = vmatprep.subr.msk.mxu0 %vm587_vm4, %v928_v6  ;;  %v1142_v6 = vld [vmem:[%s4331_s5 + $0x18] sm:$0xff]  ;;  %v1693_v26 = vsel %vm1690_vm0, %v3221_v23, %v3327_v20  ;;  %v4462_v23 = vld [vmem:[#allocation7_spill] sm:$0xff] }
 0x340   : > { %2350 = vmatpush1.msk.msra.mxu0 %vm586_vm6, %v927_v41  ;;  %v4488_v41 = vld [vmem:[#allocation21_spill] sm:$0xff] }
 0x341   : > { %2351 = vmatprep.subr.msk.mxu0 %vm587_vm4, %v3665_v14  ;;  %v923_v14 = vsel %vm611_vm12, %v2805_v36, %v3569_v2  ;;  %vm1472_vm12 = vcmask 15360  }
 0x342   : > { %2352 = vmatpush1.msk.msra.mxu0 %vm586_vm6, %v925_v35  ;;  %v1072_v47 = vpop.permute.xlu0 %1071 }
 0x343   : > { %v2015_v46 = vpop.permute.xlu1 %2014  ;;  %2353 = vmatprep.subr.msk.mxu0 %vm587_vm4, %v924_v42  ;;  %v1077_v53 = vsel %vm738_vm13, %v3737_v50, %v1072_v47  ;;  %v1078_v58 = vsel %vm738_vm13, %v1072_v47, %v2877_v24  ;;  %v1076_v50 = vsel %vm738_vm13, %v3674_v3, %v2877_v24  ;;  %v1495_v3 = vsel %vm669_vm10, %v2797_v33, %v3791_v29  ;;  %v1141_v42 = vld [vmem:[%s4331_s5 + $0x10] sm:$0xff] }
 0x344   : > { %v2017_v38 = vsel %vm4459_vm15, %v3771_v21, %v2015_v46  ;;  %2354 = vmatpush1.msk.msra.mxu0 %vm586_vm6, %v923_v14  ;;  %v1074_v21 = vsel %vm738_vm13, %v3619_v40, %v2877_v24  ;;  %v1144_v46 = vld [vmem:[%s4331_s5 + $0x28] sm:$0xff]  ;;  %vm1667_vm15 = vcmask 793600  }
 0x345   : > { %v2021_v16 = vsel %vm629_vm7, %v2017_v38, 0.0  ;;  %2355 = vmatprep.subr.msk.mxu0 %vm629_vm7, %v1078_v58  ;;  %v4463_v58 = vld [vmem:[#allocation19_spill] sm:$0xff]  ;;  %v4466_v38 = vld [vmem:[#allocation22_spill] sm:$0xff] }
 0x346   : > { %v3900_v11 = vadd.f32 %v2071_v51, %v2021_v16  ;;  %2356 = vmatpush2.msk.msra.mxu0 %vm628_vm9, %v1077_v53  ;;  %v3904_v36 = vpop.permute.xlu0 %1707  ;;  %vm4464_vm1 = vcmp.ge.s32.totalorder %v4463_v58, 0  ;;  %v4465_v14 = vld [vmem:[#allocation3_spill] sm:$0xff] }
 0x347   : > { %v1492_v2 = vpop.permute.xlu1 %1491  ;;  %2357 = vmatprep.subr.msk.mxu0 %vm629_vm7, %v1076_v50  ;;  %v1791_v16 = vsel %vm1787_vm2, %v4466_v38, %v4465_v14  ;;  %v4467_v50 = vld [vmem:[#allocation14_spill] sm:$0xff]  ;;  %v4490_v58 = vld [vmem:[#allocation27_spill] sm:$0xff] }
 0x348   : > { %v1496_v49 = vsel %vm669_vm10, %v3791_v29, %v1492_v2  ;;  %2358 = vmatpush2.msk.msra.mxu0 %vm628_vm9, %v3678_v52  ;;  %v1790_v2 = vsel %vm1787_vm2, %v4467_v50, %v4466_v38  ;;  %v4486_v50 = vld [vmem:[#allocation20_spill] sm:$0xff] }
 0x349   : > { %2359 = vmatprep.subr.msk.mxu0 %vm629_vm7, %v1074_v21  ;;  %2410 = vmatprep.subr.msk.mxu1 %vm587_vm4, %v1496_v49  ;;  %v4468_v21 = vld [vmem:[#allocation12_spill] sm:$0xff] }
 0x34a   : > { %2360 = vmatpush2.msk.msra.mxu0 %vm628_vm9, %v3625_v18  ;;  %2411 = vmatpush2.msk.msra.mxu1 %vm586_vm6, %v1495_v3  ;;  %v1126_v40 = vpop.permute.xlu0 %1125  ;;  %v1789_v49 = vsel %vm1787_vm2, %v4468_v21, %v4465_v14  ;;  %v4485_v14 = vld [vmem:[#allocation25_spill] sm:$0xff] }
 0x34b   : > { %v3928_v62 = vpop.permute.xlu1 %1571  ;;  %v1132_v52 = vsel %vm780_vm3, %v1126_v40, %v2781_v30  ;;  %v1131_v29 = vsel %vm780_vm3, %v3745_v43, %v1126_v40  ;;  %v1143_v40 = vld [vmem:[%s4331_s5 + $0x20] sm:$0xff] }
 0x34c   : > { %1221 = vmatprep.subr.mxu0 %v1132_v52 }
 0x34d   : > { %1222 = vmatpush2.msra.mxu0 %v1131_v29  ;;  %v4469_v29 = vld [vmem:[#allocation8_spill] sm:$0xff] }
 0x34e   : > { %1223 = vmatprep.subr.mxu0 %v1130_v54  ;;  %v1042_v18 = vpop.permute.xlu0 %1041  ;;  %v1788_v54 = vsel %vm1787_vm2, %v4469_v29, %v4468_v21  ;;  %vm1621_vm2 = vcmask 900096  }
 0x34f   : > { %v3937_v25 = vpop.permute.xlu1 %2024  ;;  %1224 = vmatpush2.msra.mxu0 %v3693_v27  ;;  %v1048_v43 = vsel %vm715_vm5, %v1042_v18, %v2787_v31  ;;  %v1047_v0 = vsel %vm715_vm5, %v3753_v13, %v1042_v18  ;;  %v1046_v27 = vsel %vm715_vm5, %v3701_v5, %v2787_v31  ;;  %v1493_v13 = vsel %vm669_vm10, %v2797_v33, %v1486_v12  ;;  %v1799_v18 = vld [vmem:[%s4333_s7 + $0x18] sm:$0xff] }
 0x350   : > { %1225 = vmatprep.subr.mxu0 %v1128_v1  ;;  %v4470_v1 = vld [vmem:[#allocation4_spill] sm:$0xff] }
 0x351   : > { %1226 = vmatpush2.msra.mxu0 %v3637_v39  ;;  %v1044_v39 = vsel %vm715_vm5, %v3633_v44, %v2787_v31 }
 0x352   : > { %2361 = vmatprep.subr.msk.mxu0 %vm587_vm4, %v1048_v43  ;;  %v3950_v10 = vpop.permute.xlu0 %1709  ;;  %v4471_v43 = vld [vmem:[#allocation24_spill] sm:$0xff] }
 0x353   : > { %v1488_v48 = vpop.permute.xlu1 %1487  ;;  %2362 = vmatpush2.msk.msra.mxu0 %vm586_vm6, %v1047_v0  ;;  %v1671_v0 = vsel %vm1667_vm15, %v4471_v43, %v4470_v1 }
 0x354   : > { %v1494_v8 = vsel %vm669_vm10, %v1486_v12, %v1488_v48  ;;  %2363 = vmatprep.subr.msk.mxu0 %vm587_vm4, %v1046_v27  ;;  %v4472_v27 = vld [vmem:[#allocation16_spill] sm:$0xff] }
 0x355   : > { %2412 = vmatprep.subr.msk.mxu1 %vm587_vm4, %v1494_v8  ;;  %2364 = vmatpush2.msk.msra.mxu0 %vm586_vm6, %v3709_v56  ;;  %v1016_v56 = vsel %vm692_vm8, %v3699_v7, %v2789_v32  ;;  %v1694_v7 = vsel %vm1690_vm0, %v3327_v20, %v3102_v37  ;;  %v1670_v48 = vsel %vm1667_vm15, %v4472_v27, %v4471_v43  ;;  %v4473_v8 = vld [vmem:[#allocation13_spill] sm:$0xff]  ;;  %v4495_v43 = vld [vmem:[#allocation31_spill] sm:$0xff]  ;;  %v4497_v27 = vld [vmem:[#allocation32_spill] sm:$0xff] }
 0x356   : > { %2413 = vmatpush2.msk.msra.mxu1 %vm586_vm6, %v1493_v13  ;;  %2365 = vmatprep.subr.msk.mxu0 %vm587_vm4, %v1044_v39  ;;  %v1012_v5 = vpop.permute.xlu0 %1011  ;;  %v1669_v39 = vsel %vm1667_vm15, %v4473_v8, %v4470_v1 }
 0x357   : > { %v3974_v19 = vpop.permute.xlu1 %1711  ;;  %v1017_v44 = vsel %vm692_vm8, %v3760_v45, %v1012_v5  ;;  %v1018_v51 = vsel %vm692_vm8, %v1012_v5, %v2789_v32  ;;  %2366 = vmatpush2.msk.msra.mxu0 %vm586_vm6, %v3641_v22  ;;  %v1139_v45 = vld [vmem:[%s4331_s5] sm:$0xff]  ;;  %v4475_v5 = vld [vmem:[#allocation9_spill] sm:$0xff] }
 0x358   : > { %2367 = vmatprep.subr.msk.mxu0 %vm629_vm7, %v1018_v51 }
 0x359   : > { %2368 = vmatpush2.msk.msra.mxu0 %vm628_vm9, %v1017_v44  ;;  %v1668_v44 = vsel %vm1667_vm15, %v4475_v5, %v4473_v8  ;;  %vm4482_vm15 = vmmov %vm4464_vm1 }
 0x35a   : > { %2369 = vmatprep.subr.msk.mxu0 %vm629_vm7, %v1016_v56  ;;  %v1471_v22 = vpop.permute.xlu0 %1470 }
 0x35b   : > { %v1469_v55 = vpop.permute.xlu1 %1468  ;;  %2370 = vmatpush2.msk.msra.mxu0 %vm628_vm9, %v3705_v15  ;;  %v4461_v15 = vld [vmem:[#allocation11_spill] sm:$0xff] }
 0x35c   : > { %v1476_v12 = vsel %vm1472_vm12, %v1469_v55, %v1471_v22  ;;  %1238 = vmatmul.mubr.f32.vlgmr.msra.gmra.mxu0 %v1139_v45  ;;  %2426 = vmatprep.subr.msk.mxu0 %vm629_vm7, %v1694_v7  ;;  %v1692_v35 = vsel %vm1690_vm0, %v4461_v15, %v3102_v37  ;;  %v1691_v20 = vsel %vm1690_vm0, %v4462_v23, %v4461_v15  ;;  %vm1644_vm0 = vcmask 801792   ;;  %v4476_v22 = vld [vmem:[#allocation6_spill] sm:$0xff] }
 0x35d   : > { %2414 = vmatprep.subr.msk.mxu1 %vm1259_vm14, %v1476_v12  ;;  %2427 = vmatpush1.msk.msra.mxu0 %vm628_vm9, %v1693_v26  ;;  %v4480_v12 = vld [vmem:[#allocation15_spill] sm:$0xff] }
 0x35e   : > { %2428 = vmatprep.subr.msk.mxu0 %vm629_vm7, %v1692_v35  ;;  %v1463_v47 = vpop.permute.xlu0 %1462  ;;  %2372 = vmatprep.mubr.msk.f32.mxu0 %vm1163_vm11, %v1142_v6  ;;  %v4478_v6 = vld [vmem:[#allocation17_spill] sm:$0xff]  ;;  %v1646_v15 = vsel %vm1644_vm0, %v4480_v12, %v4476_v22 }
 0x35f   : > { %v4025_v53 = vpop.permute.xlu1 %1705  ;;  %v1475_v37 = vsel %vm1472_vm12, %v1463_v47, %v1469_v55  ;;  %2429 = vmatpush1.msk.msra.mxu0 %vm628_vm9, %v1691_v20  ;;  %v4477_v55 = vld [vmem:[#allocation26_spill] sm:$0xff] }
 0x360   : > { %1244 = vmatmul.mubr.f32.gmra.mxu0 %v1141_v42  ;;  %2415 = vmatpush2.msk.msra.mxu1 %vm4464_vm1, %v1475_v37  ;;  %v1648_v7 = vsel %vm1644_vm0, %v4477_v55, %v4476_v22  ;;  %v1647_v26 = vsel %vm1644_vm0, %v4478_v6, %v4477_v55  ;;  %v4481_v42 = vld [vmem:[#allocation10_spill] sm:$0xff]  ;;  %v4501_v22 = vld [vmem:[#allocation36_spill] sm:$0xff] }
 0x361   : > { %1922 = vmatprep.subr.mxu0 %v1791_v16  ;;  %2373 = vmatprep.mubr.msk.f32.mxu0 %vm1163_vm11, %v1144_v46  ;;  %vm4474_vm11 = vcmask 130048   ;;  %v1645_v23 = vsel %vm1644_vm0, %v4481_v42, %v4480_v12  ;;  %v4484_v46 = vld [vmem:[#allocation23_spill] sm:$0xff]  ;;  %v2027_v16 = vsel %vm669_vm10, %v3832_v57, %v3937_v25  ;;  %vm1449_vm0 = vcmask 113664   ;;  %v4503_v12 = vld [vmem:[#allocation37_spill] sm:$0xff] }
 0x362   : > { %1923 = vmatpush1.msra.mxu0 %v1790_v2  ;;  %v4039_v3 = vpop.permute.xlu0 %2034  ;;  %v1624_v38 = vsel %vm1621_vm2, %v4485_v14, %v4484_v46  ;;  %v2031_v25 = vsel %vm587_vm4, %v2027_v16, 0.0  ;;  %v1581_v14 = vsel %vm715_vm5, %v3863_v61, %v4503_v12  ;;  %v1580_v61 = vsel %vm715_vm5, %v3812_v17, %v2787_v31 }
 0x363   : > { %v4044_v52 = vpop.permute.xlu1 %1703  ;;  %1924 = vmatprep.subr.mxu0 %v1789_v49  ;;  %v4491_v49 = vld [vmem:[#allocation28_spill] sm:$0xff]  ;;  %v2075_v5 = vadd.f32 %v3900_v11, %v2031_v25  ;;  %v4500_v11 = vld [vmem:[#allocation34_spill] sm:$0xff] }
 0x364   : > { %1925 = vmatpush1.msra.mxu0 %v1788_v54  ;;  %v1771_v55 = vsel %vm780_vm3, %v4501_v22, %v4500_v11 }
 0x365   : > { %1250 = vmatmul.mubr.f32.gmra.mxu0 %v1143_v40  ;;  %2430 = vmatprep.subr.msk.mxu0 %vm587_vm4, %v1671_v0  ;;  %v1622_v40 = vsel %vm1621_vm2, %v4491_v49, %v4490_v58 }
 0x366   : > { %2431 = vmatpush1.msk.msra.mxu0 %vm586_vm6, %v1670_v48  ;;  %v1467_v13 = vpop.permute.xlu0 %1466  ;;  %2454 = vmatprep.mubr.msk.f32.mxu0 %vm4474_vm11, %v1799_v18  ;;  %vm4487_vm11 = vcmp.lt.s32.totalorder %v4486_v50, 16  ;;  %v4494_v18 = vld [vmem:[#allocation29_spill] sm:$0xff]  ;;  %v1600_v48 = vsel %vm738_vm13, %v4497_v27, %v2877_v24 }
 0x367   : > { %v1465_v51 = vpop.permute.xlu1 %1464  ;;  %2432 = vmatprep.subr.msk.mxu0 %vm587_vm4, %v1669_v39  ;;  %v1602_v1 = vsel %vm738_vm13, %v4494_v18, %v2877_v24  ;;  %v1601_v0 = vsel %vm738_vm13, %v4495_v43, %v4494_v18  ;;  %v4498_v39 = vld [vmem:[#allocation33_spill] sm:$0xff] }
 0x368   : > { %v1473_v56 = vsel %vm1472_vm12, %v1463_v47, %v1465_v51  ;;  %v1474_v45 = vsel %vm1472_vm12, %v1465_v51, %v1467_v13  ;;  %2433 = vmatpush1.msk.msra.mxu0 %vm586_vm6, %v1668_v44  ;;  %vm4479_vm12 = vmmov %vm4464_vm1  ;;  %v4483_v47 = vld [vmem:[#allocation5_spill] sm:$0xff]  ;;  %v1599_v13 = vsel %vm738_vm13, %v4498_v39, %v4497_v27  ;;  %v2037_v44 = vsel %vm692_vm8, %v4039_v3, %v2789_v32 }
 0x369   : > { %2416 = vmatprep.subr.msk.mxu1 %vm1259_vm14, %v1474_v45  ;;  %2434 = vmatprep.subr.msk.mxu0 %vm1259_vm14, %v1648_v7  ;;  %v1625_v37 = vsel %vm1621_vm2, %v4484_v46, %v4483_v47  ;;  %v1623_v2 = vsel %vm1621_vm2, %v4490_v58, %v4483_v47  ;;  %v2026_v45 = vsel %vm669_vm10, %v2797_v33, %v3832_v57  ;;  %v2041_v33 = vsel %vm629_vm7, %v2037_v44, 0.0  ;;  %v4502_v57 = vld [vmem:[#allocation35_spill] sm:$0xff]  ;;  %v4504_v47 = vld [vmem:[#allocation2_spill] sm:$0xff] }
 0x36a   : > { %2417 = vmatpush2.msk.msra.mxu1 %vm4464_vm1, %v1473_v56  ;;  %2435 = vmatpush1.msk.msra.mxu0 %vm4479_vm12, %v1647_v26  ;;  %v4084_v35 = vpop.permute.xlu0 %2044  ;;  %vm4492_vm1 = vmmov %vm4487_vm11  ;;  %v1772_v32 = vsel %vm780_vm3, %v4500_v11, %v2781_v30  ;;  %v1770_v6 = vsel %vm780_vm3, %v4502_v57, %v2781_v30  ;;  %v1769_v42 = vsel %vm780_vm3, %v3776_v59, %v4502_v57  ;;  %vm1713_vm10 = vcmask 769024   ;;  %v1806_v11 = vld [vmem:[%s4333_s7 + $0x50] sm:$0xff]  ;;  %v1801_v57 = vld [vmem:[%s4333_s7 + $0x28] sm:$0xff] }
 0x36b   : > { %v2033_v20 = vpop.permute.xlu1 %2032  ;;  %2436 = vmatprep.subr.msk.mxu0 %vm1259_vm14, %v1646_v15  ;;  %vm4489_vm14 = vcmp.lt.s32.totalorder %v4488_v41, 16  ;;  %vm4496_vm2 = vmmov %vm4492_vm1  ;;  %v2047_v7 = vsel %vm715_vm5, %v4084_v35, %v2787_v31  ;;  %v1582_v15 = vsel %vm715_vm5, %v4503_v12, %v2787_v31  ;;  %v2077_v46 = vadd.f32 %v2075_v5, %v4504_v47  ;;  %v1807_v41 = vld [vmem:[%s4333_s7 + $0x58] sm:$0xff]  ;;  %v1804_v12 = vld [vmem:[%s4333_s7 + $0x40] sm:$0xff] }
 0x36c   : > { %2437 = vmatpush1.msk.msra.mxu0 %vm4482_vm15, %v1645_v23  ;;  %vm4493_vm12 = vmmov %vm4489_vm14  ;;  %v2030_v23 = vsel %vm586_vm6, %v2026_v45, 0.0  ;;  %v1716_v60 = vsel %vm1713_vm10, %v3950_v10, %v3974_v19  ;;  %v1798_v10 = vld [vmem:[%s4333_s7 + $0x10] sm:$0xff] }
 0x36d   : > { %2438 = vmatprep.subr.msk.mxu0 %vm4487_vm11, %v1625_v37  ;;  %vm4499_vm15 = vmmov %vm4493_vm12  ;;  %v2074_v59 = vadd.f32 %v3861_v28, %v2030_v23 }
 0x36e   : > { %2439 = vmatpush1.msk.msra.mxu0 %vm4489_vm14, %v1624_v38  ;;  %v1448_v21 = vpop.permute.xlu0 %1447  ;;  %v2051_v38 = vsel %vm587_vm4, %v2047_v7, 0.0  ;;  %vm4505_vm11 = vmmov %vm4492_vm1  ;;  %vm4512_vm14 = vcmask 130048  }
 0x36f   : > { %v1446_v29 = vpop.permute.xlu1 %1445  ;;  %2440 = vmatprep.subr.msk.mxu0 %vm4492_vm1, %v1623_v2  ;;  %v2079_v2 = vadd.f32 %v2077_v46, %v2041_v33  ;;  %v1796_v33 = vld [vmem:[%s4333_s7] sm:$0xff] }
 0x370   : > { %v1453_v54 = vsel %vm1449_vm0, %v1446_v29, %v1448_v21  ;;  %2441 = vmatpush1.msk.msra.mxu0 %vm4493_vm12, %v1622_v40  ;;  %v2036_v21 = vsel %vm692_vm8, %v2033_v20, %v4039_v3  ;;  %v1579_v3 = vsel %vm715_vm5, %v3928_v62, %v3812_v17  ;;  %vm4510_vm8 = vmmov %vm4492_vm1 }
 0x371   : > { %2418 = vmatprep.subr.msk.mxu1 %vm4496_vm2, %v1453_v54  ;;  %2442 = vmatprep.subr.msk.mxu0 %vm629_vm7, %v1602_v1  ;;  %v2081_v20 = vadd.f32 %v2079_v2, %v2051_v38  ;;  %v2040_v25 = vsel %vm628_vm9, %v2036_v21, 0.0 }
 0x372   : > { %2443 = vmatpush1.msk.msra.mxu0 %vm628_vm9, %v1601_v0  ;;  %v1440_v8 = vpop.permute.xlu0 %1439 }
 0x373   : > { %v2043_v51 = vpop.permute.xlu1 %2042  ;;  %2444 = vmatprep.subr.msk.mxu0 %vm629_vm7, %v1600_v48  ;;  %v1452_v56 = vsel %vm1449_vm0, %v1440_v8, %v1446_v29  ;;  %v1717_v29 = vsel %vm1713_vm10, %v3974_v19, %v3904_v36  ;;  %v1714_v19 = vsel %vm1713_vm10, %v4044_v52, %v4025_v53 }
 0x374   : > { %2445 = vmatpush1.msk.msra.mxu0 %vm628_vm9, %v1599_v13  ;;  %2419 = vmatpush2.msk.msra.mxu1 %vm4499_vm15, %v1452_v56  ;;  %v2046_v49 = vsel %vm715_vm5, %v2043_v51, %v4084_v35 }
 0x375   : > { %1942 = vmatprep.subr.mxu0 %v1772_v32  ;;  %v2050_v18 = vsel %vm586_vm6, %v2046_v49, 0.0 }
 0x376   : > { %1943 = vmatpush1.msra.mxu0 %v1771_v55  ;;  %v1444_v26 = vpop.permute.xlu0 %1443 }
 0x377   : > { %v1442_v37 = vpop.permute.xlu1 %1441  ;;  %1944 = vmatprep.subr.mxu0 %v1770_v6  ;;  %v4520_v6 = vmov 0.0  }
 0x378   : > { %v1450_v16 = vsel %vm1449_vm0, %v1440_v8, %v1442_v37  ;;  %v1451_v58 = vsel %vm1449_vm0, %v1442_v37, %v1444_v26  ;;  %1945 = vmatpush1.msra.mxu0 %v1769_v42  ;;  %vm4506_vm0 = vmmov %vm4493_vm12  ;;  %v2097_v26 = vld [vmem:[%s4335_s9 + $0x8] sm:$0xff] }
 0x379   : > { %2420 = vmatprep.subr.msk.mxu1 %vm4505_vm11, %v1451_v58  ;;  %2446 = vmatprep.subr.msk.mxu0 %vm587_vm4, %v1582_v15  ;;  %vm4509_vm5 = vmmov %vm4506_vm0  ;;  %v2098_v15 = vld [vmem:[%s4335_s9 + $0x10] sm:$0xff] }
 0x37a   : > { %2421 = vmatpush2.msk.msra.mxu1 %vm4506_vm0, %v1450_v16  ;;  %2447 = vmatpush1.msk.msra.mxu0 %vm586_vm6, %v1581_v14  ;;  %v2055_v28 = vpop.permute.xlu0 %2054 }
 0x37b   : > { %v2085_v40 = vpop.permute.xlu1 %2084  ;;  %2448 = vmatprep.subr.msk.mxu0 %vm587_vm4, %v1580_v61  ;;  %v2057_v31 = vsel %vm738_vm13, %v2055_v28, %v2877_v24  ;;  %v4507_v24 = vld [vmem:[#allocation30_spill] sm:$0xff]  ;;  %vm4508_vm4 = vmmov %vm4492_vm1  ;;  %vm4513_vm1 = vcmask 1043456  }
 0x37c   : > { %v2087_v17 = vsel %vm780_vm3, %v2085_v40, %v2781_v30  ;;  %v2061_v62 = vsel %vm629_vm7, %v2057_v31, 0.0  ;;  %2449 = vmatpush1.msk.msra.mxu0 %vm586_vm6, %v1579_v3  ;;  %v2076_v35 = vadd.f32 %v4507_v24, %v2074_v59  ;;  %v1715_v30 = vsel %vm1713_vm10, %v4025_v53, %v3904_v36  ;;  %vm4511_vm6 = vmmov %vm4506_vm0  ;;  %v1802_v53 = vld [vmem:[%s4333_s7 + $0x30] sm:$0xff] }
 0x37d   : > { %v2091_v54 = vadd.f32 %v2087_v17, %v2081_v20  ;;  %2450 = vmatprep.subr.msk.mxu0 %vm4508_vm4, %v1717_v29  ;;  %vm4519_vm10 = vmmov %vm4513_vm1 }
 0x37e   : > { %2451 = vmatpush2.msk.msra.mxu0 %vm4509_vm5, %v1716_v60  ;;  %v1424_v1 = vpop.permute.xlu0 %1423  ;;  %v2078_v43 = vadd.f32 %v2076_v35, %v2040_v25 }
 0x37f   : > { %v2093_v0 = vadd.f32 %v2091_v54, %v2061_v62  ;;  %v2083_v27 = vpop.permute.xlu1 %2082  ;;  %2452 = vmatprep.subr.msk.mxu0 %vm4510_vm8, %v1715_v30 }
 0x380   : > { %v2086_v36 = vsel %vm780_vm3, %v2083_v27, %v2085_v40  ;;  %2453 = vmatpush2.msk.msra.mxu0 %vm4511_vm6, %v1714_v19  ;;  %v2080_v48 = vadd.f32 %v2078_v43, %v2050_v18  ;;  %vm4514_vm3 = vcmask 121856  }
 0x381   : > { %v2095_v8 = vmul.f32 0.11111111, %v2093_v0  ;;  %1983 = vmatmul.mubr.f32.vlgmr.msra.gmra.mxu0 %v1798_v10  ;;  %vm4515_vm12 = vmmov %vm4514_vm3 }
 0x382   : > { %v2053_v39 = vpop.permute.xlu0 %2052  ;;  %2455 = vmatprep.mubr.msk.f32.mxu0 %vm4512_vm14, %v1803_v63  ;;  %v2090_v52 = vadd.f32 %v2086_v36, %v2080_v48  ;;  %v1429_v51 = vsel %vm4515_vm12, %v2799_v34, %v1424_v1  ;;  %vm4517_vm2 = vmmov %vm4514_vm3 }
 0x383   : > { %v1426_v50 = vpop.permute.xlu1 %1425  ;;  %2457 = vmatprep.subr.msk.mxu0 %vm4513_vm1, %v2095_v8  ;;  %v2056_v13 = vsel %vm738_vm13, %v2053_v39, %v2055_v28  ;;  %vm4516_vm13 = vmmov %vm4512_vm14 }
 0x384   : > { %v1430_v5 = vsel %vm4514_vm3, %v1424_v1, %v1426_v50  ;;  %v2060_v44 = vsel %vm628_vm9, %v2056_v13, 0.0  ;;  %vm4518_vm15 = vmmov %vm4517_vm2 }
 0x385   : > { %v2092_v56 = vadd.f32 %v2090_v52, %v2060_v44  ;;  %2422 = vmatprep.subr.msk.mxu1 %vm629_vm7, %v1430_v5  ;;  %1989 = vmatmul.mubr.f32.gmra.mxu0 %v1802_v53 }
 0x386   : > { %2423 = vmatpush2.msk.msra.mxu1 %vm628_vm9, %v1429_v51  ;;  %v1422_v45 = vpop.permute.xlu0 %1421  ;;  %2456 = vmatprep.mubr.msk.f32.mxu0 %vm4516_vm13, %v1807_v41 }
 0x387   : > { %v2094_v32 = vmul.f32 0.11111111, %v2092_v56  ;;  %v1420_v22 = vpop.permute.xlu1 %1419 }
 0x388   : > { %v1427_v55 = vsel %vm4517_vm2, %v2799_v34, %v1420_v22  ;;  %v1428_v7 = vsel %vm4518_vm15, %v1420_v22, %v1422_v45  ;;  %v2096_v34 = vld [vmem:[%s4335_s9] sm:$0xff] }
 0x389   : > { %2424 = vmatprep.subr.msk.mxu1 %vm629_vm7, %v1428_v7  ;;  %1995 = vmatmul.mubr.f32.gmra.mxu0 %v1806_v11  ;;  %vm4521_vm7 = vcmask 31744  }
 0x38a   : > { %2425 = vmatpush2.msk.msra.mxu1 %vm628_vm9, %v1427_v55  ;;  %2458 = vmatpush1.msk.msra.mxu0 %vm4519_vm10, %v2094_v32  ;;  %vm4522_vm9 = vmmov %vm4521_vm7 }
 0x38b   : > { %1900 = vmatmul.mubr.f32.vlgmr.msra.gmra.mxu1 %v1796_v33  ;;  %2196 = vmatprep.mubr.f32.mxu0 %v4520_v6  ;;  %vm4523_vm11 = vmmov %vm4521_vm7 }
 0x38c   : > { %1905 = vmatprep.mubr.f32.mxu1 %v1801_v57 }
 0x38d   : > { %2459 = vmatmul.mubr.msk.f32.vlgmr.msra.gmra.mxu0 %vm4521_vm7, %v2096_v34 }
 0x38e   : > { %2202 = vmatprep.mubr.f32.mxu0 %v4520_v6 }
 0x38f   : > { %1906 = vmatmul.mubr.f32.gmra.mxu1 %v1800_v4 }
 0x390   : > { %1911 = vmatprep.mubr.f32.mxu1 %v1805_v9 }
 0x391   : > { %2460 = vmatmul.mubr.msk.f32.gmra.mxu0 %vm4522_vm9, %v2097_v26 }
 0x392   : > { %2208 = vmatprep.mubr.f32.mxu0 %v4520_v6 }
 0x393   : > { %1912 = vmatmul.mubr.f32.gmra.mxu1 %v1804_v12  ;;  %v1819_v23 = vpop.permute.xlu0 %1818 }
 0x394   : > { %v1814_v42 = vpop.permute.xlu1 %1813 }
 0x395   : > { %2461 = vmatmul.mubr.msk.f32.gmra.mxu0 %vm4523_vm11, %v2098_v15 }
 0x397   : > { %v1151_v46 = vpop.permute.xlu0 %1150 }
 0x398   : > { %v4301_v47 = vpop.permute.xlu1 %1823 }
 0x39b   : > { %v1161_v28 = vpop.permute.xlu0 %1160 }
 0x39c   : > { %v1156_v58 = vpop.permute.xlu1 %1155 }
 0x39f   : > { %v2110_v27 = vpop.permute.xlu0 %2109 }
 0x3a0   : > { %v2105_v35 = vpop.permute.xlu1 %2104 }
 0x3a4   : > { %v2115_v5 = vpop.permute.xlu1 %2114 }
 0x41c   : > { %v1239_v37 = vpop.f32.mrf.mxu0 }
 0x41d   : > { %v1240_v14 = vadd.f32 %v1239_v37, %v1151_v46 }
 0x41e   : > { %v1241_v38 = vpop.f32.mrf.mxu0 }
 0x41f   : > { %2215 = vst [vmem:[%s3001_s30] sm:$0xff] %v1240_v14  ;;  %v1242_v16 = vadd.f32 %v1241_v38, %v1151_v46 }
 0x420   : > { %v1245_v59 = vpop.f32.mrf.mxu0 }
 0x421   : > { %2216 = vst [vmem:[%s3001_s30 + $0x8] sm:$0xff] %v1242_v16  ;;  %v1246_v2 = vadd.f32 %v1245_v59, %v1156_v58 }
 0x422   : > { %v1247_v21 = vpop.f32.mrf.mxu0 }
 0x423   : > { %2217 = vst [vmem:[%s3001_s30 + $0x10] sm:$0xff] %v1246_v2  ;;  %v1248_v61 = vadd.f32 %v1247_v21, %v1156_v58 }
 0x425   : > { %2218 = vst [vmem:[%s3001_s30 + $0x18] sm:$0xff] %v1248_v61  ;;  %v1251_v3 = vpop.f32.mrf.mxu0 }
 0x426   : > { %v1252_v20 = vadd.f32 %v1251_v3, %v1161_v28 }
 0x427   : > { %v1253_v49 = vpop.f32.mrf.mxu0 }
 0x428   : > { %2219 = vst [vmem:[%s3001_s30 + $0x20] sm:$0xff] %v1252_v20  ;;  %v1254_v40 = vadd.f32 %v1253_v49, %v1161_v28 }
 0x42a   : > { %2220 = vst [vmem:[%s3001_s30 + $0x28] sm:$0xff] %v1254_v40 }
 0x441   : > { %v1984_v31 = vpop.f32.mrf.mxu0 }
 0x443   : > { %v1986_v29 = vpop.f32.mrf.mxu0 }
 0x445   : > { %v1990_v25 = vpop.f32.mrf.mxu0 }
 0x447   : > { %v1992_v17 = vpop.f32.mrf.mxu0 }
 0x449   : > { %v1996_v62 = vpop.f32.mrf.mxu0 }
 0x44b   : > { %v1901_v60 = vpop.f32.mrf.mxu1  ;;  %v1998_v24 = vpop.f32.mrf.mxu0 }
 0x44c   : > { %v1902_v54 = vadd.f32 %v1901_v60, %v1814_v42 }
 0x44d   : > { %v1903_v30 = vpop.f32.mrf.mxu1  ;;  %v2198_v18 = vpop.f32.mrf.mxu0 }
 0x44e   : > { %v1985_v1 = vadd.f32 %v1984_v31, %v1902_v54  ;;  %v1904_v10 = vadd.f32 %v1903_v30, %v1814_v42  ;;  %v2199_v19 = vadd.f32 %v2198_v18, %v2105_v35 }
 0x44f   : > { %v1907_v43 = vpop.f32.mrf.mxu1  ;;  %v2200_v0 = vpop.f32.mrf.mxu0 }
 0x450   : > { %2221 = vst [vmem:[%s3001_s30 + $0x30] sm:$0xff] %v1985_v1  ;;  %v1987_v63 = vadd.f32 %v1986_v29, %v1904_v10  ;;  %2231 = vst [vmem:[%s3001_s30 + $0x80] sm:$0xff] %v2199_v19  ;;  %v1908_v36 = vadd.f32 %v1907_v43, %v1819_v23  ;;  %v2201_v48 = vadd.f32 %v2200_v0, %v2105_v35 }
 0x451   : > { %v1909_v8 = vpop.f32.mrf.mxu1  ;;  %v2204_v39 = vpop.f32.mrf.mxu0 }
 0x452   : > { %2222 = vst [vmem:[%s3001_s30 + $0x38] sm:$0xff] %v1987_v63  ;;  %v1991_v53 = vadd.f32 %v1990_v25, %v1908_v36  ;;  %2232 = vst [vmem:[%s3001_s30 + $0x88] sm:$0xff] %v2201_v48  ;;  %v1910_v52 = vadd.f32 %v1909_v8, %v1819_v23  ;;  %v2205_v50 = vadd.f32 %v2204_v39, %v2110_v27 }
 0x453   : > { %v1913_v13 = vpop.f32.mrf.mxu1  ;;  %v2206_v41 = vpop.f32.mrf.mxu0 }
 0x454   : > { %2223 = vst [vmem:[%s3001_s30 + $0x40] sm:$0xff] %v1991_v53  ;;  %v1993_v44 = vadd.f32 %v1992_v17, %v1910_v52  ;;  %2233 = vst [vmem:[%s3001_s30 + $0x90] sm:$0xff] %v2205_v50  ;;  %v1914_v51 = vadd.f32 %v1913_v13, %v4301_v47  ;;  %v2207_v56 = vadd.f32 %v2206_v41, %v2110_v27 }
 0x455   : > { %v1915_v45 = vpop.f32.mrf.mxu1  ;;  %v2210_v11 = vpop.f32.mrf.mxu0 }
 0x456   : > { %2224 = vst [vmem:[%s3001_s30 + $0x48] sm:$0xff] %v1993_v44  ;;  %v1997_v32 = vadd.f32 %v1996_v62, %v1914_v51  ;;  %2234 = vst [vmem:[%s3001_s30 + $0x98] sm:$0xff] %v2207_v56  ;;  %v1916_v22 = vadd.f32 %v1915_v45, %v4301_v47  ;;  %v2211_v55 = vadd.f32 %v2210_v11, %v2115_v5 }
 0x457   : > { %v2212_v7 = vpop.f32.mrf.mxu0 }
 0x458   : > { %2225 = vst [vmem:[%s3001_s30 + $0x50] sm:$0xff] %v1997_v32  ;;  %v1999_v33 = vadd.f32 %v1998_v24, %v1916_v22  ;;  %2235 = vst [vmem:[%s3001_s30 + $0xa0] sm:$0xff] %v2211_v55  ;;  %v2213_v57 = vadd.f32 %v2212_v7, %v2115_v5 }
 0x45a   : > { %2226 = vst [vmem:[%s3001_s30 + $0x58] sm:$0xff] %v1999_v33  ;;  %2236 = vst [vmem:[%s3001_s30 + $0xa8] sm:$0xff] %v2213_v57 }
 0x45b PF: > { %s21_s17 = sadd.s32 1, %s2510_s17  }
 0x45c   : > { %p18_p4 = scmp.ge.s32.totalorder %s21_s17, 4  }
 0x45e   :  { %20 = sbr.rel (!%p18_p4) target bundleno = 1 (0x1), region = 94 }

</bundles_post_ra>
